<compile_context>
chip_gen: v7x
topology: tpu7x:2x2x1
jax: 0.10.0
libtpu: 0.0.40
codegen_flags: <defaults>
</compile_context>

<pallas_src>
import math
import numpy as np

import jax
import jax.numpy as jnp
from jax import lax
from jax.experimental import pallas as pl
from jax.experimental.pallas import tpu as pltpu

ENC_SIZE = 32
N_LATENT = 16          # even, so the Bessel orders d/2, d/2+1 are integers
BATCH = 8
KAPPA = 100.0
BN_EPS = 1e-4
ATTEMPTS = 24          # fixed trip count; per-attempt accept ~0.66 -> miss ~0.34^24
TWO_PI = 2.0 * math.pi
INV_TWO_PI = 1.0 / TWO_PI

# Best & Fisher proposal constants (compile-time scalars).
_TAU = 1.0 + math.sqrt(1.0 + 4.0 * KAPPA * KAPPA)
_RHO = (_TAU - math.sqrt(2.0 * _TAU)) / (2.0 * KAPPA)
_PROPOSAL_R = (1.0 + _RHO * _RHO) / (2.0 * _RHO)


# ----------------------------------------------------------------------------
# Host-side glue: scipy-free / np.trapz-free vMF KLD constant (_vmf_kld)
# ----------------------------------------------------------------------------
def _vmf_kld(k: float, d: float) -> float:
    # I_v(x) = (1/pi) * \int_0^pi exp(x cos t) cos(v t) dt   (integer order v)
    theta = np.linspace(0.0, np.pi, 200001)
    h = float(theta[1] - theta[0])

    def iv(v, x):  # manual trapezoid rule (np.trapz removed in numpy >= 2.0)
        y = np.exp(x * np.cos(theta)) * np.cos(v * theta)
        return (h * (np.sum(y) - 0.5 * (y[0] + y[-1]))) / np.pi

    iv_a = iv(d / 2.0, k)
    iv_b = iv(d / 2.0 + 1.0, k)
    return float(
        k * ((iv_b + iv_a * d / (2.0 * k)) / iv_a - d / (2.0 * k))
        + d * np.log(k) / 2.0
        - np.log(iv_a)
        - math.lgamma(d / 2.0 + 1.0)
        - d * np.log(2.0) / 2.0
    )


# ----------------------------------------------------------------------------
# In-kernel math helpers (pure element-wise; no reliance on trig lowering)
# ----------------------------------------------------------------------------
def _sin_halfpi(x):
    # Taylor sin(x) for |x| <= pi/2 (abs err < 4e-6, plenty for a sampler)
    x2 = x * x
    return x * (1.0 + x2 * (-1.0 / 6.0 + x2 * (1.0 / 120.0
              + x2 * (-1.0 / 5040.0 + x2 * (1.0 / 362880.0)))))


def _acos_poly(x):
    # Abramowitz & Stegun 4.4.46 (|err| <= 2e-8 on [0,1]); x is in [-1, 1]
    ax = jnp.abs(x)
    p = (1.5707963050 + ax * (-0.2145988016 + ax * (0.0889789874
        + ax * (-0.0501743046 + ax * (0.0308918810 + ax * (-0.0170881256
        + ax * (0.0066700901 + ax * (-0.0012624911))))))))
    r = jnp.sqrt(jnp.maximum(1.0 - ax, 0.0)) * p
    return jnp.where(x < 0.0, math.pi - r, r)


# ----------------------------------------------------------------------------
# Pallas kernel: Linear + BatchNorm1d(train) + Softplus + VonMises sampling
# ----------------------------------------------------------------------------
def _vonmises_fwd_kernel(x_ref, w_ref, p_ref, u_ref, z_ref):
    bias = p_ref[0:1, :]
    gamma = p_ref[1:2, :]
    beta = p_ref[2:3, :]

    # --- Linear: mu = x @ W + b (MXU; one padded vmatmul at this size) ---
    mu = jnp.dot(x_ref[...], w_ref[...], preferred_element_type=jnp.float32) + bias

    # --- BatchNorm1d, training mode (biased batch stats), eps = 1e-4 ---
    # TODO(synk): running_mean/running_var (momentum=0.8) buffers are not updated here.
    mean = jnp.mean(mu, axis=0, keepdims=True)
    ctr = mu - mean
    var = jnp.mean(ctr * ctr, axis=0, keepdims=True)          # two-pass: no cancellation
    mu_bn = ctr * lax.rsqrt(var + BN_EPS) * gamma + beta

    # --- Softplus (torch defaults: beta=1, threshold=20) ---
    loc = jnp.where(mu_bn > 20.0, mu_bn,
                    jnp.log(1.0 + jnp.exp(jnp.minimum(mu_bn, 20.0))))

    # --- VonMises(loc, kappa): Best & Fisher rejection, fixed unrolled trip count ---
    x_acc = jnp.zeros_like(loc)
    done = jnp.zeros(loc.shape, jnp.bool_)
    for a in range(ATTEMPTS):                                  # static unroll, no branches
        u1 = u_ref[a, 0]                                       # (B, L) uniform [0, 1)
        u2 = u_ref[a, 1]                                       # (B, L) uniform [0, 1)
        sgn = u_ref[a, 2]                                      # (B, L) +/- 1 (precomputed)
        z = -_sin_halfpi(math.pi * (u1 - 0.5))                 # == cos(pi * u1)
        f = (1.0 + _PROPOSAL_R * z) / (_PROPOSAL_R + z)
        c = KAPPA * (_PROPOSAL_R - f)
        # fast test: c*(2-c) > u2 ; slow test: log(c/u2)+1-c >= 0  <=>  c*exp(1-c) >= u2
        accept = (c * (2.0 - c) > u2) | (c * jnp.exp(1.0 - c) >= u2)
        newly = accept & jnp.logical_not(done)
        x_acc = jnp.where(newly, sgn * _acos_poly(f), x_acc)
        done = done | accept
    # Elements that exhaust all attempts (prob ~6e-12/elem at kappa=100) keep
    # x_acc = 0, i.e. emit (pi + loc) mod 2pi - pi.

    # (x + pi + loc) % (2*pi) - pi   (floor-mod, as Python/torch %)
    y = x_acc + math.pi + loc
    z_ref[...] = y - TWO_PI * jnp.floor(y * INV_TWO_PI) - math.pi


# ----------------------------------------------------------------------------
# Wrapper
# ----------------------------------------------------------------------------
def vonmises_forward(data, w, b, gamma, beta, kld_scalar, rng_key, batch_size):
    B, E = data.shape
    L = w.shape[1]
    params = jnp.stack([b, gamma, beta], axis=0)               # single (3, L) VMEM input

    # Rejection-sampler randoms, generated once outside the kernel:
    #   channel 0/1 : u1, u2 ~ U[0, 1)
    #   channel 2   : +/- 1 sign, precomputed from u3 (sign(u3 - 0.5))
    u = jax.random.uniform(rng_key, (ATTEMPTS, 3, B, L), jnp.float32)
    rand = jnp.concatenate(
        [u[:, 0:2], jnp.where(u[:, 2:3] >= 0.5, 1.0, -1.0)], axis=1)

    flops = 2 * B * E * L + B * L * (ATTEMPTS * 20 + 40)
    transcendentals = B * L * (2 * ATTEMPTS + 3)
    bytes_accessed = 4 * (B * E + E * L + 3 * L + ATTEMPTS * 3 * B * L + B * L)

    z_p = pl.pallas_call(
        _vonmises_fwd_kernel,
        out_shape=jax.ShapeDtypeStruct((B, L), jnp.float32),
        in_specs=[
            pl.BlockSpec(memory_space=pltpu.MemorySpace.VMEM),   # data     (B, E)
            pl.BlockSpec(memory_space=pltpu.MemorySpace.VMEM),   # W        (E, L)
            pl.BlockSpec(memory_space=pltpu.MemorySpace.VMEM),   # [b;g;be] (3, L)
            pl.BlockSpec(memory_space=pltpu.MemorySpace.VMEM),   # uniforms (A, 3, B, L)
        ],
        out_specs=pl.BlockSpec(memory_space=pltpu.MemorySpace.VMEM),
        cost_estimate=pl.CostEstimate(flops=flops,
                                      transcendentals=transcendentals,
                                      bytes_accessed=bytes_accessed),
    )(data, w, params, rand)

    # kld_v.expand(batch_size)  (scalar constant broadcast; kept in float32)
    kld = jnp.broadcast_to(jnp.asarray(kld_scalar, jnp.float32), (batch_size,))
    return z_p, kld


if __name__ == "__main__":
    key = jax.random.PRNGKey(0)
    k_data, k_w, k_b, k_u = jax.random.split(key, 4)

    data = jax.random.normal(k_data, (BATCH, ENC_SIZE), jnp.float32)

    # Deterministic parameter init (nn.Linear-style uniform; BN gamma=1, beta=0)
    bound = 1.0 / math.sqrt(ENC_SIZE)
    w = jax.random.uniform(k_w, (ENC_SIZE, N_LATENT), jnp.float32, -bound, bound)
    b = jax.random.uniform(k_b, (N_LATENT,), jnp.float32, -bound, bound)
    gamma = jnp.ones((N_LATENT,), jnp.float32)
    beta = jnp.zeros((N_LATENT,), jnp.float32)

    kld_scalar = _vmf_kld(KAPPA, float(N_LATENT))

    z_p, kld = vonmises_forward(data, w, b, gamma, beta, kld_scalar, k_u, BATCH)
    z_p = jax.block_until_ready(z_p)
    kld = jax.block_until_ready(kld)

    assert z_p.shape == (BATCH, N_LATENT) and z_p.dtype == jnp.float32
    assert kld.shape == (BATCH,)
    assert bool(jnp.all(jnp.isfinite(z_p)))
    assert bool(jnp.all((z_p >= -math.pi - 1e-4) & (z_p <= math.pi + 1e-4)))
    print("KERNEL_OK")
</pallas_src>

<mosaic_0001>
module attributes {stable_mosaic.version = 11 : i64} {
  func.func @_vonmises_fwd_kernel(%arg0: memref<8x32xf32, #tpu.memory_space<vmem>>, %arg1: memref<32x16xf32, #tpu.memory_space<vmem>>, %arg2: memref<3x16xf32, #tpu.memory_space<vmem>>, %arg3: memref<24x3x8x16xf32, #tpu.memory_space<vmem>>, %arg4: memref<8x16xf32, #tpu.memory_space<vmem>>) attributes {dimension_semantics = [], scalar_prefetch = 0 : i64, scratch_operands = 0 : i64, tpu.core_type = #tpu.core_type<tc>} {
    %c0 = arith.constant 0 : index
    %c0_0 = arith.constant 0 : index
    %0 = vector.load %arg2[%c0, %c0_0] : memref<3x16xf32, #tpu.memory_space<vmem>>, vector<1x16xf32>
    %c1 = arith.constant 1 : index
    %c0_1 = arith.constant 0 : index
    %1 = vector.load %arg2[%c1, %c0_1] : memref<3x16xf32, #tpu.memory_space<vmem>>, vector<1x16xf32>
    %c2 = arith.constant 2 : index
    %c0_2 = arith.constant 0 : index
    %2 = vector.load %arg2[%c2, %c0_2] : memref<3x16xf32, #tpu.memory_space<vmem>>, vector<1x16xf32>
    %c0_3 = arith.constant 0 : index
    %c0_4 = arith.constant 0 : index
    %3 = vector.load %arg0[%c0_3, %c0_4] : memref<8x32xf32, #tpu.memory_space<vmem>>, vector<8x32xf32>
    %c0_5 = arith.constant 0 : index
    %c0_6 = arith.constant 0 : index
    %4 = vector.load %arg1[%c0_5, %c0_6] : memref<32x16xf32, #tpu.memory_space<vmem>>, vector<32x16xf32>
    %cst = arith.constant dense<0.000000e+00> : vector<8x16xf32>
    %5 = tpu.matmul %3, %4, %cst {dimension_numbers = #tpu.dot_dimension_numbers<[1], [0], [0], [1], [0, 0, 1, 1], [], []>} : vector<8x32xf32>, vector<32x16xf32>, vector<8x16xf32> -> vector<8x16xf32>
    %6 = vector.broadcast %0 : vector<1x16xf32> to vector<8x16xf32>
    %7 = arith.addf %5, %6 : vector<8x16xf32>
    %cst_7 = arith.constant dense<0.000000e+00> : vector<16xf32>
    %8 = vector.multi_reduction <add>, %7, %cst_7 [0] : vector<8x16xf32> to vector<16xf32>
    %9 = vector.shape_cast %8 : vector<16xf32> to vector<1x16xf32>
    %cst_8 = arith.constant 8.000000e+00 : f32
    %10 = vector.broadcast %cst_8 : f32 to vector<1x16xf32>
    %11 = arith.divf %9, %10 : vector<1x16xf32>
    %12 = vector.broadcast %11 : vector<1x16xf32> to vector<8x16xf32>
    %13 = arith.subf %7, %12 : vector<8x16xf32>
    %14 = arith.mulf %13, %13 : vector<8x16xf32>
    %cst_9 = arith.constant dense<0.000000e+00> : vector<16xf32>
    %15 = vector.multi_reduction <add>, %14, %cst_9 [0] : vector<8x16xf32> to vector<16xf32>
    %16 = vector.shape_cast %15 : vector<16xf32> to vector<1x16xf32>
    %cst_10 = arith.constant 8.000000e+00 : f32
    %17 = vector.broadcast %cst_10 : f32 to vector<1x16xf32>
    %18 = arith.divf %16, %17 : vector<1x16xf32>
    %cst_11 = arith.constant 9.99999974E-5 : f32
    %19 = vector.broadcast %cst_11 : f32 to vector<1x16xf32>
    %20 = arith.addf %18, %19 : vector<1x16xf32>
    %21 = math.rsqrt %20 : vector<1x16xf32>
    %22 = vector.broadcast %21 : vector<1x16xf32> to vector<8x16xf32>
    %23 = arith.mulf %13, %22 : vector<8x16xf32>
    %24 = vector.broadcast %1 : vector<1x16xf32> to vector<8x16xf32>
    %25 = arith.mulf %23, %24 : vector<8x16xf32>
    %26 = vector.broadcast %2 : vector<1x16xf32> to vector<8x16xf32>
    %27 = arith.addf %25, %26 : vector<8x16xf32>
    %cst_12 = arith.constant 2.000000e+01 : f32
    %28 = vector.broadcast %cst_12 : f32 to vector<8x16xf32>
    %29 = arith.cmpf ogt, %27, %28 : vector<8x16xf32>
    %cst_13 = arith.constant 2.000000e+01 : f32
    %30 = vector.broadcast %cst_13 : f32 to vector<8x16xf32>
    %31 = arith.minimumf %27, %30 : vector<8x16xf32>
    %32 = math.exp %31 : vector<8x16xf32>
    %cst_14 = arith.constant 1.000000e+00 : f32
    %33 = vector.broadcast %cst_14 : f32 to vector<8x16xf32>
    %34 = arith.addf %33, %32 : vector<8x16xf32>
    %35 = math.log %34 : vector<8x16xf32>
    %36 = arith.select %29, %27, %35 : vector<8x16xi1>, vector<8x16xf32>
    %cst_15 = arith.constant 0.000000e+00 : f32
    %37 = vector.broadcast %cst_15 : f32 to vector<8x16xf32>
    %false = arith.constant false
    %38 = vector.broadcast %false : i1 to vector<8x16xi1>
    %c0_16 = arith.constant 0 : index
    %c0_17 = arith.constant 0 : index
    %c0_18 = arith.constant 0 : index
    %c0_19 = arith.constant 0 : index
    %39 = vector.load %arg3[%c0_16, %c0_17, %c0_18, %c0_19] : memref<24x3x8x16xf32, #tpu.memory_space<vmem>>, vector<1x1x8x16xf32>
    %40 = vector.shape_cast %39 : vector<1x1x8x16xf32> to vector<8x16xf32>
    %c0_20 = arith.constant 0 : index
    %c1_21 = arith.constant 1 : index
    %c0_22 = arith.constant 0 : index
    %c0_23 = arith.constant 0 : index
    %41 = vector.load %arg3[%c0_20, %c1_21, %c0_22, %c0_23] : memref<24x3x8x16xf32, #tpu.memory_space<vmem>>, vector<1x1x8x16xf32>
    %42 = vector.shape_cast %41 : vector<1x1x8x16xf32> to vector<8x16xf32>
    %c0_24 = arith.constant 0 : index
    %c2_25 = arith.constant 2 : index
    %c0_26 = arith.constant 0 : index
    %c0_27 = arith.constant 0 : index
    %43 = vector.load %arg3[%c0_24, %c2_25, %c0_26, %c0_27] : memref<24x3x8x16xf32, #tpu.memory_space<vmem>>, vector<1x1x8x16xf32>
    %44 = vector.shape_cast %43 : vector<1x1x8x16xf32> to vector<8x16xf32>
    %cst_28 = arith.constant 5.000000e-01 : f32
    %45 = vector.broadcast %cst_28 : f32 to vector<8x16xf32>
    %46 = arith.subf %40, %45 : vector<8x16xf32>
    %cst_29 = arith.constant 3.14159274 : f32
    %47 = vector.broadcast %cst_29 : f32 to vector<8x16xf32>
    %48 = arith.mulf %47, %46 : vector<8x16xf32>
    %49 = arith.mulf %48, %48 : vector<8x16xf32>
    %cst_30 = arith.constant 2.75573188E-6 : f32
    %50 = vector.broadcast %cst_30 : f32 to vector<8x16xf32>
    %51 = arith.mulf %49, %50 : vector<8x16xf32>
    %cst_31 = arith.constant -1.98412701E-4 : f32
    %52 = vector.broadcast %cst_31 : f32 to vector<8x16xf32>
    %53 = arith.addf %52, %51 : vector<8x16xf32>
    %54 = arith.mulf %49, %53 : vector<8x16xf32>
    %cst_32 = arith.constant 0.00833333377 : f32
    %55 = vector.broadcast %cst_32 : f32 to vector<8x16xf32>
    %56 = arith.addf %55, %54 : vector<8x16xf32>
    %57 = arith.mulf %49, %56 : vector<8x16xf32>
    %cst_33 = arith.constant -0.166666672 : f32
    %58 = vector.broadcast %cst_33 : f32 to vector<8x16xf32>
    %59 = arith.addf %58, %57 : vector<8x16xf32>
    %60 = arith.mulf %49, %59 : vector<8x16xf32>
    %cst_34 = arith.constant 1.000000e+00 : f32
    %61 = vector.broadcast %cst_34 : f32 to vector<8x16xf32>
    %62 = arith.addf %61, %60 : vector<8x16xf32>
    %63 = arith.mulf %48, %62 : vector<8x16xf32>
    %cst_35 = arith.constant 0.000000e+00 : f32
    %64 = vector.broadcast %cst_35 : f32 to vector<8x16xf32>
    %65 = arith.subf %64, %63 : vector<8x16xf32>
    %cst_36 = arith.constant 1.00501251 : f32
    %66 = vector.broadcast %cst_36 : f32 to vector<8x16xf32>
    %67 = arith.mulf %66, %65 : vector<8x16xf32>
    %cst_37 = arith.constant 1.000000e+00 : f32
    %68 = vector.broadcast %cst_37 : f32 to vector<8x16xf32>
    %69 = arith.addf %68, %67 : vector<8x16xf32>
    %cst_38 = arith.constant 1.00501251 : f32
    %70 = vector.broadcast %cst_38 : f32 to vector<8x16xf32>
    %71 = arith.addf %70, %65 : vector<8x16xf32>
    %72 = arith.divf %69, %71 : vector<8x16xf32>
    %cst_39 = arith.constant 1.00501251 : f32
    %73 = vector.broadcast %cst_39 : f32 to vector<8x16xf32>
    %74 = arith.subf %73, %72 : vector<8x16xf32>
    %cst_40 = arith.constant 1.000000e+02 : f32
    %75 = vector.broadcast %cst_40 : f32 to vector<8x16xf32>
    %76 = arith.mulf %75, %74 : vector<8x16xf32>
    %cst_41 = arith.constant 2.000000e+00 : f32
    %77 = vector.broadcast %cst_41 : f32 to vector<8x16xf32>
    %78 = arith.subf %77, %76 : vector<8x16xf32>
    %79 = arith.mulf %76, %78 : vector<8x16xf32>
    %80 = arith.cmpf ogt, %79, %42 : vector<8x16xf32>
    %cst_42 = arith.constant 1.000000e+00 : f32
    %81 = vector.broadcast %cst_42 : f32 to vector<8x16xf32>
    %82 = arith.subf %81, %76 : vector<8x16xf32>
    %83 = math.exp %82 : vector<8x16xf32>
    %84 = arith.mulf %76, %83 : vector<8x16xf32>
    %85 = arith.cmpf oge, %84, %42 : vector<8x16xf32>
    %86 = arith.ori %80, %85 : vector<8x16xi1>
    %cst_43 = arith.constant dense<true> : vector<8x16xi1>
    %87 = arith.xori %38, %cst_43 : vector<8x16xi1>
    %88 = arith.andi %86, %87 : vector<8x16xi1>
    %89 = math.absf %72 : vector<8x16xf32>
    %cst_44 = arith.constant -0.0012624911 : f32
    %90 = vector.broadcast %cst_44 : f32 to vector<8x16xf32>
    %91 = arith.mulf %89, %90 : vector<8x16xf32>
    %cst_45 = arith.constant 6.670090e-03 : f32
    %92 = vector.broadcast %cst_45 : f32 to vector<8x16xf32>
    %93 = arith.addf %92, %91 : vector<8x16xf32>
    %94 = arith.mulf %89, %93 : vector<8x16xf32>
    %cst_46 = arith.constant -0.0170881264 : f32
    %95 = vector.broadcast %cst_46 : f32 to vector<8x16xf32>
    %96 = arith.addf %95, %94 : vector<8x16xf32>
    %97 = arith.mulf %89, %96 : vector<8x16xf32>
    %cst_47 = arith.constant 0.0308918804 : f32
    %98 = vector.broadcast %cst_47 : f32 to vector<8x16xf32>
    %99 = arith.addf %98, %97 : vector<8x16xf32>
    %100 = arith.mulf %89, %99 : vector<8x16xf32>
    %cst_48 = arith.constant -0.0501743034 : f32
    %101 = vector.broadcast %cst_48 : f32 to vector<8x16xf32>
    %102 = arith.addf %101, %100 : vector<8x16xf32>
    %103 = arith.mulf %89, %102 : vector<8x16xf32>
    %cst_49 = arith.constant 0.0889789909 : f32
    %104 = vector.broadcast %cst_49 : f32 to vector<8x16xf32>
    %105 = arith.addf %104, %103 : vector<8x16xf32>
    %106 = arith.mulf %89, %105 : vector<8x16xf32>
    %cst_50 = arith.constant -0.214598805 : f32
    %107 = vector.broadcast %cst_50 : f32 to vector<8x16xf32>
    %108 = arith.addf %107, %106 : vector<8x16xf32>
    %109 = arith.mulf %89, %108 : vector<8x16xf32>
    %cst_51 = arith.constant 1.57079625 : f32
    %110 = vector.broadcast %cst_51 : f32 to vector<8x16xf32>
    %111 = arith.addf %110, %109 : vector<8x16xf32>
    %cst_52 = arith.constant 1.000000e+00 : f32
    %112 = vector.broadcast %cst_52 : f32 to vector<8x16xf32>
    %113 = arith.subf %112, %89 : vector<8x16xf32>
    %cst_53 = arith.constant 0.000000e+00 : f32
    %114 = vector.broadcast %cst_53 : f32 to vector<8x16xf32>
    %115 = arith.maximumf %113, %114 : vector<8x16xf32>
    %116 = math.sqrt %115 : vector<8x16xf32>
    %117 = arith.mulf %116, %111 : vector<8x16xf32>
    %cst_54 = arith.constant 0.000000e+00 : f32
    %118 = vector.broadcast %cst_54 : f32 to vector<8x16xf32>
    %119 = arith.cmpf olt, %72, %118 : vector<8x16xf32>
    %cst_55 = arith.constant 3.14159274 : f32
    %120 = vector.broadcast %cst_55 : f32 to vector<8x16xf32>
    %121 = arith.subf %120, %117 : vector<8x16xf32>
    %122 = arith.select %119, %121, %117 : vector<8x16xi1>, vector<8x16xf32>
    %123 = arith.mulf %44, %122 : vector<8x16xf32>
    %124 = arith.select %88, %123, %37 : vector<8x16xi1>, vector<8x16xf32>
    %125 = arith.ori %38, %86 : vector<8x16xi1>
    %c1_56 = arith.constant 1 : index
    %c0_57 = arith.constant 0 : index
    %c0_58 = arith.constant 0 : index
    %c0_59 = arith.constant 0 : index
    %126 = vector.load %arg3[%c1_56, %c0_57, %c0_58, %c0_59] : memref<24x3x8x16xf32, #tpu.memory_space<vmem>>, vector<1x1x8x16xf32>
    %127 = vector.shape_cast %126 : vector<1x1x8x16xf32> to vector<8x16xf32>
    %c1_60 = arith.constant 1 : index
    %c1_61 = arith.constant 1 : index
    %c0_62 = arith.constant 0 : index
    %c0_63 = arith.constant 0 : index
    %128 = vector.load %arg3[%c1_60, %c1_61, %c0_62, %c0_63] : memref<24x3x8x16xf32, #tpu.memory_space<vmem>>, vector<1x1x8x16xf32>
    %129 = vector.shape_cast %128 : vector<1x1x8x16xf32> to vector<8x16xf32>
    %c1_64 = arith.constant 1 : index
    %c2_65 = arith.constant 2 : index
    %c0_66 = arith.constant 0 : index
    %c0_67 = arith.constant 0 : index
    %130 = vector.load %arg3[%c1_64, %c2_65, %c0_66, %c0_67] : memref<24x3x8x16xf32, #tpu.memory_space<vmem>>, vector<1x1x8x16xf32>
    %131 = vector.shape_cast %130 : vector<1x1x8x16xf32> to vector<8x16xf32>
    %cst_68 = arith.constant 5.000000e-01 : f32
    %132 = vector.broadcast %cst_68 : f32 to vector<8x16xf32>
    %133 = arith.subf %127, %132 : vector<8x16xf32>
    %cst_69 = arith.constant 3.14159274 : f32
    %134 = vector.broadcast %cst_69 : f32 to vector<8x16xf32>
    %135 = arith.mulf %134, %133 : vector<8x16xf32>
    %136 = arith.mulf %135, %135 : vector<8x16xf32>
    %cst_70 = arith.constant 2.75573188E-6 : f32
    %137 = vector.broadcast %cst_70 : f32 to vector<8x16xf32>
    %138 = arith.mulf %136, %137 : vector<8x16xf32>
    %cst_71 = arith.constant -1.98412701E-4 : f32
    %139 = vector.broadcast %cst_71 : f32 to vector<8x16xf32>
    %140 = arith.addf %139, %138 : vector<8x16xf32>
    %141 = arith.mulf %136, %140 : vector<8x16xf32>
    %cst_72 = arith.constant 0.00833333377 : f32
    %142 = vector.broadcast %cst_72 : f32 to vector<8x16xf32>
    %143 = arith.addf %142, %141 : vector<8x16xf32>
    %144 = arith.mulf %136, %143 : vector<8x16xf32>
    %cst_73 = arith.constant -0.166666672 : f32
    %145 = vector.broadcast %cst_73 : f32 to vector<8x16xf32>
    %146 = arith.addf %145, %144 : vector<8x16xf32>
    %147 = arith.mulf %136, %146 : vector<8x16xf32>
    %cst_74 = arith.constant 1.000000e+00 : f32
    %148 = vector.broadcast %cst_74 : f32 to vector<8x16xf32>
    %149 = arith.addf %148, %147 : vector<8x16xf32>
    %150 = arith.mulf %135, %149 : vector<8x16xf32>
    %cst_75 = arith.constant 0.000000e+00 : f32
    %151 = vector.broadcast %cst_75 : f32 to vector<8x16xf32>
    %152 = arith.subf %151, %150 : vector<8x16xf32>
    %cst_76 = arith.constant 1.00501251 : f32
    %153 = vector.broadcast %cst_76 : f32 to vector<8x16xf32>
    %154 = arith.mulf %153, %152 : vector<8x16xf32>
    %cst_77 = arith.constant 1.000000e+00 : f32
    %155 = vector.broadcast %cst_77 : f32 to vector<8x16xf32>
    %156 = arith.addf %155, %154 : vector<8x16xf32>
    %cst_78 = arith.constant 1.00501251 : f32
    %157 = vector.broadcast %cst_78 : f32 to vector<8x16xf32>
    %158 = arith.addf %157, %152 : vector<8x16xf32>
    %159 = arith.divf %156, %158 : vector<8x16xf32>
    %cst_79 = arith.constant 1.00501251 : f32
    %160 = vector.broadcast %cst_79 : f32 to vector<8x16xf32>
    %161 = arith.subf %160, %159 : vector<8x16xf32>
    %cst_80 = arith.constant 1.000000e+02 : f32
    %162 = vector.broadcast %cst_80 : f32 to vector<8x16xf32>
    %163 = arith.mulf %162, %161 : vector<8x16xf32>
    %cst_81 = arith.constant 2.000000e+00 : f32
    %164 = vector.broadcast %cst_81 : f32 to vector<8x16xf32>
    %165 = arith.subf %164, %163 : vector<8x16xf32>
    %166 = arith.mulf %163, %165 : vector<8x16xf32>
    %167 = arith.cmpf ogt, %166, %129 : vector<8x16xf32>
    %cst_82 = arith.constant 1.000000e+00 : f32
    %168 = vector.broadcast %cst_82 : f32 to vector<8x16xf32>
    %169 = arith.subf %168, %163 : vector<8x16xf32>
    %170 = math.exp %169 : vector<8x16xf32>
    %171 = arith.mulf %163, %170 : vector<8x16xf32>
    %172 = arith.cmpf oge, %171, %129 : vector<8x16xf32>
    %173 = arith.ori %167, %172 : vector<8x16xi1>
    %cst_83 = arith.constant dense<true> : vector<8x16xi1>
    %174 = arith.xori %125, %cst_83 : vector<8x16xi1>
    %175 = arith.andi %173, %174 : vector<8x16xi1>
    %176 = math.absf %159 : vector<8x16xf32>
    %cst_84 = arith.constant -0.0012624911 : f32
    %177 = vector.broadcast %cst_84 : f32 to vector<8x16xf32>
    %178 = arith.mulf %176, %177 : vector<8x16xf32>
    %cst_85 = arith.constant 6.670090e-03 : f32
    %179 = vector.broadcast %cst_85 : f32 to vector<8x16xf32>
    %180 = arith.addf %179, %178 : vector<8x16xf32>
    %181 = arith.mulf %176, %180 : vector<8x16xf32>
    %cst_86 = arith.constant -0.0170881264 : f32
    %182 = vector.broadcast %cst_86 : f32 to vector<8x16xf32>
    %183 = arith.addf %182, %181 : vector<8x16xf32>
    %184 = arith.mulf %176, %183 : vector<8x16xf32>
    %cst_87 = arith.constant 0.0308918804 : f32
    %185 = vector.broadcast %cst_87 : f32 to vector<8x16xf32>
    %186 = arith.addf %185, %184 : vector<8x16xf32>
    %187 = arith.mulf %176, %186 : vector<8x16xf32>
    %cst_88 = arith.constant -0.0501743034 : f32
    %188 = vector.broadcast %cst_88 : f32 to vector<8x16xf32>
    %189 = arith.addf %188, %187 : vector<8x16xf32>
    %190 = arith.mulf %176, %189 : vector<8x16xf32>
    %cst_89 = arith.constant 0.0889789909 : f32
    %191 = vector.broadcast %cst_89 : f32 to vector<8x16xf32>
    %192 = arith.addf %191, %190 : vector<8x16xf32>
    %193 = arith.mulf %176, %192 : vector<8x16xf32>
    %cst_90 = arith.constant -0.214598805 : f32
    %194 = vector.broadcast %cst_90 : f32 to vector<8x16xf32>
    %195 = arith.addf %194, %193 : vector<8x16xf32>
    %196 = arith.mulf %176, %195 : vector<8x16xf32>
    %cst_91 = arith.constant 1.57079625 : f32
    %197 = vector.broadcast %cst_91 : f32 to vector<8x16xf32>
    %198 = arith.addf %197, %196 : vector<8x16xf32>
    %cst_92 = arith.constant 1.000000e+00 : f32
    %199 = vector.broadcast %cst_92 : f32 to vector<8x16xf32>
    %200 = arith.subf %199, %176 : vector<8x16xf32>
    %cst_93 = arith.constant 0.000000e+00 : f32
    %201 = vector.broadcast %cst_93 : f32 to vector<8x16xf32>
    %202 = arith.maximumf %200, %201 : vector<8x16xf32>
    %203 = math.sqrt %202 : vector<8x16xf32>
    %204 = arith.mulf %203, %198 : vector<8x16xf32>
    %cst_94 = arith.constant 0.000000e+00 : f32
    %205 = vector.broadcast %cst_94 : f32 to vector<8x16xf32>
    %206 = arith.cmpf olt, %159, %205 : vector<8x16xf32>
    %cst_95 = arith.constant 3.14159274 : f32
    %207 = vector.broadcast %cst_95 : f32 to vector<8x16xf32>
    %208 = arith.subf %207, %204 : vector<8x16xf32>
    %209 = arith.select %206, %208, %204 : vector<8x16xi1>, vector<8x16xf32>
    %210 = arith.mulf %131, %209 : vector<8x16xf32>
    %211 = arith.select %175, %210, %124 : vector<8x16xi1>, vector<8x16xf32>
    %212 = arith.ori %125, %173 : vector<8x16xi1>
    %c2_96 = arith.constant 2 : index
    %c0_97 = arith.constant 0 : index
    %c0_98 = arith.constant 0 : index
    %c0_99 = arith.constant 0 : index
    %213 = vector.load %arg3[%c2_96, %c0_97, %c0_98, %c0_99] : memref<24x3x8x16xf32, #tpu.memory_space<vmem>>, vector<1x1x8x16xf32>
    %214 = vector.shape_cast %213 : vector<1x1x8x16xf32> to vector<8x16xf32>
    %c2_100 = arith.constant 2 : index
    %c1_101 = arith.constant 1 : index
    %c0_102 = arith.constant 0 : index
    %c0_103 = arith.constant 0 : index
    %215 = vector.load %arg3[%c2_100, %c1_101, %c0_102, %c0_103] : memref<24x3x8x16xf32, #tpu.memory_space<vmem>>, vector<1x1x8x16xf32>
    %216 = vector.shape_cast %215 : vector<1x1x8x16xf32> to vector<8x16xf32>
    %c2_104 = arith.constant 2 : index
    %c2_105 = arith.constant 2 : index
    %c0_106 = arith.constant 0 : index
    %c0_107 = arith.constant 0 : index
    %217 = vector.load %arg3[%c2_104, %c2_105, %c0_106, %c0_107] : memref<24x3x8x16xf32, #tpu.memory_space<vmem>>, vector<1x1x8x16xf32>
    %218 = vector.shape_cast %217 : vector<1x1x8x16xf32> to vector<8x16xf32>
    %cst_108 = arith.constant 5.000000e-01 : f32
    %219 = vector.broadcast %cst_108 : f32 to vector<8x16xf32>
    %220 = arith.subf %214, %219 : vector<8x16xf32>
    %cst_109 = arith.constant 3.14159274 : f32
    %221 = vector.broadcast %cst_109 : f32 to vector<8x16xf32>
    %222 = arith.mulf %221, %220 : vector<8x16xf32>
    %223 = arith.mulf %222, %222 : vector<8x16xf32>
    %cst_110 = arith.constant 2.75573188E-6 : f32
    %224 = vector.broadcast %cst_110 : f32 to vector<8x16xf32>
    %225 = arith.mulf %223, %224 : vector<8x16xf32>
    %cst_111 = arith.constant -1.98412701E-4 : f32
    %226 = vector.broadcast %cst_111 : f32 to vector<8x16xf32>
    %227 = arith.addf %226, %225 : vector<8x16xf32>
    %228 = arith.mulf %223, %227 : vector<8x16xf32>
    %cst_112 = arith.constant 0.00833333377 : f32
    %229 = vector.broadcast %cst_112 : f32 to vector<8x16xf32>
    %230 = arith.addf %229, %228 : vector<8x16xf32>
    %231 = arith.mulf %223, %230 : vector<8x16xf32>
    %cst_113 = arith.constant -0.166666672 : f32
    %232 = vector.broadcast %cst_113 : f32 to vector<8x16xf32>
    %233 = arith.addf %232, %231 : vector<8x16xf32>
    %234 = arith.mulf %223, %233 : vector<8x16xf32>
    %cst_114 = arith.constant 1.000000e+00 : f32
    %235 = vector.broadcast %cst_114 : f32 to vector<8x16xf32>
    %236 = arith.addf %235, %234 : vector<8x16xf32>
    %237 = arith.mulf %222, %236 : vector<8x16xf32>
    %cst_115 = arith.constant 0.000000e+00 : f32
    %238 = vector.broadcast %cst_115 : f32 to vector<8x16xf32>
    %239 = arith.subf %238, %237 : vector<8x16xf32>
    %cst_116 = arith.constant 1.00501251 : f32
    %240 = vector.broadcast %cst_116 : f32 to vector<8x16xf32>
    %241 = arith.mulf %240, %239 : vector<8x16xf32>
    %cst_117 = arith.constant 1.000000e+00 : f32
    %242 = vector.broadcast %cst_117 : f32 to vector<8x16xf32>
    %243 = arith.addf %242, %241 : vector<8x16xf32>
    %cst_118 = arith.constant 1.00501251 : f32
    %244 = vector.broadcast %cst_118 : f32 to vector<8x16xf32>
    %245 = arith.addf %244, %239 : vector<8x16xf32>
    %246 = arith.divf %243, %245 : vector<8x16xf32>
    %cst_119 = arith.constant 1.00501251 : f32
    %247 = vector.broadcast %cst_119 : f32 to vector<8x16xf32>
    %248 = arith.subf %247, %246 : vector<8x16xf32>
    %cst_120 = arith.constant 1.000000e+02 : f32
    %249 = vector.broadcast %cst_120 : f32 to vector<8x16xf32>
    %250 = arith.mulf %249, %248 : vector<8x16xf32>
    %cst_121 = arith.constant 2.000000e+00 : f32
    %251 = vector.broadcast %cst_121 : f32 to vector<8x16xf32>
    %252 = arith.subf %251, %250 : vector<8x16xf32>
    %253 = arith.mulf %250, %252 : vector<8x16xf32>
    %254 = arith.cmpf ogt, %253, %216 : vector<8x16xf32>
    %cst_122 = arith.constant 1.000000e+00 : f32
    %255 = vector.broadcast %cst_122 : f32 to vector<8x16xf32>
    %256 = arith.subf %255, %250 : vector<8x16xf32>
    %257 = math.exp %256 : vector<8x16xf32>
    %258 = arith.mulf %250, %257 : vector<8x16xf32>
    %259 = arith.cmpf oge, %258, %216 : vector<8x16xf32>
    %260 = arith.ori %254, %259 : vector<8x16xi1>
    %cst_123 = arith.constant dense<true> : vector<8x16xi1>
    %261 = arith.xori %212, %cst_123 : vector<8x16xi1>
    %262 = arith.andi %260, %261 : vector<8x16xi1>
    %263 = math.absf %246 : vector<8x16xf32>
    %cst_124 = arith.constant -0.0012624911 : f32
    %264 = vector.broadcast %cst_124 : f32 to vector<8x16xf32>
    %265 = arith.mulf %263, %264 : vector<8x16xf32>
    %cst_125 = arith.constant 6.670090e-03 : f32
    %266 = vector.broadcast %cst_125 : f32 to vector<8x16xf32>
    %267 = arith.addf %266, %265 : vector<8x16xf32>
    %268 = arith.mulf %263, %267 : vector<8x16xf32>
    %cst_126 = arith.constant -0.0170881264 : f32
    %269 = vector.broadcast %cst_126 : f32 to vector<8x16xf32>
    %270 = arith.addf %269, %268 : vector<8x16xf32>
    %271 = arith.mulf %263, %270 : vector<8x16xf32>
    %cst_127 = arith.constant 0.0308918804 : f32
    %272 = vector.broadcast %cst_127 : f32 to vector<8x16xf32>
    %273 = arith.addf %272, %271 : vector<8x16xf32>
    %274 = arith.mulf %263, %273 : vector<8x16xf32>
    %cst_128 = arith.constant -0.0501743034 : f32
    %275 = vector.broadcast %cst_128 : f32 to vector<8x16xf32>
    %276 = arith.addf %275, %274 : vector<8x16xf32>
    %277 = arith.mulf %263, %276 : vector<8x16xf32>
    %cst_129 = arith.constant 0.0889789909 : f32
    %278 = vector.broadcast %cst_129 : f32 to vector<8x16xf32>
    %279 = arith.addf %278, %277 : vector<8x16xf32>
    %280 = arith.mulf %263, %279 : vector<8x16xf32>
    %cst_130 = arith.constant -0.214598805 : f32
    %281 = vector.broadcast %cst_130 : f32 to vector<8x16xf32>
    %282 = arith.addf %281, %280 : vector<8x16xf32>
    %283 = arith.mulf %263, %282 : vector<8x16xf32>
    %cst_131 = arith.constant 1.57079625 : f32
    %284 = vector.broadcast %cst_131 : f32 to vector<8x16xf32>
    %285 = arith.addf %284, %283 : vector<8x16xf32>
    %cst_132 = arith.constant 1.000000e+00 : f32
    %286 = vector.broadcast %cst_132 : f32 to vector<8x16xf32>
    %287 = arith.subf %286, %263 : vector<8x16xf32>
    %cst_133 = arith.constant 0.000000e+00 : f32
    %288 = vector.broadcast %cst_133 : f32 to vector<8x16xf32>
    %289 = arith.maximumf %287, %288 : vector<8x16xf32>
    %290 = math.sqrt %289 : vector<8x16xf32>
    %291 = arith.mulf %290, %285 : vector<8x16xf32>
    %cst_134 = arith.constant 0.000000e+00 : f32
    %292 = vector.broadcast %cst_134 : f32 to vector<8x16xf32>
    %293 = arith.cmpf olt, %246, %292 : vector<8x16xf32>
    %cst_135 = arith.constant 3.14159274 : f32
    %294 = vector.broadcast %cst_135 : f32 to vector<8x16xf32>
    %295 = arith.subf %294, %291 : vector<8x16xf32>
    %296 = arith.select %293, %295, %291 : vector<8x16xi1>, vector<8x16xf32>
    %297 = arith.mulf %218, %296 : vector<8x16xf32>
    %298 = arith.select %262, %297, %211 : vector<8x16xi1>, vector<8x16xf32>
    %299 = arith.ori %212, %260 : vector<8x16xi1>
    %c3 = arith.constant 3 : index
    %c0_136 = arith.constant 0 : index
    %c0_137 = arith.constant 0 : index
    %c0_138 = arith.constant 0 : index
    %300 = vector.load %arg3[%c3, %c0_136, %c0_137, %c0_138] : memref<24x3x8x16xf32, #tpu.memory_space<vmem>>, vector<1x1x8x16xf32>
    %301 = vector.shape_cast %300 : vector<1x1x8x16xf32> to vector<8x16xf32>
    %c3_139 = arith.constant 3 : index
    %c1_140 = arith.constant 1 : index
    %c0_141 = arith.constant 0 : index
    %c0_142 = arith.constant 0 : index
    %302 = vector.load %arg3[%c3_139, %c1_140, %c0_141, %c0_142] : memref<24x3x8x16xf32, #tpu.memory_space<vmem>>, vector<1x1x8x16xf32>
    %303 = vector.shape_cast %302 : vector<1x1x8x16xf32> to vector<8x16xf32>
    %c3_143 = arith.constant 3 : index
    %c2_144 = arith.constant 2 : index
    %c0_145 = arith.constant 0 : index
    %c0_146 = arith.constant 0 : index
    %304 = vector.load %arg3[%c3_143, %c2_144, %c0_145, %c0_146] : memref<24x3x8x16xf32, #tpu.memory_space<vmem>>, vector<1x1x8x16xf32>
    %305 = vector.shape_cast %304 : vector<1x1x8x16xf32> to vector<8x16xf32>
    %cst_147 = arith.constant 5.000000e-01 : f32
    %306 = vector.broadcast %cst_147 : f32 to vector<8x16xf32>
    %307 = arith.subf %301, %306 : vector<8x16xf32>
    %cst_148 = arith.constant 3.14159274 : f32
    %308 = vector.broadcast %cst_148 : f32 to vector<8x16xf32>
    %309 = arith.mulf %308, %307 : vector<8x16xf32>
    %310 = arith.mulf %309, %309 : vector<8x16xf32>
    %cst_149 = arith.constant 2.75573188E-6 : f32
    %311 = vector.broadcast %cst_149 : f32 to vector<8x16xf32>
    %312 = arith.mulf %310, %311 : vector<8x16xf32>
    %cst_150 = arith.constant -1.98412701E-4 : f32
    %313 = vector.broadcast %cst_150 : f32 to vector<8x16xf32>
    %314 = arith.addf %313, %312 : vector<8x16xf32>
    %315 = arith.mulf %310, %314 : vector<8x16xf32>
    %cst_151 = arith.constant 0.00833333377 : f32
    %316 = vector.broadcast %cst_151 : f32 to vector<8x16xf32>
    %317 = arith.addf %316, %315 : vector<8x16xf32>
    %318 = arith.mulf %310, %317 : vector<8x16xf32>
    %cst_152 = arith.constant -0.166666672 : f32
    %319 = vector.broadcast %cst_152 : f32 to vector<8x16xf32>
    %320 = arith.addf %319, %318 : vector<8x16xf32>
    %321 = arith.mulf %310, %320 : vector<8x16xf32>
    %cst_153 = arith.constant 1.000000e+00 : f32
    %322 = vector.broadcast %cst_153 : f32 to vector<8x16xf32>
    %323 = arith.addf %322, %321 : vector<8x16xf32>
    %324 = arith.mulf %309, %323 : vector<8x16xf32>
    %cst_154 = arith.constant 0.000000e+00 : f32
    %325 = vector.broadcast %cst_154 : f32 to vector<8x16xf32>
    %326 = arith.subf %325, %324 : vector<8x16xf32>
    %cst_155 = arith.constant 1.00501251 : f32
    %327 = vector.broadcast %cst_155 : f32 to vector<8x16xf32>
    %328 = arith.mulf %327, %326 : vector<8x16xf32>
    %cst_156 = arith.constant 1.000000e+00 : f32
    %329 = vector.broadcast %cst_156 : f32 to vector<8x16xf32>
    %330 = arith.addf %329, %328 : vector<8x16xf32>
    %cst_157 = arith.constant 1.00501251 : f32
    %331 = vector.broadcast %cst_157 : f32 to vector<8x16xf32>
    %332 = arith.addf %331, %326 : vector<8x16xf32>
    %333 = arith.divf %330, %332 : vector<8x16xf32>
    %cst_158 = arith.constant 1.00501251 : f32
    %334 = vector.broadcast %cst_158 : f32 to vector<8x16xf32>
    %335 = arith.subf %334, %333 : vector<8x16xf32>
    %cst_159 = arith.constant 1.000000e+02 : f32
    %336 = vector.broadcast %cst_159 : f32 to vector<8x16xf32>
    %337 = arith.mulf %336, %335 : vector<8x16xf32>
    %cst_160 = arith.constant 2.000000e+00 : f32
    %338 = vector.broadcast %cst_160 : f32 to vector<8x16xf32>
    %339 = arith.subf %338, %337 : vector<8x16xf32>
    %340 = arith.mulf %337, %339 : vector<8x16xf32>
    %341 = arith.cmpf ogt, %340, %303 : vector<8x16xf32>
    %cst_161 = arith.constant 1.000000e+00 : f32
    %342 = vector.broadcast %cst_161 : f32 to vector<8x16xf32>
    %343 = arith.subf %342, %337 : vector<8x16xf32>
    %344 = math.exp %343 : vector<8x16xf32>
    %345 = arith.mulf %337, %344 : vector<8x16xf32>
    %346 = arith.cmpf oge, %345, %303 : vector<8x16xf32>
    %347 = arith.ori %341, %346 : vector<8x16xi1>
    %cst_162 = arith.constant dense<true> : vector<8x16xi1>
    %348 = arith.xori %299, %cst_162 : vector<8x16xi1>
    %349 = arith.andi %347, %348 : vector<8x16xi1>
    %350 = math.absf %333 : vector<8x16xf32>
    %cst_163 = arith.constant -0.0012624911 : f32
    %351 = vector.broadcast %cst_163 : f32 to vector<8x16xf32>
    %352 = arith.mulf %350, %351 : vector<8x16xf32>
    %cst_164 = arith.constant 6.670090e-03 : f32
    %353 = vector.broadcast %cst_164 : f32 to vector<8x16xf32>
    %354 = arith.addf %353, %352 : vector<8x16xf32>
    %355 = arith.mulf %350, %354 : vector<8x16xf32>
    %cst_165 = arith.constant -0.0170881264 : f32
    %356 = vector.broadcast %cst_165 : f32 to vector<8x16xf32>
    %357 = arith.addf %356, %355 : vector<8x16xf32>
    %358 = arith.mulf %350, %357 : vector<8x16xf32>
    %cst_166 = arith.constant 0.0308918804 : f32
    %359 = vector.broadcast %cst_166 : f32 to vector<8x16xf32>
    %360 = arith.addf %359, %358 : vector<8x16xf32>
    %361 = arith.mulf %350, %360 : vector<8x16xf32>
    %cst_167 = arith.constant -0.0501743034 : f32
    %362 = vector.broadcast %cst_167 : f32 to vector<8x16xf32>
    %363 = arith.addf %362, %361 : vector<8x16xf32>
    %364 = arith.mulf %350, %363 : vector<8x16xf32>
    %cst_168 = arith.constant 0.0889789909 : f32
    %365 = vector.broadcast %cst_168 : f32 to vector<8x16xf32>
    %366 = arith.addf %365, %364 : vector<8x16xf32>
    %367 = arith.mulf %350, %366 : vector<8x16xf32>
    %cst_169 = arith.constant -0.214598805 : f32
    %368 = vector.broadcast %cst_169 : f32 to vector<8x16xf32>
    %369 = arith.addf %368, %367 : vector<8x16xf32>
    %370 = arith.mulf %350, %369 : vector<8x16xf32>
    %cst_170 = arith.constant 1.57079625 : f32
    %371 = vector.broadcast %cst_170 : f32 to vector<8x16xf32>
    %372 = arith.addf %371, %370 : vector<8x16xf32>
    %cst_171 = arith.constant 1.000000e+00 : f32
    %373 = vector.broadcast %cst_171 : f32 to vector<8x16xf32>
    %374 = arith.subf %373, %350 : vector<8x16xf32>
    %cst_172 = arith.constant 0.000000e+00 : f32
    %375 = vector.broadcast %cst_172 : f32 to vector<8x16xf32>
    %376 = arith.maximumf %374, %375 : vector<8x16xf32>
    %377 = math.sqrt %376 : vector<8x16xf32>
    %378 = arith.mulf %377, %372 : vector<8x16xf32>
    %cst_173 = arith.constant 0.000000e+00 : f32
    %379 = vector.broadcast %cst_173 : f32 to vector<8x16xf32>
    %380 = arith.cmpf olt, %333, %379 : vector<8x16xf32>
    %cst_174 = arith.constant 3.14159274 : f32
    %381 = vector.broadcast %cst_174 : f32 to vector<8x16xf32>
    %382 = arith.subf %381, %378 : vector<8x16xf32>
    %383 = arith.select %380, %382, %378 : vector<8x16xi1>, vector<8x16xf32>
    %384 = arith.mulf %305, %383 : vector<8x16xf32>
    %385 = arith.select %349, %384, %298 : vector<8x16xi1>, vector<8x16xf32>
    %386 = arith.ori %299, %347 : vector<8x16xi1>
    %c4 = arith.constant 4 : index
    %c0_175 = arith.constant 0 : index
    %c0_176 = arith.constant 0 : index
    %c0_177 = arith.constant 0 : index
    %387 = vector.load %arg3[%c4, %c0_175, %c0_176, %c0_177] : memref<24x3x8x16xf32, #tpu.memory_space<vmem>>, vector<1x1x8x16xf32>
    %388 = vector.shape_cast %387 : vector<1x1x8x16xf32> to vector<8x16xf32>
    %c4_178 = arith.constant 4 : index
    %c1_179 = arith.constant 1 : index
    %c0_180 = arith.constant 0 : index
    %c0_181 = arith.constant 0 : index
    %389 = vector.load %arg3[%c4_178, %c1_179, %c0_180, %c0_181] : memref<24x3x8x16xf32, #tpu.memory_space<vmem>>, vector<1x1x8x16xf32>
    %390 = vector.shape_cast %389 : vector<1x1x8x16xf32> to vector<8x16xf32>
    %c4_182 = arith.constant 4 : index
    %c2_183 = arith.constant 2 : index
    %c0_184 = arith.constant 0 : index
    %c0_185 = arith.constant 0 : index
    %391 = vector.load %arg3[%c4_182, %c2_183, %c0_184, %c0_185] : memref<24x3x8x16xf32, #tpu.memory_space<vmem>>, vector<1x1x8x16xf32>
    %392 = vector.shape_cast %391 : vector<1x1x8x16xf32> to vector<8x16xf32>
    %cst_186 = arith.constant 5.000000e-01 : f32
    %393 = vector.broadcast %cst_186 : f32 to vector<8x16xf32>
    %394 = arith.subf %388, %393 : vector<8x16xf32>
    %cst_187 = arith.constant 3.14159274 : f32
    %395 = vector.broadcast %cst_187 : f32 to vector<8x16xf32>
    %396 = arith.mulf %395, %394 : vector<8x16xf32>
    %397 = arith.mulf %396, %396 : vector<8x16xf32>
    %cst_188 = arith.constant 2.75573188E-6 : f32
    %398 = vector.broadcast %cst_188 : f32 to vector<8x16xf32>
    %399 = arith.mulf %397, %398 : vector<8x16xf32>
    %cst_189 = arith.constant -1.98412701E-4 : f32
    %400 = vector.broadcast %cst_189 : f32 to vector<8x16xf32>
    %401 = arith.addf %400, %399 : vector<8x16xf32>
    %402 = arith.mulf %397, %401 : vector<8x16xf32>
    %cst_190 = arith.constant 0.00833333377 : f32
    %403 = vector.broadcast %cst_190 : f32 to vector<8x16xf32>
    %404 = arith.addf %403, %402 : vector<8x16xf32>
    %405 = arith.mulf %397, %404 : vector<8x16xf32>
    %cst_191 = arith.constant -0.166666672 : f32
    %406 = vector.broadcast %cst_191 : f32 to vector<8x16xf32>
    %407 = arith.addf %406, %405 : vector<8x16xf32>
    %408 = arith.mulf %397, %407 : vector<8x16xf32>
    %cst_192 = arith.constant 1.000000e+00 : f32
    %409 = vector.broadcast %cst_192 : f32 to vector<8x16xf32>
    %410 = arith.addf %409, %408 : vector<8x16xf32>
    %411 = arith.mulf %396, %410 : vector<8x16xf32>
    %cst_193 = arith.constant 0.000000e+00 : f32
    %412 = vector.broadcast %cst_193 : f32 to vector<8x16xf32>
    %413 = arith.subf %412, %411 : vector<8x16xf32>
    %cst_194 = arith.constant 1.00501251 : f32
    %414 = vector.broadcast %cst_194 : f32 to vector<8x16xf32>
    %415 = arith.mulf %414, %413 : vector<8x16xf32>
    %cst_195 = arith.constant 1.000000e+00 : f32
    %416 = vector.broadcast %cst_195 : f32 to vector<8x16xf32>
    %417 = arith.addf %416, %415 : vector<8x16xf32>
    %cst_196 = arith.constant 1.00501251 : f32
    %418 = vector.broadcast %cst_196 : f32 to vector<8x16xf32>
    %419 = arith.addf %418, %413 : vector<8x16xf32>
    %420 = arith.divf %417, %419 : vector<8x16xf32>
    %cst_197 = arith.constant 1.00501251 : f32
    %421 = vector.broadcast %cst_197 : f32 to vector<8x16xf32>
    %422 = arith.subf %421, %420 : vector<8x16xf32>
    %cst_198 = arith.constant 1.000000e+02 : f32
    %423 = vector.broadcast %cst_198 : f32 to vector<8x16xf32>
    %424 = arith.mulf %423, %422 : vector<8x16xf32>
    %cst_199 = arith.constant 2.000000e+00 : f32
    %425 = vector.broadcast %cst_199 : f32 to vector<8x16xf32>
    %426 = arith.subf %425, %424 : vector<8x16xf32>
    %427 = arith.mulf %424, %426 : vector<8x16xf32>
    %428 = arith.cmpf ogt, %427, %390 : vector<8x16xf32>
    %cst_200 = arith.constant 1.000000e+00 : f32
    %429 = vector.broadcast %cst_200 : f32 to vector<8x16xf32>
    %430 = arith.subf %429, %424 : vector<8x16xf32>
    %431 = math.exp %430 : vector<8x16xf32>
    %432 = arith.mulf %424, %431 : vector<8x16xf32>
    %433 = arith.cmpf oge, %432, %390 : vector<8x16xf32>
    %434 = arith.ori %428, %433 : vector<8x16xi1>
    %cst_201 = arith.constant dense<true> : vector<8x16xi1>
    %435 = arith.xori %386, %cst_201 : vector<8x16xi1>
    %436 = arith.andi %434, %435 : vector<8x16xi1>
    %437 = math.absf %420 : vector<8x16xf32>
    %cst_202 = arith.constant -0.0012624911 : f32
    %438 = vector.broadcast %cst_202 : f32 to vector<8x16xf32>
    %439 = arith.mulf %437, %438 : vector<8x16xf32>
    %cst_203 = arith.constant 6.670090e-03 : f32
    %440 = vector.broadcast %cst_203 : f32 to vector<8x16xf32>
    %441 = arith.addf %440, %439 : vector<8x16xf32>
    %442 = arith.mulf %437, %441 : vector<8x16xf32>
    %cst_204 = arith.constant -0.0170881264 : f32
    %443 = vector.broadcast %cst_204 : f32 to vector<8x16xf32>
    %444 = arith.addf %443, %442 : vector<8x16xf32>
    %445 = arith.mulf %437, %444 : vector<8x16xf32>
    %cst_205 = arith.constant 0.0308918804 : f32
    %446 = vector.broadcast %cst_205 : f32 to vector<8x16xf32>
    %447 = arith.addf %446, %445 : vector<8x16xf32>
    %448 = arith.mulf %437, %447 : vector<8x16xf32>
    %cst_206 = arith.constant -0.0501743034 : f32
    %449 = vector.broadcast %cst_206 : f32 to vector<8x16xf32>
    %450 = arith.addf %449, %448 : vector<8x16xf32>
    %451 = arith.mulf %437, %450 : vector<8x16xf32>
    %cst_207 = arith.constant 0.0889789909 : f32
    %452 = vector.broadcast %cst_207 : f32 to vector<8x16xf32>
    %453 = arith.addf %452, %451 : vector<8x16xf32>
    %454 = arith.mulf %437, %453 : vector<8x16xf32>
    %cst_208 = arith.constant -0.214598805 : f32
    %455 = vector.broadcast %cst_208 : f32 to vector<8x16xf32>
    %456 = arith.addf %455, %454 : vector<8x16xf32>
    %457 = arith.mulf %437, %456 : vector<8x16xf32>
    %cst_209 = arith.constant 1.57079625 : f32
    %458 = vector.broadcast %cst_209 : f32 to vector<8x16xf32>
    %459 = arith.addf %458, %457 : vector<8x16xf32>
    %cst_210 = arith.constant 1.000000e+00 : f32
    %460 = vector.broadcast %cst_210 : f32 to vector<8x16xf32>
    %461 = arith.subf %460, %437 : vector<8x16xf32>
    %cst_211 = arith.constant 0.000000e+00 : f32
    %462 = vector.broadcast %cst_211 : f32 to vector<8x16xf32>
    %463 = arith.maximumf %461, %462 : vector<8x16xf32>
    %464 = math.sqrt %463 : vector<8x16xf32>
    %465 = arith.mulf %464, %459 : vector<8x16xf32>
    %cst_212 = arith.constant 0.000000e+00 : f32
    %466 = vector.broadcast %cst_212 : f32 to vector<8x16xf32>
    %467 = arith.cmpf olt, %420, %466 : vector<8x16xf32>
    %cst_213 = arith.constant 3.14159274 : f32
    %468 = vector.broadcast %cst_213 : f32 to vector<8x16xf32>
    %469 = arith.subf %468, %465 : vector<8x16xf32>
    %470 = arith.select %467, %469, %465 : vector<8x16xi1>, vector<8x16xf32>
    %471 = arith.mulf %392, %470 : vector<8x16xf32>
    %472 = arith.select %436, %471, %385 : vector<8x16xi1>, vector<8x16xf32>
    %473 = arith.ori %386, %434 : vector<8x16xi1>
    %c5 = arith.constant 5 : index
    %c0_214 = arith.constant 0 : index
    %c0_215 = arith.constant 0 : index
    %c0_216 = arith.constant 0 : index
    %474 = vector.load %arg3[%c5, %c0_214, %c0_215, %c0_216] : memref<24x3x8x16xf32, #tpu.memory_space<vmem>>, vector<1x1x8x16xf32>
    %475 = vector.shape_cast %474 : vector<1x1x8x16xf32> to vector<8x16xf32>
    %c5_217 = arith.constant 5 : index
    %c1_218 = arith.constant 1 : index
    %c0_219 = arith.constant 0 : index
    %c0_220 = arith.constant 0 : index
    %476 = vector.load %arg3[%c5_217, %c1_218, %c0_219, %c0_220] : memref<24x3x8x16xf32, #tpu.memory_space<vmem>>, vector<1x1x8x16xf32>
    %477 = vector.shape_cast %476 : vector<1x1x8x16xf32> to vector<8x16xf32>
    %c5_221 = arith.constant 5 : index
    %c2_222 = arith.constant 2 : index
    %c0_223 = arith.constant 0 : index
    %c0_224 = arith.constant 0 : index
    %478 = vector.load %arg3[%c5_221, %c2_222, %c0_223, %c0_224] : memref<24x3x8x16xf32, #tpu.memory_space<vmem>>, vector<1x1x8x16xf32>
    %479 = vector.shape_cast %478 : vector<1x1x8x16xf32> to vector<8x16xf32>
    %cst_225 = arith.constant 5.000000e-01 : f32
    %480 = vector.broadcast %cst_225 : f32 to vector<8x16xf32>
    %481 = arith.subf %475, %480 : vector<8x16xf32>
    %cst_226 = arith.constant 3.14159274 : f32
    %482 = vector.broadcast %cst_226 : f32 to vector<8x16xf32>
    %483 = arith.mulf %482, %481 : vector<8x16xf32>
    %484 = arith.mulf %483, %483 : vector<8x16xf32>
    %cst_227 = arith.constant 2.75573188E-6 : f32
    %485 = vector.broadcast %cst_227 : f32 to vector<8x16xf32>
    %486 = arith.mulf %484, %485 : vector<8x16xf32>
    %cst_228 = arith.constant -1.98412701E-4 : f32
    %487 = vector.broadcast %cst_228 : f32 to vector<8x16xf32>
    %488 = arith.addf %487, %486 : vector<8x16xf32>
    %489 = arith.mulf %484, %488 : vector<8x16xf32>
    %cst_229 = arith.constant 0.00833333377 : f32
    %490 = vector.broadcast %cst_229 : f32 to vector<8x16xf32>
    %491 = arith.addf %490, %489 : vector<8x16xf32>
    %492 = arith.mulf %484, %491 : vector<8x16xf32>
    %cst_230 = arith.constant -0.166666672 : f32
    %493 = vector.broadcast %cst_230 : f32 to vector<8x16xf32>
    %494 = arith.addf %493, %492 : vector<8x16xf32>
    %495 = arith.mulf %484, %494 : vector<8x16xf32>
    %cst_231 = arith.constant 1.000000e+00 : f32
    %496 = vector.broadcast %cst_231 : f32 to vector<8x16xf32>
    %497 = arith.addf %496, %495 : vector<8x16xf32>
    %498 = arith.mulf %483, %497 : vector<8x16xf32>
    %cst_232 = arith.constant 0.000000e+00 : f32
    %499 = vector.broadcast %cst_232 : f32 to vector<8x16xf32>
    %500 = arith.subf %499, %498 : vector<8x16xf32>
    %cst_233 = arith.constant 1.00501251 : f32
    %501 = vector.broadcast %cst_233 : f32 to vector<8x16xf32>
    %502 = arith.mulf %501, %500 : vector<8x16xf32>
    %cst_234 = arith.constant 1.000000e+00 : f32
    %503 = vector.broadcast %cst_234 : f32 to vector<8x16xf32>
    %504 = arith.addf %503, %502 : vector<8x16xf32>
    %cst_235 = arith.constant 1.00501251 : f32
    %505 = vector.broadcast %cst_235 : f32 to vector<8x16xf32>
    %506 = arith.addf %505, %500 : vector<8x16xf32>
    %507 = arith.divf %504, %506 : vector<8x16xf32>
    %cst_236 = arith.constant 1.00501251 : f32
    %508 = vector.broadcast %cst_236 : f32 to vector<8x16xf32>
    %509 = arith.subf %508, %507 : vector<8x16xf32>
    %cst_237 = arith.constant 1.000000e+02 : f32
    %510 = vector.broadcast %cst_237 : f32 to vector<8x16xf32>
    %511 = arith.mulf %510, %509 : vector<8x16xf32>
    %cst_238 = arith.constant 2.000000e+00 : f32
    %512 = vector.broadcast %cst_238 : f32 to vector<8x16xf32>
    %513 = arith.subf %512, %511 : vector<8x16xf32>
    %514 = arith.mulf %511, %513 : vector<8x16xf32>
    %515 = arith.cmpf ogt, %514, %477 : vector<8x16xf32>
    %cst_239 = arith.constant 1.000000e+00 : f32
    %516 = vector.broadcast %cst_239 : f32 to vector<8x16xf32>
    %517 = arith.subf %516, %511 : vector<8x16xf32>
    %518 = math.exp %517 : vector<8x16xf32>
    %519 = arith.mulf %511, %518 : vector<8x16xf32>
    %520 = arith.cmpf oge, %519, %477 : vector<8x16xf32>
    %521 = arith.ori %515, %520 : vector<8x16xi1>
    %cst_240 = arith.constant dense<true> : vector<8x16xi1>
    %522 = arith.xori %473, %cst_240 : vector<8x16xi1>
    %523 = arith.andi %521, %522 : vector<8x16xi1>
    %524 = math.absf %507 : vector<8x16xf32>
    %cst_241 = arith.constant -0.0012624911 : f32
    %525 = vector.broadcast %cst_241 : f32 to vector<8x16xf32>
    %526 = arith.mulf %524, %525 : vector<8x16xf32>
    %cst_242 = arith.constant 6.670090e-03 : f32
    %527 = vector.broadcast %cst_242 : f32 to vector<8x16xf32>
    %528 = arith.addf %527, %526 : vector<8x16xf32>
    %529 = arith.mulf %524, %528 : vector<8x16xf32>
    %cst_243 = arith.constant -0.0170881264 : f32
    %530 = vector.broadcast %cst_243 : f32 to vector<8x16xf32>
    %531 = arith.addf %530, %529 : vector<8x16xf32>
    %532 = arith.mulf %524, %531 : vector<8x16xf32>
    %cst_244 = arith.constant 0.0308918804 : f32
    %533 = vector.broadcast %cst_244 : f32 to vector<8x16xf32>
    %534 = arith.addf %533, %532 : vector<8x16xf32>
    %535 = arith.mulf %524, %534 : vector<8x16xf32>
    %cst_245 = arith.constant -0.0501743034 : f32
    %536 = vector.broadcast %cst_245 : f32 to vector<8x16xf32>
    %537 = arith.addf %536, %535 : vector<8x16xf32>
    %538 = arith.mulf %524, %537 : vector<8x16xf32>
    %cst_246 = arith.constant 0.0889789909 : f32
    %539 = vector.broadcast %cst_246 : f32 to vector<8x16xf32>
    %540 = arith.addf %539, %538 : vector<8x16xf32>
    %541 = arith.mulf %524, %540 : vector<8x16xf32>
    %cst_247 = arith.constant -0.214598805 : f32
    %542 = vector.broadcast %cst_247 : f32 to vector<8x16xf32>
    %543 = arith.addf %542, %541 : vector<8x16xf32>
    %544 = arith.mulf %524, %543 : vector<8x16xf32>
    %cst_248 = arith.constant 1.57079625 : f32
    %545 = vector.broadcast %cst_248 : f32 to vector<8x16xf32>
    %546 = arith.addf %545, %544 : vector<8x16xf32>
    %cst_249 = arith.constant 1.000000e+00 : f32
    %547 = vector.broadcast %cst_249 : f32 to vector<8x16xf32>
    %548 = arith.subf %547, %524 : vector<8x16xf32>
    %cst_250 = arith.constant 0.000000e+00 : f32
    %549 = vector.broadcast %cst_250 : f32 to vector<8x16xf32>
    %550 = arith.maximumf %548, %549 : vector<8x16xf32>
    %551 = math.sqrt %550 : vector<8x16xf32>
    %552 = arith.mulf %551, %546 : vector<8x16xf32>
    %cst_251 = arith.constant 0.000000e+00 : f32
    %553 = vector.broadcast %cst_251 : f32 to vector<8x16xf32>
    %554 = arith.cmpf olt, %507, %553 : vector<8x16xf32>
    %cst_252 = arith.constant 3.14159274 : f32
    %555 = vector.broadcast %cst_252 : f32 to vector<8x16xf32>
    %556 = arith.subf %555, %552 : vector<8x16xf32>
    %557 = arith.select %554, %556, %552 : vector<8x16xi1>, vector<8x16xf32>
    %558 = arith.mulf %479, %557 : vector<8x16xf32>
    %559 = arith.select %523, %558, %472 : vector<8x16xi1>, vector<8x16xf32>
    %560 = arith.ori %473, %521 : vector<8x16xi1>
    %c6 = arith.constant 6 : index
    %c0_253 = arith.constant 0 : index
    %c0_254 = arith.constant 0 : index
    %c0_255 = arith.constant 0 : index
    %561 = vector.load %arg3[%c6, %c0_253, %c0_254, %c0_255] : memref<24x3x8x16xf32, #tpu.memory_space<vmem>>, vector<1x1x8x16xf32>
    %562 = vector.shape_cast %561 : vector<1x1x8x16xf32> to vector<8x16xf32>
    %c6_256 = arith.constant 6 : index
    %c1_257 = arith.constant 1 : index
    %c0_258 = arith.constant 0 : index
    %c0_259 = arith.constant 0 : index
    %563 = vector.load %arg3[%c6_256, %c1_257, %c0_258, %c0_259] : memref<24x3x8x16xf32, #tpu.memory_space<vmem>>, vector<1x1x8x16xf32>
    %564 = vector.shape_cast %563 : vector<1x1x8x16xf32> to vector<8x16xf32>
    %c6_260 = arith.constant 6 : index
    %c2_261 = arith.constant 2 : index
    %c0_262 = arith.constant 0 : index
    %c0_263 = arith.constant 0 : index
    %565 = vector.load %arg3[%c6_260, %c2_261, %c0_262, %c0_263] : memref<24x3x8x16xf32, #tpu.memory_space<vmem>>, vector<1x1x8x16xf32>
    %566 = vector.shape_cast %565 : vector<1x1x8x16xf32> to vector<8x16xf32>
    %cst_264 = arith.constant 5.000000e-01 : f32
    %567 = vector.broadcast %cst_264 : f32 to vector<8x16xf32>
    %568 = arith.subf %562, %567 : vector<8x16xf32>
    %cst_265 = arith.constant 3.14159274 : f32
    %569 = vector.broadcast %cst_265 : f32 to vector<8x16xf32>
    %570 = arith.mulf %569, %568 : vector<8x16xf32>
    %571 = arith.mulf %570, %570 : vector<8x16xf32>
    %cst_266 = arith.constant 2.75573188E-6 : f32
    %572 = vector.broadcast %cst_266 : f32 to vector<8x16xf32>
    %573 = arith.mulf %571, %572 : vector<8x16xf32>
    %cst_267 = arith.constant -1.98412701E-4 : f32
    %574 = vector.broadcast %cst_267 : f32 to vector<8x16xf32>
    %575 = arith.addf %574, %573 : vector<8x16xf32>
    %576 = arith.mulf %571, %575 : vector<8x16xf32>
    %cst_268 = arith.constant 0.00833333377 : f32
    %577 = vector.broadcast %cst_268 : f32 to vector<8x16xf32>
    %578 = arith.addf %577, %576 : vector<8x16xf32>
    %579 = arith.mulf %571, %578 : vector<8x16xf32>
    %cst_269 = arith.constant -0.166666672 : f32
    %580 = vector.broadcast %cst_269 : f32 to vector<8x16xf32>
    %581 = arith.addf %580, %579 : vector<8x16xf32>
    %582 = arith.mulf %571, %581 : vector<8x16xf32>
    %cst_270 = arith.constant 1.000000e+00 : f32
    %583 = vector.broadcast %cst_270 : f32 to vector<8x16xf32>
    %584 = arith.addf %583, %582 : vector<8x16xf32>
    %585 = arith.mulf %570, %584 : vector<8x16xf32>
    %cst_271 = arith.constant 0.000000e+00 : f32
    %586 = vector.broadcast %cst_271 : f32 to vector<8x16xf32>
    %587 = arith.subf %586, %585 : vector<8x16xf32>
    %cst_272 = arith.constant 1.00501251 : f32
    %588 = vector.broadcast %cst_272 : f32 to vector<8x16xf32>
    %589 = arith.mulf %588, %587 : vector<8x16xf32>
    %cst_273 = arith.constant 1.000000e+00 : f32
    %590 = vector.broadcast %cst_273 : f32 to vector<8x16xf32>
    %591 = arith.addf %590, %589 : vector<8x16xf32>
    %cst_274 = arith.constant 1.00501251 : f32
    %592 = vector.broadcast %cst_274 : f32 to vector<8x16xf32>
    %593 = arith.addf %592, %587 : vector<8x16xf32>
    %594 = arith.divf %591, %593 : vector<8x16xf32>
    %cst_275 = arith.constant 1.00501251 : f32
    %595 = vector.broadcast %cst_275 : f32 to vector<8x16xf32>
    %596 = arith.subf %595, %594 : vector<8x16xf32>
    %cst_276 = arith.constant 1.000000e+02 : f32
    %597 = vector.broadcast %cst_276 : f32 to vector<8x16xf32>
    %598 = arith.mulf %597, %596 : vector<8x16xf32>
    %cst_277 = arith.constant 2.000000e+00 : f32
    %599 = vector.broadcast %cst_277 : f32 to vector<8x16xf32>
    %600 = arith.subf %599, %598 : vector<8x16xf32>
    %601 = arith.mulf %598, %600 : vector<8x16xf32>
    %602 = arith.cmpf ogt, %601, %564 : vector<8x16xf32>
    %cst_278 = arith.constant 1.000000e+00 : f32
    %603 = vector.broadcast %cst_278 : f32 to vector<8x16xf32>
    %604 = arith.subf %603, %598 : vector<8x16xf32>
    %605 = math.exp %604 : vector<8x16xf32>
    %606 = arith.mulf %598, %605 : vector<8x16xf32>
    %607 = arith.cmpf oge, %606, %564 : vector<8x16xf32>
    %608 = arith.ori %602, %607 : vector<8x16xi1>
    %cst_279 = arith.constant dense<true> : vector<8x16xi1>
    %609 = arith.xori %560, %cst_279 : vector<8x16xi1>
    %610 = arith.andi %608, %609 : vector<8x16xi1>
    %611 = math.absf %594 : vector<8x16xf32>
    %cst_280 = arith.constant -0.0012624911 : f32
    %612 = vector.broadcast %cst_280 : f32 to vector<8x16xf32>
    %613 = arith.mulf %611, %612 : vector<8x16xf32>
    %cst_281 = arith.constant 6.670090e-03 : f32
    %614 = vector.broadcast %cst_281 : f32 to vector<8x16xf32>
    %615 = arith.addf %614, %613 : vector<8x16xf32>
    %616 = arith.mulf %611, %615 : vector<8x16xf32>
    %cst_282 = arith.constant -0.0170881264 : f32
    %617 = vector.broadcast %cst_282 : f32 to vector<8x16xf32>
    %618 = arith.addf %617, %616 : vector<8x16xf32>
    %619 = arith.mulf %611, %618 : vector<8x16xf32>
    %cst_283 = arith.constant 0.0308918804 : f32
    %620 = vector.broadcast %cst_283 : f32 to vector<8x16xf32>
    %621 = arith.addf %620, %619 : vector<8x16xf32>
    %622 = arith.mulf %611, %621 : vector<8x16xf32>
    %cst_284 = arith.constant -0.0501743034 : f32
    %623 = vector.broadcast %cst_284 : f32 to vector<8x16xf32>
    %624 = arith.addf %623, %622 : vector<8x16xf32>
    %625 = arith.mulf %611, %624 : vector<8x16xf32>
    %cst_285 = arith.constant 0.0889789909 : f32
    %626 = vector.broadcast %cst_285 : f32 to vector<8x16xf32>
    %627 = arith.addf %626, %625 : vector<8x16xf32>
    %628 = arith.mulf %611, %627 : vector<8x16xf32>
    %cst_286 = arith.constant -0.214598805 : f32
    %629 = vector.broadcast %cst_286 : f32 to vector<8x16xf32>
    %630 = arith.addf %629, %628 : vector<8x16xf32>
    %631 = arith.mulf %611, %630 : vector<8x16xf32>
    %cst_287 = arith.constant 1.57079625 : f32
    %632 = vector.broadcast %cst_287 : f32 to vector<8x16xf32>
    %633 = arith.addf %632, %631 : vector<8x16xf32>
    %cst_288 = arith.constant 1.000000e+00 : f32
    %634 = vector.broadcast %cst_288 : f32 to vector<8x16xf32>
    %635 = arith.subf %634, %611 : vector<8x16xf32>
    %cst_289 = arith.constant 0.000000e+00 : f32
    %636 = vector.broadcast %cst_289 : f32 to vector<8x16xf32>
    %637 = arith.maximumf %635, %636 : vector<8x16xf32>
    %638 = math.sqrt %637 : vector<8x16xf32>
    %639 = arith.mulf %638, %633 : vector<8x16xf32>
    %cst_290 = arith.constant 0.000000e+00 : f32
    %640 = vector.broadcast %cst_290 : f32 to vector<8x16xf32>
    %641 = arith.cmpf olt, %594, %640 : vector<8x16xf32>
    %cst_291 = arith.constant 3.14159274 : f32
    %642 = vector.broadcast %cst_291 : f32 to vector<8x16xf32>
    %643 = arith.subf %642, %639 : vector<8x16xf32>
    %644 = arith.select %641, %643, %639 : vector<8x16xi1>, vector<8x16xf32>
    %645 = arith.mulf %566, %644 : vector<8x16xf32>
    %646 = arith.select %610, %645, %559 : vector<8x16xi1>, vector<8x16xf32>
    %647 = arith.ori %560, %608 : vector<8x16xi1>
    %c7 = arith.constant 7 : index
    %c0_292 = arith.constant 0 : index
    %c0_293 = arith.constant 0 : index
    %c0_294 = arith.constant 0 : index
    %648 = vector.load %arg3[%c7, %c0_292, %c0_293, %c0_294] : memref<24x3x8x16xf32, #tpu.memory_space<vmem>>, vector<1x1x8x16xf32>
    %649 = vector.shape_cast %648 : vector<1x1x8x16xf32> to vector<8x16xf32>
    %c7_295 = arith.constant 7 : index
    %c1_296 = arith.constant 1 : index
    %c0_297 = arith.constant 0 : index
    %c0_298 = arith.constant 0 : index
    %650 = vector.load %arg3[%c7_295, %c1_296, %c0_297, %c0_298] : memref<24x3x8x16xf32, #tpu.memory_space<vmem>>, vector<1x1x8x16xf32>
    %651 = vector.shape_cast %650 : vector<1x1x8x16xf32> to vector<8x16xf32>
    %c7_299 = arith.constant 7 : index
    %c2_300 = arith.constant 2 : index
    %c0_301 = arith.constant 0 : index
    %c0_302 = arith.constant 0 : index
    %652 = vector.load %arg3[%c7_299, %c2_300, %c0_301, %c0_302] : memref<24x3x8x16xf32, #tpu.memory_space<vmem>>, vector<1x1x8x16xf32>
    %653 = vector.shape_cast %652 : vector<1x1x8x16xf32> to vector<8x16xf32>
    %cst_303 = arith.constant 5.000000e-01 : f32
    %654 = vector.broadcast %cst_303 : f32 to vector<8x16xf32>
    %655 = arith.subf %649, %654 : vector<8x16xf32>
    %cst_304 = arith.constant 3.14159274 : f32
    %656 = vector.broadcast %cst_304 : f32 to vector<8x16xf32>
    %657 = arith.mulf %656, %655 : vector<8x16xf32>
    %658 = arith.mulf %657, %657 : vector<8x16xf32>
    %cst_305 = arith.constant 2.75573188E-6 : f32
    %659 = vector.broadcast %cst_305 : f32 to vector<8x16xf32>
    %660 = arith.mulf %658, %659 : vector<8x16xf32>
    %cst_306 = arith.constant -1.98412701E-4 : f32
    %661 = vector.broadcast %cst_306 : f32 to vector<8x16xf32>
    %662 = arith.addf %661, %660 : vector<8x16xf32>
    %663 = arith.mulf %658, %662 : vector<8x16xf32>
    %cst_307 = arith.constant 0.00833333377 : f32
    %664 = vector.broadcast %cst_307 : f32 to vector<8x16xf32>
    %665 = arith.addf %664, %663 : vector<8x16xf32>
    %666 = arith.mulf %658, %665 : vector<8x16xf32>
    %cst_308 = arith.constant -0.166666672 : f32
    %667 = vector.broadcast %cst_308 : f32 to vector<8x16xf32>
    %668 = arith.addf %667, %666 : vector<8x16xf32>
    %669 = arith.mulf %658, %668 : vector<8x16xf32>
    %cst_309 = arith.constant 1.000000e+00 : f32
    %670 = vector.broadcast %cst_309 : f32 to vector<8x16xf32>
    %671 = arith.addf %670, %669 : vector<8x16xf32>
    %672 = arith.mulf %657, %671 : vector<8x16xf32>
    %cst_310 = arith.constant 0.000000e+00 : f32
    %673 = vector.broadcast %cst_310 : f32 to vector<8x16xf32>
    %674 = arith.subf %673, %672 : vector<8x16xf32>
    %cst_311 = arith.constant 1.00501251 : f32
    %675 = vector.broadcast %cst_311 : f32 to vector<8x16xf32>
    %676 = arith.mulf %675, %674 : vector<8x16xf32>
    %cst_312 = arith.constant 1.000000e+00 : f32
    %677 = vector.broadcast %cst_312 : f32 to vector<8x16xf32>
    %678 = arith.addf %677, %676 : vector<8x16xf32>
    %cst_313 = arith.constant 1.00501251 : f32
    %679 = vector.broadcast %cst_313 : f32 to vector<8x16xf32>
    %680 = arith.addf %679, %674 : vector<8x16xf32>
    %681 = arith.divf %678, %680 : vector<8x16xf32>
    %cst_314 = arith.constant 1.00501251 : f32
    %682 = vector.broadcast %cst_314 : f32 to vector<8x16xf32>
    %683 = arith.subf %682, %681 : vector<8x16xf32>
    %cst_315 = arith.constant 1.000000e+02 : f32
    %684 = vector.broadcast %cst_315 : f32 to vector<8x16xf32>
    %685 = arith.mulf %684, %683 : vector<8x16xf32>
    %cst_316 = arith.constant 2.000000e+00 : f32
    %686 = vector.broadcast %cst_316 : f32 to vector<8x16xf32>
    %687 = arith.subf %686, %685 : vector<8x16xf32>
    %688 = arith.mulf %685, %687 : vector<8x16xf32>
    %689 = arith.cmpf ogt, %688, %651 : vector<8x16xf32>
    %cst_317 = arith.constant 1.000000e+00 : f32
    %690 = vector.broadcast %cst_317 : f32 to vector<8x16xf32>
    %691 = arith.subf %690, %685 : vector<8x16xf32>
    %692 = math.exp %691 : vector<8x16xf32>
    %693 = arith.mulf %685, %692 : vector<8x16xf32>
    %694 = arith.cmpf oge, %693, %651 : vector<8x16xf32>
    %695 = arith.ori %689, %694 : vector<8x16xi1>
    %cst_318 = arith.constant dense<true> : vector<8x16xi1>
    %696 = arith.xori %647, %cst_318 : vector<8x16xi1>
    %697 = arith.andi %695, %696 : vector<8x16xi1>
    %698 = math.absf %681 : vector<8x16xf32>
    %cst_319 = arith.constant -0.0012624911 : f32
    %699 = vector.broadcast %cst_319 : f32 to vector<8x16xf32>
    %700 = arith.mulf %698, %699 : vector<8x16xf32>
    %cst_320 = arith.constant 6.670090e-03 : f32
    %701 = vector.broadcast %cst_320 : f32 to vector<8x16xf32>
    %702 = arith.addf %701, %700 : vector<8x16xf32>
    %703 = arith.mulf %698, %702 : vector<8x16xf32>
    %cst_321 = arith.constant -0.0170881264 : f32
    %704 = vector.broadcast %cst_321 : f32 to vector<8x16xf32>
    %705 = arith.addf %704, %703 : vector<8x16xf32>
    %706 = arith.mulf %698, %705 : vector<8x16xf32>
    %cst_322 = arith.constant 0.0308918804 : f32
    %707 = vector.broadcast %cst_322 : f32 to vector<8x16xf32>
    %708 = arith.addf %707, %706 : vector<8x16xf32>
    %709 = arith.mulf %698, %708 : vector<8x16xf32>
    %cst_323 = arith.constant -0.0501743034 : f32
    %710 = vector.broadcast %cst_323 : f32 to vector<8x16xf32>
    %711 = arith.addf %710, %709 : vector<8x16xf32>
    %712 = arith.mulf %698, %711 : vector<8x16xf32>
    %cst_324 = arith.constant 0.0889789909 : f32
    %713 = vector.broadcast %cst_324 : f32 to vector<8x16xf32>
    %714 = arith.addf %713, %712 : vector<8x16xf32>
    %715 = arith.mulf %698, %714 : vector<8x16xf32>
    %cst_325 = arith.constant -0.214598805 : f32
    %716 = vector.broadcast %cst_325 : f32 to vector<8x16xf32>
    %717 = arith.addf %716, %715 : vector<8x16xf32>
    %718 = arith.mulf %698, %717 : vector<8x16xf32>
    %cst_326 = arith.constant 1.57079625 : f32
    %719 = vector.broadcast %cst_326 : f32 to vector<8x16xf32>
    %720 = arith.addf %719, %718 : vector<8x16xf32>
    %cst_327 = arith.constant 1.000000e+00 : f32
    %721 = vector.broadcast %cst_327 : f32 to vector<8x16xf32>
    %722 = arith.subf %721, %698 : vector<8x16xf32>
    %cst_328 = arith.constant 0.000000e+00 : f32
    %723 = vector.broadcast %cst_328 : f32 to vector<8x16xf32>
    %724 = arith.maximumf %722, %723 : vector<8x16xf32>
    %725 = math.sqrt %724 : vector<8x16xf32>
    %726 = arith.mulf %725, %720 : vector<8x16xf32>
    %cst_329 = arith.constant 0.000000e+00 : f32
    %727 = vector.broadcast %cst_329 : f32 to vector<8x16xf32>
    %728 = arith.cmpf olt, %681, %727 : vector<8x16xf32>
    %cst_330 = arith.constant 3.14159274 : f32
    %729 = vector.broadcast %cst_330 : f32 to vector<8x16xf32>
    %730 = arith.subf %729, %726 : vector<8x16xf32>
    %731 = arith.select %728, %730, %726 : vector<8x16xi1>, vector<8x16xf32>
    %732 = arith.mulf %653, %731 : vector<8x16xf32>
    %733 = arith.select %697, %732, %646 : vector<8x16xi1>, vector<8x16xf32>
    %734 = arith.ori %647, %695 : vector<8x16xi1>
    %c8 = arith.constant 8 : index
    %c0_331 = arith.constant 0 : index
    %c0_332 = arith.constant 0 : index
    %c0_333 = arith.constant 0 : index
    %735 = vector.load %arg3[%c8, %c0_331, %c0_332, %c0_333] : memref<24x3x8x16xf32, #tpu.memory_space<vmem>>, vector<1x1x8x16xf32>
    %736 = vector.shape_cast %735 : vector<1x1x8x16xf32> to vector<8x16xf32>
    %c8_334 = arith.constant 8 : index
    %c1_335 = arith.constant 1 : index
    %c0_336 = arith.constant 0 : index
    %c0_337 = arith.constant 0 : index
    %737 = vector.load %arg3[%c8_334, %c1_335, %c0_336, %c0_337] : memref<24x3x8x16xf32, #tpu.memory_space<vmem>>, vector<1x1x8x16xf32>
    %738 = vector.shape_cast %737 : vector<1x1x8x16xf32> to vector<8x16xf32>
    %c8_338 = arith.constant 8 : index
    %c2_339 = arith.constant 2 : index
    %c0_340 = arith.constant 0 : index
    %c0_341 = arith.constant 0 : index
    %739 = vector.load %arg3[%c8_338, %c2_339, %c0_340, %c0_341] : memref<24x3x8x16xf32, #tpu.memory_space<vmem>>, vector<1x1x8x16xf32>
    %740 = vector.shape_cast %739 : vector<1x1x8x16xf32> to vector<8x16xf32>
    %cst_342 = arith.constant 5.000000e-01 : f32
    %741 = vector.broadcast %cst_342 : f32 to vector<8x16xf32>
    %742 = arith.subf %736, %741 : vector<8x16xf32>
    %cst_343 = arith.constant 3.14159274 : f32
    %743 = vector.broadcast %cst_343 : f32 to vector<8x16xf32>
    %744 = arith.mulf %743, %742 : vector<8x16xf32>
    %745 = arith.mulf %744, %744 : vector<8x16xf32>
    %cst_344 = arith.constant 2.75573188E-6 : f32
    %746 = vector.broadcast %cst_344 : f32 to vector<8x16xf32>
    %747 = arith.mulf %745, %746 : vector<8x16xf32>
    %cst_345 = arith.constant -1.98412701E-4 : f32
    %748 = vector.broadcast %cst_345 : f32 to vector<8x16xf32>
    %749 = arith.addf %748, %747 : vector<8x16xf32>
    %750 = arith.mulf %745, %749 : vector<8x16xf32>
    %cst_346 = arith.constant 0.00833333377 : f32
    %751 = vector.broadcast %cst_346 : f32 to vector<8x16xf32>
    %752 = arith.addf %751, %750 : vector<8x16xf32>
    %753 = arith.mulf %745, %752 : vector<8x16xf32>
    %cst_347 = arith.constant -0.166666672 : f32
    %754 = vector.broadcast %cst_347 : f32 to vector<8x16xf32>
    %755 = arith.addf %754, %753 : vector<8x16xf32>
    %756 = arith.mulf %745, %755 : vector<8x16xf32>
    %cst_348 = arith.constant 1.000000e+00 : f32
    %757 = vector.broadcast %cst_348 : f32 to vector<8x16xf32>
    %758 = arith.addf %757, %756 : vector<8x16xf32>
    %759 = arith.mulf %744, %758 : vector<8x16xf32>
    %cst_349 = arith.constant 0.000000e+00 : f32
    %760 = vector.broadcast %cst_349 : f32 to vector<8x16xf32>
    %761 = arith.subf %760, %759 : vector<8x16xf32>
    %cst_350 = arith.constant 1.00501251 : f32
    %762 = vector.broadcast %cst_350 : f32 to vector<8x16xf32>
    %763 = arith.mulf %762, %761 : vector<8x16xf32>
    %cst_351 = arith.constant 1.000000e+00 : f32
    %764 = vector.broadcast %cst_351 : f32 to vector<8x16xf32>
    %765 = arith.addf %764, %763 : vector<8x16xf32>
    %cst_352 = arith.constant 1.00501251 : f32
    %766 = vector.broadcast %cst_352 : f32 to vector<8x16xf32>
    %767 = arith.addf %766, %761 : vector<8x16xf32>
    %768 = arith.divf %765, %767 : vector<8x16xf32>
    %cst_353 = arith.constant 1.00501251 : f32
    %769 = vector.broadcast %cst_353 : f32 to vector<8x16xf32>
    %770 = arith.subf %769, %768 : vector<8x16xf32>
    %cst_354 = arith.constant 1.000000e+02 : f32
    %771 = vector.broadcast %cst_354 : f32 to vector<8x16xf32>
    %772 = arith.mulf %771, %770 : vector<8x16xf32>
    %cst_355 = arith.constant 2.000000e+00 : f32
    %773 = vector.broadcast %cst_355 : f32 to vector<8x16xf32>
    %774 = arith.subf %773, %772 : vector<8x16xf32>
    %775 = arith.mulf %772, %774 : vector<8x16xf32>
    %776 = arith.cmpf ogt, %775, %738 : vector<8x16xf32>
    %cst_356 = arith.constant 1.000000e+00 : f32
    %777 = vector.broadcast %cst_356 : f32 to vector<8x16xf32>
    %778 = arith.subf %777, %772 : vector<8x16xf32>
    %779 = math.exp %778 : vector<8x16xf32>
    %780 = arith.mulf %772, %779 : vector<8x16xf32>
    %781 = arith.cmpf oge, %780, %738 : vector<8x16xf32>
    %782 = arith.ori %776, %781 : vector<8x16xi1>
    %cst_357 = arith.constant dense<true> : vector<8x16xi1>
    %783 = arith.xori %734, %cst_357 : vector<8x16xi1>
    %784 = arith.andi %782, %783 : vector<8x16xi1>
    %785 = math.absf %768 : vector<8x16xf32>
    %cst_358 = arith.constant -0.0012624911 : f32
    %786 = vector.broadcast %cst_358 : f32 to vector<8x16xf32>
    %787 = arith.mulf %785, %786 : vector<8x16xf32>
    %cst_359 = arith.constant 6.670090e-03 : f32
    %788 = vector.broadcast %cst_359 : f32 to vector<8x16xf32>
    %789 = arith.addf %788, %787 : vector<8x16xf32>
    %790 = arith.mulf %785, %789 : vector<8x16xf32>
    %cst_360 = arith.constant -0.0170881264 : f32
    %791 = vector.broadcast %cst_360 : f32 to vector<8x16xf32>
    %792 = arith.addf %791, %790 : vector<8x16xf32>
    %793 = arith.mulf %785, %792 : vector<8x16xf32>
    %cst_361 = arith.constant 0.0308918804 : f32
    %794 = vector.broadcast %cst_361 : f32 to vector<8x16xf32>
    %795 = arith.addf %794, %793 : vector<8x16xf32>
    %796 = arith.mulf %785, %795 : vector<8x16xf32>
    %cst_362 = arith.constant -0.0501743034 : f32
    %797 = vector.broadcast %cst_362 : f32 to vector<8x16xf32>
    %798 = arith.addf %797, %796 : vector<8x16xf32>
    %799 = arith.mulf %785, %798 : vector<8x16xf32>
    %cst_363 = arith.constant 0.0889789909 : f32
    %800 = vector.broadcast %cst_363 : f32 to vector<8x16xf32>
    %801 = arith.addf %800, %799 : vector<8x16xf32>
    %802 = arith.mulf %785, %801 : vector<8x16xf32>
    %cst_364 = arith.constant -0.214598805 : f32
    %803 = vector.broadcast %cst_364 : f32 to vector<8x16xf32>
    %804 = arith.addf %803, %802 : vector<8x16xf32>
    %805 = arith.mulf %785, %804 : vector<8x16xf32>
    %cst_365 = arith.constant 1.57079625 : f32
    %806 = vector.broadcast %cst_365 : f32 to vector<8x16xf32>
    %807 = arith.addf %806, %805 : vector<8x16xf32>
    %cst_366 = arith.constant 1.000000e+00 : f32
    %808 = vector.broadcast %cst_366 : f32 to vector<8x16xf32>
    %809 = arith.subf %808, %785 : vector<8x16xf32>
    %cst_367 = arith.constant 0.000000e+00 : f32
    %810 = vector.broadcast %cst_367 : f32 to vector<8x16xf32>
    %811 = arith.maximumf %809, %810 : vector<8x16xf32>
    %812 = math.sqrt %811 : vector<8x16xf32>
    %813 = arith.mulf %812, %807 : vector<8x16xf32>
    %cst_368 = arith.constant 0.000000e+00 : f32
    %814 = vector.broadcast %cst_368 : f32 to vector<8x16xf32>
    %815 = arith.cmpf olt, %768, %814 : vector<8x16xf32>
    %cst_369 = arith.constant 3.14159274 : f32
    %816 = vector.broadcast %cst_369 : f32 to vector<8x16xf32>
    %817 = arith.subf %816, %813 : vector<8x16xf32>
    %818 = arith.select %815, %817, %813 : vector<8x16xi1>, vector<8x16xf32>
    %819 = arith.mulf %740, %818 : vector<8x16xf32>
    %820 = arith.select %784, %819, %733 : vector<8x16xi1>, vector<8x16xf32>
    %821 = arith.ori %734, %782 : vector<8x16xi1>
    %c9 = arith.constant 9 : index
    %c0_370 = arith.constant 0 : index
    %c0_371 = arith.constant 0 : index
    %c0_372 = arith.constant 0 : index
    %822 = vector.load %arg3[%c9, %c0_370, %c0_371, %c0_372] : memref<24x3x8x16xf32, #tpu.memory_space<vmem>>, vector<1x1x8x16xf32>
    %823 = vector.shape_cast %822 : vector<1x1x8x16xf32> to vector<8x16xf32>
    %c9_373 = arith.constant 9 : index
    %c1_374 = arith.constant 1 : index
    %c0_375 = arith.constant 0 : index
    %c0_376 = arith.constant 0 : index
    %824 = vector.load %arg3[%c9_373, %c1_374, %c0_375, %c0_376] : memref<24x3x8x16xf32, #tpu.memory_space<vmem>>, vector<1x1x8x16xf32>
    %825 = vector.shape_cast %824 : vector<1x1x8x16xf32> to vector<8x16xf32>
    %c9_377 = arith.constant 9 : index
    %c2_378 = arith.constant 2 : index
    %c0_379 = arith.constant 0 : index
    %c0_380 = arith.constant 0 : index
    %826 = vector.load %arg3[%c9_377, %c2_378, %c0_379, %c0_380] : memref<24x3x8x16xf32, #tpu.memory_space<vmem>>, vector<1x1x8x16xf32>
    %827 = vector.shape_cast %826 : vector<1x1x8x16xf32> to vector<8x16xf32>
    %cst_381 = arith.constant 5.000000e-01 : f32
    %828 = vector.broadcast %cst_381 : f32 to vector<8x16xf32>
    %829 = arith.subf %823, %828 : vector<8x16xf32>
    %cst_382 = arith.constant 3.14159274 : f32
    %830 = vector.broadcast %cst_382 : f32 to vector<8x16xf32>
    %831 = arith.mulf %830, %829 : vector<8x16xf32>
    %832 = arith.mulf %831, %831 : vector<8x16xf32>
    %cst_383 = arith.constant 2.75573188E-6 : f32
    %833 = vector.broadcast %cst_383 : f32 to vector<8x16xf32>
    %834 = arith.mulf %832, %833 : vector<8x16xf32>
    %cst_384 = arith.constant -1.98412701E-4 : f32
    %835 = vector.broadcast %cst_384 : f32 to vector<8x16xf32>
    %836 = arith.addf %835, %834 : vector<8x16xf32>
    %837 = arith.mulf %832, %836 : vector<8x16xf32>
    %cst_385 = arith.constant 0.00833333377 : f32
    %838 = vector.broadcast %cst_385 : f32 to vector<8x16xf32>
    %839 = arith.addf %838, %837 : vector<8x16xf32>
    %840 = arith.mulf %832, %839 : vector<8x16xf32>
    %cst_386 = arith.constant -0.166666672 : f32
    %841 = vector.broadcast %cst_386 : f32 to vector<8x16xf32>
    %842 = arith.addf %841, %840 : vector<8x16xf32>
    %843 = arith.mulf %832, %842 : vector<8x16xf32>
    %cst_387 = arith.constant 1.000000e+00 : f32
    %844 = vector.broadcast %cst_387 : f32 to vector<8x16xf32>
    %845 = arith.addf %844, %843 : vector<8x16xf32>
    %846 = arith.mulf %831, %845 : vector<8x16xf32>
    %cst_388 = arith.constant 0.000000e+00 : f32
    %847 = vector.broadcast %cst_388 : f32 to vector<8x16xf32>
    %848 = arith.subf %847, %846 : vector<8x16xf32>
    %cst_389 = arith.constant 1.00501251 : f32
    %849 = vector.broadcast %cst_389 : f32 to vector<8x16xf32>
    %850 = arith.mulf %849, %848 : vector<8x16xf32>
    %cst_390 = arith.constant 1.000000e+00 : f32
    %851 = vector.broadcast %cst_390 : f32 to vector<8x16xf32>
    %852 = arith.addf %851, %850 : vector<8x16xf32>
    %cst_391 = arith.constant 1.00501251 : f32
    %853 = vector.broadcast %cst_391 : f32 to vector<8x16xf32>
    %854 = arith.addf %853, %848 : vector<8x16xf32>
    %855 = arith.divf %852, %854 : vector<8x16xf32>
    %cst_392 = arith.constant 1.00501251 : f32
    %856 = vector.broadcast %cst_392 : f32 to vector<8x16xf32>
    %857 = arith.subf %856, %855 : vector<8x16xf32>
    %cst_393 = arith.constant 1.000000e+02 : f32
    %858 = vector.broadcast %cst_393 : f32 to vector<8x16xf32>
    %859 = arith.mulf %858, %857 : vector<8x16xf32>
    %cst_394 = arith.constant 2.000000e+00 : f32
    %860 = vector.broadcast %cst_394 : f32 to vector<8x16xf32>
    %861 = arith.subf %860, %859 : vector<8x16xf32>
    %862 = arith.mulf %859, %861 : vector<8x16xf32>
    %863 = arith.cmpf ogt, %862, %825 : vector<8x16xf32>
    %cst_395 = arith.constant 1.000000e+00 : f32
    %864 = vector.broadcast %cst_395 : f32 to vector<8x16xf32>
    %865 = arith.subf %864, %859 : vector<8x16xf32>
    %866 = math.exp %865 : vector<8x16xf32>
    %867 = arith.mulf %859, %866 : vector<8x16xf32>
    %868 = arith.cmpf oge, %867, %825 : vector<8x16xf32>
    %869 = arith.ori %863, %868 : vector<8x16xi1>
    %cst_396 = arith.constant dense<true> : vector<8x16xi1>
    %870 = arith.xori %821, %cst_396 : vector<8x16xi1>
    %871 = arith.andi %869, %870 : vector<8x16xi1>
    %872 = math.absf %855 : vector<8x16xf32>
    %cst_397 = arith.constant -0.0012624911 : f32
    %873 = vector.broadcast %cst_397 : f32 to vector<8x16xf32>
    %874 = arith.mulf %872, %873 : vector<8x16xf32>
    %cst_398 = arith.constant 6.670090e-03 : f32
    %875 = vector.broadcast %cst_398 : f32 to vector<8x16xf32>
    %876 = arith.addf %875, %874 : vector<8x16xf32>
    %877 = arith.mulf %872, %876 : vector<8x16xf32>
    %cst_399 = arith.constant -0.0170881264 : f32
    %878 = vector.broadcast %cst_399 : f32 to vector<8x16xf32>
    %879 = arith.addf %878, %877 : vector<8x16xf32>
    %880 = arith.mulf %872, %879 : vector<8x16xf32>
    %cst_400 = arith.constant 0.0308918804 : f32
    %881 = vector.broadcast %cst_400 : f32 to vector<8x16xf32>
    %882 = arith.addf %881, %880 : vector<8x16xf32>
    %883 = arith.mulf %872, %882 : vector<8x16xf32>
    %cst_401 = arith.constant -0.0501743034 : f32
    %884 = vector.broadcast %cst_401 : f32 to vector<8x16xf32>
    %885 = arith.addf %884, %883 : vector<8x16xf32>
    %886 = arith.mulf %872, %885 : vector<8x16xf32>
    %cst_402 = arith.constant 0.0889789909 : f32
    %887 = vector.broadcast %cst_402 : f32 to vector<8x16xf32>
    %888 = arith.addf %887, %886 : vector<8x16xf32>
    %889 = arith.mulf %872, %888 : vector<8x16xf32>
    %cst_403 = arith.constant -0.214598805 : f32
    %890 = vector.broadcast %cst_403 : f32 to vector<8x16xf32>
    %891 = arith.addf %890, %889 : vector<8x16xf32>
    %892 = arith.mulf %872, %891 : vector<8x16xf32>
    %cst_404 = arith.constant 1.57079625 : f32
    %893 = vector.broadcast %cst_404 : f32 to vector<8x16xf32>
    %894 = arith.addf %893, %892 : vector<8x16xf32>
    %cst_405 = arith.constant 1.000000e+00 : f32
    %895 = vector.broadcast %cst_405 : f32 to vector<8x16xf32>
    %896 = arith.subf %895, %872 : vector<8x16xf32>
    %cst_406 = arith.constant 0.000000e+00 : f32
    %897 = vector.broadcast %cst_406 : f32 to vector<8x16xf32>
    %898 = arith.maximumf %896, %897 : vector<8x16xf32>
    %899 = math.sqrt %898 : vector<8x16xf32>
    %900 = arith.mulf %899, %894 : vector<8x16xf32>
    %cst_407 = arith.constant 0.000000e+00 : f32
    %901 = vector.broadcast %cst_407 : f32 to vector<8x16xf32>
    %902 = arith.cmpf olt, %855, %901 : vector<8x16xf32>
    %cst_408 = arith.constant 3.14159274 : f32
    %903 = vector.broadcast %cst_408 : f32 to vector<8x16xf32>
    %904 = arith.subf %903, %900 : vector<8x16xf32>
    %905 = arith.select %902, %904, %900 : vector<8x16xi1>, vector<8x16xf32>
    %906 = arith.mulf %827, %905 : vector<8x16xf32>
    %907 = arith.select %871, %906, %820 : vector<8x16xi1>, vector<8x16xf32>
    %908 = arith.ori %821, %869 : vector<8x16xi1>
    %c10 = arith.constant 10 : index
    %c0_409 = arith.constant 0 : index
    %c0_410 = arith.constant 0 : index
    %c0_411 = arith.constant 0 : index
    %909 = vector.load %arg3[%c10, %c0_409, %c0_410, %c0_411] : memref<24x3x8x16xf32, #tpu.memory_space<vmem>>, vector<1x1x8x16xf32>
    %910 = vector.shape_cast %909 : vector<1x1x8x16xf32> to vector<8x16xf32>
    %c10_412 = arith.constant 10 : index
    %c1_413 = arith.constant 1 : index
    %c0_414 = arith.constant 0 : index
    %c0_415 = arith.constant 0 : index
    %911 = vector.load %arg3[%c10_412, %c1_413, %c0_414, %c0_415] : memref<24x3x8x16xf32, #tpu.memory_space<vmem>>, vector<1x1x8x16xf32>
    %912 = vector.shape_cast %911 : vector<1x1x8x16xf32> to vector<8x16xf32>
    %c10_416 = arith.constant 10 : index
    %c2_417 = arith.constant 2 : index
    %c0_418 = arith.constant 0 : index
    %c0_419 = arith.constant 0 : index
    %913 = vector.load %arg3[%c10_416, %c2_417, %c0_418, %c0_419] : memref<24x3x8x16xf32, #tpu.memory_space<vmem>>, vector<1x1x8x16xf32>
    %914 = vector.shape_cast %913 : vector<1x1x8x16xf32> to vector<8x16xf32>
    %cst_420 = arith.constant 5.000000e-01 : f32
    %915 = vector.broadcast %cst_420 : f32 to vector<8x16xf32>
    %916 = arith.subf %910, %915 : vector<8x16xf32>
    %cst_421 = arith.constant 3.14159274 : f32
    %917 = vector.broadcast %cst_421 : f32 to vector<8x16xf32>
    %918 = arith.mulf %917, %916 : vector<8x16xf32>
    %919 = arith.mulf %918, %918 : vector<8x16xf32>
    %cst_422 = arith.constant 2.75573188E-6 : f32
    %920 = vector.broadcast %cst_422 : f32 to vector<8x16xf32>
    %921 = arith.mulf %919, %920 : vector<8x16xf32>
    %cst_423 = arith.constant -1.98412701E-4 : f32
    %922 = vector.broadcast %cst_423 : f32 to vector<8x16xf32>
    %923 = arith.addf %922, %921 : vector<8x16xf32>
    %924 = arith.mulf %919, %923 : vector<8x16xf32>
    %cst_424 = arith.constant 0.00833333377 : f32
    %925 = vector.broadcast %cst_424 : f32 to vector<8x16xf32>
    %926 = arith.addf %925, %924 : vector<8x16xf32>
    %927 = arith.mulf %919, %926 : vector<8x16xf32>
    %cst_425 = arith.constant -0.166666672 : f32
    %928 = vector.broadcast %cst_425 : f32 to vector<8x16xf32>
    %929 = arith.addf %928, %927 : vector<8x16xf32>
    %930 = arith.mulf %919, %929 : vector<8x16xf32>
    %cst_426 = arith.constant 1.000000e+00 : f32
    %931 = vector.broadcast %cst_426 : f32 to vector<8x16xf32>
    %932 = arith.addf %931, %930 : vector<8x16xf32>
    %933 = arith.mulf %918, %932 : vector<8x16xf32>
    %cst_427 = arith.constant 0.000000e+00 : f32
    %934 = vector.broadcast %cst_427 : f32 to vector<8x16xf32>
    %935 = arith.subf %934, %933 : vector<8x16xf32>
    %cst_428 = arith.constant 1.00501251 : f32
    %936 = vector.broadcast %cst_428 : f32 to vector<8x16xf32>
    %937 = arith.mulf %936, %935 : vector<8x16xf32>
    %cst_429 = arith.constant 1.000000e+00 : f32
    %938 = vector.broadcast %cst_429 : f32 to vector<8x16xf32>
    %939 = arith.addf %938, %937 : vector<8x16xf32>
    %cst_430 = arith.constant 1.00501251 : f32
    %940 = vector.broadcast %cst_430 : f32 to vector<8x16xf32>
    %941 = arith.addf %940, %935 : vector<8x16xf32>
    %942 = arith.divf %939, %941 : vector<8x16xf32>
    %cst_431 = arith.constant 1.00501251 : f32
    %943 = vector.broadcast %cst_431 : f32 to vector<8x16xf32>
    %944 = arith.subf %943, %942 : vector<8x16xf32>
    %cst_432 = arith.constant 1.000000e+02 : f32
    %945 = vector.broadcast %cst_432 : f32 to vector<8x16xf32>
    %946 = arith.mulf %945, %944 : vector<8x16xf32>
    %cst_433 = arith.constant 2.000000e+00 : f32
    %947 = vector.broadcast %cst_433 : f32 to vector<8x16xf32>
    %948 = arith.subf %947, %946 : vector<8x16xf32>
    %949 = arith.mulf %946, %948 : vector<8x16xf32>
    %950 = arith.cmpf ogt, %949, %912 : vector<8x16xf32>
    %cst_434 = arith.constant 1.000000e+00 : f32
    %951 = vector.broadcast %cst_434 : f32 to vector<8x16xf32>
    %952 = arith.subf %951, %946 : vector<8x16xf32>
    %953 = math.exp %952 : vector<8x16xf32>
    %954 = arith.mulf %946, %953 : vector<8x16xf32>
    %955 = arith.cmpf oge, %954, %912 : vector<8x16xf32>
    %956 = arith.ori %950, %955 : vector<8x16xi1>
    %cst_435 = arith.constant dense<true> : vector<8x16xi1>
    %957 = arith.xori %908, %cst_435 : vector<8x16xi1>
    %958 = arith.andi %956, %957 : vector<8x16xi1>
    %959 = math.absf %942 : vector<8x16xf32>
    %cst_436 = arith.constant -0.0012624911 : f32
    %960 = vector.broadcast %cst_436 : f32 to vector<8x16xf32>
    %961 = arith.mulf %959, %960 : vector<8x16xf32>
    %cst_437 = arith.constant 6.670090e-03 : f32
    %962 = vector.broadcast %cst_437 : f32 to vector<8x16xf32>
    %963 = arith.addf %962, %961 : vector<8x16xf32>
    %964 = arith.mulf %959, %963 : vector<8x16xf32>
    %cst_438 = arith.constant -0.0170881264 : f32
    %965 = vector.broadcast %cst_438 : f32 to vector<8x16xf32>
    %966 = arith.addf %965, %964 : vector<8x16xf32>
    %967 = arith.mulf %959, %966 : vector<8x16xf32>
    %cst_439 = arith.constant 0.0308918804 : f32
    %968 = vector.broadcast %cst_439 : f32 to vector<8x16xf32>
    %969 = arith.addf %968, %967 : vector<8x16xf32>
    %970 = arith.mulf %959, %969 : vector<8x16xf32>
    %cst_440 = arith.constant -0.0501743034 : f32
    %971 = vector.broadcast %cst_440 : f32 to vector<8x16xf32>
    %972 = arith.addf %971, %970 : vector<8x16xf32>
    %973 = arith.mulf %959, %972 : vector<8x16xf32>
    %cst_441 = arith.constant 0.0889789909 : f32
    %974 = vector.broadcast %cst_441 : f32 to vector<8x16xf32>
    %975 = arith.addf %974, %973 : vector<8x16xf32>
    %976 = arith.mulf %959, %975 : vector<8x16xf32>
    %cst_442 = arith.constant -0.214598805 : f32
    %977 = vector.broadcast %cst_442 : f32 to vector<8x16xf32>
    %978 = arith.addf %977, %976 : vector<8x16xf32>
    %979 = arith.mulf %959, %978 : vector<8x16xf32>
    %cst_443 = arith.constant 1.57079625 : f32
    %980 = vector.broadcast %cst_443 : f32 to vector<8x16xf32>
    %981 = arith.addf %980, %979 : vector<8x16xf32>
    %cst_444 = arith.constant 1.000000e+00 : f32
    %982 = vector.broadcast %cst_444 : f32 to vector<8x16xf32>
    %983 = arith.subf %982, %959 : vector<8x16xf32>
    %cst_445 = arith.constant 0.000000e+00 : f32
    %984 = vector.broadcast %cst_445 : f32 to vector<8x16xf32>
    %985 = arith.maximumf %983, %984 : vector<8x16xf32>
    %986 = math.sqrt %985 : vector<8x16xf32>
    %987 = arith.mulf %986, %981 : vector<8x16xf32>
    %cst_446 = arith.constant 0.000000e+00 : f32
    %988 = vector.broadcast %cst_446 : f32 to vector<8x16xf32>
    %989 = arith.cmpf olt, %942, %988 : vector<8x16xf32>
    %cst_447 = arith.constant 3.14159274 : f32
    %990 = vector.broadcast %cst_447 : f32 to vector<8x16xf32>
    %991 = arith.subf %990, %987 : vector<8x16xf32>
    %992 = arith.select %989, %991, %987 : vector<8x16xi1>, vector<8x16xf32>
    %993 = arith.mulf %914, %992 : vector<8x16xf32>
    %994 = arith.select %958, %993, %907 : vector<8x16xi1>, vector<8x16xf32>
    %995 = arith.ori %908, %956 : vector<8x16xi1>
    %c11 = arith.constant 11 : index
    %c0_448 = arith.constant 0 : index
    %c0_449 = arith.constant 0 : index
    %c0_450 = arith.constant 0 : index
    %996 = vector.load %arg3[%c11, %c0_448, %c0_449, %c0_450] : memref<24x3x8x16xf32, #tpu.memory_space<vmem>>, vector<1x1x8x16xf32>
    %997 = vector.shape_cast %996 : vector<1x1x8x16xf32> to vector<8x16xf32>
    %c11_451 = arith.constant 11 : index
    %c1_452 = arith.constant 1 : index
    %c0_453 = arith.constant 0 : index
    %c0_454 = arith.constant 0 : index
    %998 = vector.load %arg3[%c11_451, %c1_452, %c0_453, %c0_454] : memref<24x3x8x16xf32, #tpu.memory_space<vmem>>, vector<1x1x8x16xf32>
    %999 = vector.shape_cast %998 : vector<1x1x8x16xf32> to vector<8x16xf32>
    %c11_455 = arith.constant 11 : index
    %c2_456 = arith.constant 2 : index
    %c0_457 = arith.constant 0 : index
    %c0_458 = arith.constant 0 : index
    %1000 = vector.load %arg3[%c11_455, %c2_456, %c0_457, %c0_458] : memref<24x3x8x16xf32, #tpu.memory_space<vmem>>, vector<1x1x8x16xf32>
    %1001 = vector.shape_cast %1000 : vector<1x1x8x16xf32> to vector<8x16xf32>
    %cst_459 = arith.constant 5.000000e-01 : f32
    %1002 = vector.broadcast %cst_459 : f32 to vector<8x16xf32>
    %1003 = arith.subf %997, %1002 : vector<8x16xf32>
    %cst_460 = arith.constant 3.14159274 : f32
    %1004 = vector.broadcast %cst_460 : f32 to vector<8x16xf32>
    %1005 = arith.mulf %1004, %1003 : vector<8x16xf32>
    %1006 = arith.mulf %1005, %1005 : vector<8x16xf32>
    %cst_461 = arith.constant 2.75573188E-6 : f32
    %1007 = vector.broadcast %cst_461 : f32 to vector<8x16xf32>
    %1008 = arith.mulf %1006, %1007 : vector<8x16xf32>
    %cst_462 = arith.constant -1.98412701E-4 : f32
    %1009 = vector.broadcast %cst_462 : f32 to vector<8x16xf32>
    %1010 = arith.addf %1009, %1008 : vector<8x16xf32>
    %1011 = arith.mulf %1006, %1010 : vector<8x16xf32>
    %cst_463 = arith.constant 0.00833333377 : f32
    %1012 = vector.broadcast %cst_463 : f32 to vector<8x16xf32>
    %1013 = arith.addf %1012, %1011 : vector<8x16xf32>
    %1014 = arith.mulf %1006, %1013 : vector<8x16xf32>
    %cst_464 = arith.constant -0.166666672 : f32
    %1015 = vector.broadcast %cst_464 : f32 to vector<8x16xf32>
    %1016 = arith.addf %1015, %1014 : vector<8x16xf32>
    %1017 = arith.mulf %1006, %1016 : vector<8x16xf32>
    %cst_465 = arith.constant 1.000000e+00 : f32
    %1018 = vector.broadcast %cst_465 : f32 to vector<8x16xf32>
    %1019 = arith.addf %1018, %1017 : vector<8x16xf32>
    %1020 = arith.mulf %1005, %1019 : vector<8x16xf32>
    %cst_466 = arith.constant 0.000000e+00 : f32
    %1021 = vector.broadcast %cst_466 : f32 to vector<8x16xf32>
    %1022 = arith.subf %1021, %1020 : vector<8x16xf32>
    %cst_467 = arith.constant 1.00501251 : f32
    %1023 = vector.broadcast %cst_467 : f32 to vector<8x16xf32>
    %1024 = arith.mulf %1023, %1022 : vector<8x16xf32>
    %cst_468 = arith.constant 1.000000e+00 : f32
    %1025 = vector.broadcast %cst_468 : f32 to vector<8x16xf32>
    %1026 = arith.addf %1025, %1024 : vector<8x16xf32>
    %cst_469 = arith.constant 1.00501251 : f32
    %1027 = vector.broadcast %cst_469 : f32 to vector<8x16xf32>
    %1028 = arith.addf %1027, %1022 : vector<8x16xf32>
    %1029 = arith.divf %1026, %1028 : vector<8x16xf32>
    %cst_470 = arith.constant 1.00501251 : f32
    %1030 = vector.broadcast %cst_470 : f32 to vector<8x16xf32>
    %1031 = arith.subf %1030, %1029 : vector<8x16xf32>
    %cst_471 = arith.constant 1.000000e+02 : f32
    %1032 = vector.broadcast %cst_471 : f32 to vector<8x16xf32>
    %1033 = arith.mulf %1032, %1031 : vector<8x16xf32>
    %cst_472 = arith.constant 2.000000e+00 : f32
    %1034 = vector.broadcast %cst_472 : f32 to vector<8x16xf32>
    %1035 = arith.subf %1034, %1033 : vector<8x16xf32>
    %1036 = arith.mulf %1033, %1035 : vector<8x16xf32>
    %1037 = arith.cmpf ogt, %1036, %999 : vector<8x16xf32>
    %cst_473 = arith.constant 1.000000e+00 : f32
    %1038 = vector.broadcast %cst_473 : f32 to vector<8x16xf32>
    %1039 = arith.subf %1038, %1033 : vector<8x16xf32>
    %1040 = math.exp %1039 : vector<8x16xf32>
    %1041 = arith.mulf %1033, %1040 : vector<8x16xf32>
    %1042 = arith.cmpf oge, %1041, %999 : vector<8x16xf32>
    %1043 = arith.ori %1037, %1042 : vector<8x16xi1>
    %cst_474 = arith.constant dense<true> : vector<8x16xi1>
    %1044 = arith.xori %995, %cst_474 : vector<8x16xi1>
    %1045 = arith.andi %1043, %1044 : vector<8x16xi1>
    %1046 = math.absf %1029 : vector<8x16xf32>
    %cst_475 = arith.constant -0.0012624911 : f32
    %1047 = vector.broadcast %cst_475 : f32 to vector<8x16xf32>
    %1048 = arith.mulf %1046, %1047 : vector<8x16xf32>
    %cst_476 = arith.constant 6.670090e-03 : f32
    %1049 = vector.broadcast %cst_476 : f32 to vector<8x16xf32>
    %1050 = arith.addf %1049, %1048 : vector<8x16xf32>
    %1051 = arith.mulf %1046, %1050 : vector<8x16xf32>
    %cst_477 = arith.constant -0.0170881264 : f32
    %1052 = vector.broadcast %cst_477 : f32 to vector<8x16xf32>
    %1053 = arith.addf %1052, %1051 : vector<8x16xf32>
    %1054 = arith.mulf %1046, %1053 : vector<8x16xf32>
    %cst_478 = arith.constant 0.0308918804 : f32
    %1055 = vector.broadcast %cst_478 : f32 to vector<8x16xf32>
    %1056 = arith.addf %1055, %1054 : vector<8x16xf32>
    %1057 = arith.mulf %1046, %1056 : vector<8x16xf32>
    %cst_479 = arith.constant -0.0501743034 : f32
    %1058 = vector.broadcast %cst_479 : f32 to vector<8x16xf32>
    %1059 = arith.addf %1058, %1057 : vector<8x16xf32>
    %1060 = arith.mulf %1046, %1059 : vector<8x16xf32>
    %cst_480 = arith.constant 0.0889789909 : f32
    %1061 = vector.broadcast %cst_480 : f32 to vector<8x16xf32>
    %1062 = arith.addf %1061, %1060 : vector<8x16xf32>
    %1063 = arith.mulf %1046, %1062 : vector<8x16xf32>
    %cst_481 = arith.constant -0.214598805 : f32
    %1064 = vector.broadcast %cst_481 : f32 to vector<8x16xf32>
    %1065 = arith.addf %1064, %1063 : vector<8x16xf32>
    %1066 = arith.mulf %1046, %1065 : vector<8x16xf32>
    %cst_482 = arith.constant 1.57079625 : f32
    %1067 = vector.broadcast %cst_482 : f32 to vector<8x16xf32>
    %1068 = arith.addf %1067, %1066 : vector<8x16xf32>
    %cst_483 = arith.constant 1.000000e+00 : f32
    %1069 = vector.broadcast %cst_483 : f32 to vector<8x16xf32>
    %1070 = arith.subf %1069, %1046 : vector<8x16xf32>
    %cst_484 = arith.constant 0.000000e+00 : f32
    %1071 = vector.broadcast %cst_484 : f32 to vector<8x16xf32>
    %1072 = arith.maximumf %1070, %1071 : vector<8x16xf32>
    %1073 = math.sqrt %1072 : vector<8x16xf32>
    %1074 = arith.mulf %1073, %1068 : vector<8x16xf32>
    %cst_485 = arith.constant 0.000000e+00 : f32
    %1075 = vector.broadcast %cst_485 : f32 to vector<8x16xf32>
    %1076 = arith.cmpf olt, %1029, %1075 : vector<8x16xf32>
    %cst_486 = arith.constant 3.14159274 : f32
    %1077 = vector.broadcast %cst_486 : f32 to vector<8x16xf32>
    %1078 = arith.subf %1077, %1074 : vector<8x16xf32>
    %1079 = arith.select %1076, %1078, %1074 : vector<8x16xi1>, vector<8x16xf32>
    %1080 = arith.mulf %1001, %1079 : vector<8x16xf32>
    %1081 = arith.select %1045, %1080, %994 : vector<8x16xi1>, vector<8x16xf32>
    %1082 = arith.ori %995, %1043 : vector<8x16xi1>
    %c12 = arith.constant 12 : index
    %c0_487 = arith.constant 0 : index
    %c0_488 = arith.constant 0 : index
    %c0_489 = arith.constant 0 : index
    %1083 = vector.load %arg3[%c12, %c0_487, %c0_488, %c0_489] : memref<24x3x8x16xf32, #tpu.memory_space<vmem>>, vector<1x1x8x16xf32>
    %1084 = vector.shape_cast %1083 : vector<1x1x8x16xf32> to vector<8x16xf32>
    %c12_490 = arith.constant 12 : index
    %c1_491 = arith.constant 1 : index
    %c0_492 = arith.constant 0 : index
    %c0_493 = arith.constant 0 : index
    %1085 = vector.load %arg3[%c12_490, %c1_491, %c0_492, %c0_493] : memref<24x3x8x16xf32, #tpu.memory_space<vmem>>, vector<1x1x8x16xf32>
    %1086 = vector.shape_cast %1085 : vector<1x1x8x16xf32> to vector<8x16xf32>
    %c12_494 = arith.constant 12 : index
    %c2_495 = arith.constant 2 : index
    %c0_496 = arith.constant 0 : index
    %c0_497 = arith.constant 0 : index
    %1087 = vector.load %arg3[%c12_494, %c2_495, %c0_496, %c0_497] : memref<24x3x8x16xf32, #tpu.memory_space<vmem>>, vector<1x1x8x16xf32>
    %1088 = vector.shape_cast %1087 : vector<1x1x8x16xf32> to vector<8x16xf32>
    %cst_498 = arith.constant 5.000000e-01 : f32
    %1089 = vector.broadcast %cst_498 : f32 to vector<8x16xf32>
    %1090 = arith.subf %1084, %1089 : vector<8x16xf32>
    %cst_499 = arith.constant 3.14159274 : f32
    %1091 = vector.broadcast %cst_499 : f32 to vector<8x16xf32>
    %1092 = arith.mulf %1091, %1090 : vector<8x16xf32>
    %1093 = arith.mulf %1092, %1092 : vector<8x16xf32>
    %cst_500 = arith.constant 2.75573188E-6 : f32
    %1094 = vector.broadcast %cst_500 : f32 to vector<8x16xf32>
    %1095 = arith.mulf %1093, %1094 : vector<8x16xf32>
    %cst_501 = arith.constant -1.98412701E-4 : f32
    %1096 = vector.broadcast %cst_501 : f32 to vector<8x16xf32>
    %1097 = arith.addf %1096, %1095 : vector<8x16xf32>
    %1098 = arith.mulf %1093, %1097 : vector<8x16xf32>
    %cst_502 = arith.constant 0.00833333377 : f32
    %1099 = vector.broadcast %cst_502 : f32 to vector<8x16xf32>
    %1100 = arith.addf %1099, %1098 : vector<8x16xf32>
    %1101 = arith.mulf %1093, %1100 : vector<8x16xf32>
    %cst_503 = arith.constant -0.166666672 : f32
    %1102 = vector.broadcast %cst_503 : f32 to vector<8x16xf32>
    %1103 = arith.addf %1102, %1101 : vector<8x16xf32>
    %1104 = arith.mulf %1093, %1103 : vector<8x16xf32>
    %cst_504 = arith.constant 1.000000e+00 : f32
    %1105 = vector.broadcast %cst_504 : f32 to vector<8x16xf32>
    %1106 = arith.addf %1105, %1104 : vector<8x16xf32>
    %1107 = arith.mulf %1092, %1106 : vector<8x16xf32>
    %cst_505 = arith.constant 0.000000e+00 : f32
    %1108 = vector.broadcast %cst_505 : f32 to vector<8x16xf32>
    %1109 = arith.subf %1108, %1107 : vector<8x16xf32>
    %cst_506 = arith.constant 1.00501251 : f32
    %1110 = vector.broadcast %cst_506 : f32 to vector<8x16xf32>
    %1111 = arith.mulf %1110, %1109 : vector<8x16xf32>
    %cst_507 = arith.constant 1.000000e+00 : f32
    %1112 = vector.broadcast %cst_507 : f32 to vector<8x16xf32>
    %1113 = arith.addf %1112, %1111 : vector<8x16xf32>
    %cst_508 = arith.constant 1.00501251 : f32
    %1114 = vector.broadcast %cst_508 : f32 to vector<8x16xf32>
    %1115 = arith.addf %1114, %1109 : vector<8x16xf32>
    %1116 = arith.divf %1113, %1115 : vector<8x16xf32>
    %cst_509 = arith.constant 1.00501251 : f32
    %1117 = vector.broadcast %cst_509 : f32 to vector<8x16xf32>
    %1118 = arith.subf %1117, %1116 : vector<8x16xf32>
    %cst_510 = arith.constant 1.000000e+02 : f32
    %1119 = vector.broadcast %cst_510 : f32 to vector<8x16xf32>
    %1120 = arith.mulf %1119, %1118 : vector<8x16xf32>
    %cst_511 = arith.constant 2.000000e+00 : f32
    %1121 = vector.broadcast %cst_511 : f32 to vector<8x16xf32>
    %1122 = arith.subf %1121, %1120 : vector<8x16xf32>
    %1123 = arith.mulf %1120, %1122 : vector<8x16xf32>
    %1124 = arith.cmpf ogt, %1123, %1086 : vector<8x16xf32>
    %cst_512 = arith.constant 1.000000e+00 : f32
    %1125 = vector.broadcast %cst_512 : f32 to vector<8x16xf32>
    %1126 = arith.subf %1125, %1120 : vector<8x16xf32>
    %1127 = math.exp %1126 : vector<8x16xf32>
    %1128 = arith.mulf %1120, %1127 : vector<8x16xf32>
    %1129 = arith.cmpf oge, %1128, %1086 : vector<8x16xf32>
    %1130 = arith.ori %1124, %1129 : vector<8x16xi1>
    %cst_513 = arith.constant dense<true> : vector<8x16xi1>
    %1131 = arith.xori %1082, %cst_513 : vector<8x16xi1>
    %1132 = arith.andi %1130, %1131 : vector<8x16xi1>
    %1133 = math.absf %1116 : vector<8x16xf32>
    %cst_514 = arith.constant -0.0012624911 : f32
    %1134 = vector.broadcast %cst_514 : f32 to vector<8x16xf32>
    %1135 = arith.mulf %1133, %1134 : vector<8x16xf32>
    %cst_515 = arith.constant 6.670090e-03 : f32
    %1136 = vector.broadcast %cst_515 : f32 to vector<8x16xf32>
    %1137 = arith.addf %1136, %1135 : vector<8x16xf32>
    %1138 = arith.mulf %1133, %1137 : vector<8x16xf32>
    %cst_516 = arith.constant -0.0170881264 : f32
    %1139 = vector.broadcast %cst_516 : f32 to vector<8x16xf32>
    %1140 = arith.addf %1139, %1138 : vector<8x16xf32>
    %1141 = arith.mulf %1133, %1140 : vector<8x16xf32>
    %cst_517 = arith.constant 0.0308918804 : f32
    %1142 = vector.broadcast %cst_517 : f32 to vector<8x16xf32>
    %1143 = arith.addf %1142, %1141 : vector<8x16xf32>
    %1144 = arith.mulf %1133, %1143 : vector<8x16xf32>
    %cst_518 = arith.constant -0.0501743034 : f32
    %1145 = vector.broadcast %cst_518 : f32 to vector<8x16xf32>
    %1146 = arith.addf %1145, %1144 : vector<8x16xf32>
    %1147 = arith.mulf %1133, %1146 : vector<8x16xf32>
    %cst_519 = arith.constant 0.0889789909 : f32
    %1148 = vector.broadcast %cst_519 : f32 to vector<8x16xf32>
    %1149 = arith.addf %1148, %1147 : vector<8x16xf32>
    %1150 = arith.mulf %1133, %1149 : vector<8x16xf32>
    %cst_520 = arith.constant -0.214598805 : f32
    %1151 = vector.broadcast %cst_520 : f32 to vector<8x16xf32>
    %1152 = arith.addf %1151, %1150 : vector<8x16xf32>
    %1153 = arith.mulf %1133, %1152 : vector<8x16xf32>
    %cst_521 = arith.constant 1.57079625 : f32
    %1154 = vector.broadcast %cst_521 : f32 to vector<8x16xf32>
    %1155 = arith.addf %1154, %1153 : vector<8x16xf32>
    %cst_522 = arith.constant 1.000000e+00 : f32
    %1156 = vector.broadcast %cst_522 : f32 to vector<8x16xf32>
    %1157 = arith.subf %1156, %1133 : vector<8x16xf32>
    %cst_523 = arith.constant 0.000000e+00 : f32
    %1158 = vector.broadcast %cst_523 : f32 to vector<8x16xf32>
    %1159 = arith.maximumf %1157, %1158 : vector<8x16xf32>
    %1160 = math.sqrt %1159 : vector<8x16xf32>
    %1161 = arith.mulf %1160, %1155 : vector<8x16xf32>
    %cst_524 = arith.constant 0.000000e+00 : f32
    %1162 = vector.broadcast %cst_524 : f32 to vector<8x16xf32>
    %1163 = arith.cmpf olt, %1116, %1162 : vector<8x16xf32>
    %cst_525 = arith.constant 3.14159274 : f32
    %1164 = vector.broadcast %cst_525 : f32 to vector<8x16xf32>
    %1165 = arith.subf %1164, %1161 : vector<8x16xf32>
    %1166 = arith.select %1163, %1165, %1161 : vector<8x16xi1>, vector<8x16xf32>
    %1167 = arith.mulf %1088, %1166 : vector<8x16xf32>
    %1168 = arith.select %1132, %1167, %1081 : vector<8x16xi1>, vector<8x16xf32>
    %1169 = arith.ori %1082, %1130 : vector<8x16xi1>
    %c13 = arith.constant 13 : index
    %c0_526 = arith.constant 0 : index
    %c0_527 = arith.constant 0 : index
    %c0_528 = arith.constant 0 : index
    %1170 = vector.load %arg3[%c13, %c0_526, %c0_527, %c0_528] : memref<24x3x8x16xf32, #tpu.memory_space<vmem>>, vector<1x1x8x16xf32>
    %1171 = vector.shape_cast %1170 : vector<1x1x8x16xf32> to vector<8x16xf32>
    %c13_529 = arith.constant 13 : index
    %c1_530 = arith.constant 1 : index
    %c0_531 = arith.constant 0 : index
    %c0_532 = arith.constant 0 : index
    %1172 = vector.load %arg3[%c13_529, %c1_530, %c0_531, %c0_532] : memref<24x3x8x16xf32, #tpu.memory_space<vmem>>, vector<1x1x8x16xf32>
    %1173 = vector.shape_cast %1172 : vector<1x1x8x16xf32> to vector<8x16xf32>
    %c13_533 = arith.constant 13 : index
    %c2_534 = arith.constant 2 : index
    %c0_535 = arith.constant 0 : index
    %c0_536 = arith.constant 0 : index
    %1174 = vector.load %arg3[%c13_533, %c2_534, %c0_535, %c0_536] : memref<24x3x8x16xf32, #tpu.memory_space<vmem>>, vector<1x1x8x16xf32>
    %1175 = vector.shape_cast %1174 : vector<1x1x8x16xf32> to vector<8x16xf32>
    %cst_537 = arith.constant 5.000000e-01 : f32
    %1176 = vector.broadcast %cst_537 : f32 to vector<8x16xf32>
    %1177 = arith.subf %1171, %1176 : vector<8x16xf32>
    %cst_538 = arith.constant 3.14159274 : f32
    %1178 = vector.broadcast %cst_538 : f32 to vector<8x16xf32>
    %1179 = arith.mulf %1178, %1177 : vector<8x16xf32>
    %1180 = arith.mulf %1179, %1179 : vector<8x16xf32>
    %cst_539 = arith.constant 2.75573188E-6 : f32
    %1181 = vector.broadcast %cst_539 : f32 to vector<8x16xf32>
    %1182 = arith.mulf %1180, %1181 : vector<8x16xf32>
    %cst_540 = arith.constant -1.98412701E-4 : f32
    %1183 = vector.broadcast %cst_540 : f32 to vector<8x16xf32>
    %1184 = arith.addf %1183, %1182 : vector<8x16xf32>
    %1185 = arith.mulf %1180, %1184 : vector<8x16xf32>
    %cst_541 = arith.constant 0.00833333377 : f32
    %1186 = vector.broadcast %cst_541 : f32 to vector<8x16xf32>
    %1187 = arith.addf %1186, %1185 : vector<8x16xf32>
    %1188 = arith.mulf %1180, %1187 : vector<8x16xf32>
    %cst_542 = arith.constant -0.166666672 : f32
    %1189 = vector.broadcast %cst_542 : f32 to vector<8x16xf32>
    %1190 = arith.addf %1189, %1188 : vector<8x16xf32>
    %1191 = arith.mulf %1180, %1190 : vector<8x16xf32>
    %cst_543 = arith.constant 1.000000e+00 : f32
    %1192 = vector.broadcast %cst_543 : f32 to vector<8x16xf32>
    %1193 = arith.addf %1192, %1191 : vector<8x16xf32>
    %1194 = arith.mulf %1179, %1193 : vector<8x16xf32>
    %cst_544 = arith.constant 0.000000e+00 : f32
    %1195 = vector.broadcast %cst_544 : f32 to vector<8x16xf32>
    %1196 = arith.subf %1195, %1194 : vector<8x16xf32>
    %cst_545 = arith.constant 1.00501251 : f32
    %1197 = vector.broadcast %cst_545 : f32 to vector<8x16xf32>
    %1198 = arith.mulf %1197, %1196 : vector<8x16xf32>
    %cst_546 = arith.constant 1.000000e+00 : f32
    %1199 = vector.broadcast %cst_546 : f32 to vector<8x16xf32>
    %1200 = arith.addf %1199, %1198 : vector<8x16xf32>
    %cst_547 = arith.constant 1.00501251 : f32
    %1201 = vector.broadcast %cst_547 : f32 to vector<8x16xf32>
    %1202 = arith.addf %1201, %1196 : vector<8x16xf32>
    %1203 = arith.divf %1200, %1202 : vector<8x16xf32>
    %cst_548 = arith.constant 1.00501251 : f32
    %1204 = vector.broadcast %cst_548 : f32 to vector<8x16xf32>
    %1205 = arith.subf %1204, %1203 : vector<8x16xf32>
    %cst_549 = arith.constant 1.000000e+02 : f32
    %1206 = vector.broadcast %cst_549 : f32 to vector<8x16xf32>
    %1207 = arith.mulf %1206, %1205 : vector<8x16xf32>
    %cst_550 = arith.constant 2.000000e+00 : f32
    %1208 = vector.broadcast %cst_550 : f32 to vector<8x16xf32>
    %1209 = arith.subf %1208, %1207 : vector<8x16xf32>
    %1210 = arith.mulf %1207, %1209 : vector<8x16xf32>
    %1211 = arith.cmpf ogt, %1210, %1173 : vector<8x16xf32>
    %cst_551 = arith.constant 1.000000e+00 : f32
    %1212 = vector.broadcast %cst_551 : f32 to vector<8x16xf32>
    %1213 = arith.subf %1212, %1207 : vector<8x16xf32>
    %1214 = math.exp %1213 : vector<8x16xf32>
    %1215 = arith.mulf %1207, %1214 : vector<8x16xf32>
    %1216 = arith.cmpf oge, %1215, %1173 : vector<8x16xf32>
    %1217 = arith.ori %1211, %1216 : vector<8x16xi1>
    %cst_552 = arith.constant dense<true> : vector<8x16xi1>
    %1218 = arith.xori %1169, %cst_552 : vector<8x16xi1>
    %1219 = arith.andi %1217, %1218 : vector<8x16xi1>
    %1220 = math.absf %1203 : vector<8x16xf32>
    %cst_553 = arith.constant -0.0012624911 : f32
    %1221 = vector.broadcast %cst_553 : f32 to vector<8x16xf32>
    %1222 = arith.mulf %1220, %1221 : vector<8x16xf32>
    %cst_554 = arith.constant 6.670090e-03 : f32
    %1223 = vector.broadcast %cst_554 : f32 to vector<8x16xf32>
    %1224 = arith.addf %1223, %1222 : vector<8x16xf32>
    %1225 = arith.mulf %1220, %1224 : vector<8x16xf32>
    %cst_555 = arith.constant -0.0170881264 : f32
    %1226 = vector.broadcast %cst_555 : f32 to vector<8x16xf32>
    %1227 = arith.addf %1226, %1225 : vector<8x16xf32>
    %1228 = arith.mulf %1220, %1227 : vector<8x16xf32>
    %cst_556 = arith.constant 0.0308918804 : f32
    %1229 = vector.broadcast %cst_556 : f32 to vector<8x16xf32>
    %1230 = arith.addf %1229, %1228 : vector<8x16xf32>
    %1231 = arith.mulf %1220, %1230 : vector<8x16xf32>
    %cst_557 = arith.constant -0.0501743034 : f32
    %1232 = vector.broadcast %cst_557 : f32 to vector<8x16xf32>
    %1233 = arith.addf %1232, %1231 : vector<8x16xf32>
    %1234 = arith.mulf %1220, %1233 : vector<8x16xf32>
    %cst_558 = arith.constant 0.0889789909 : f32
    %1235 = vector.broadcast %cst_558 : f32 to vector<8x16xf32>
    %1236 = arith.addf %1235, %1234 : vector<8x16xf32>
    %1237 = arith.mulf %1220, %1236 : vector<8x16xf32>
    %cst_559 = arith.constant -0.214598805 : f32
    %1238 = vector.broadcast %cst_559 : f32 to vector<8x16xf32>
    %1239 = arith.addf %1238, %1237 : vector<8x16xf32>
    %1240 = arith.mulf %1220, %1239 : vector<8x16xf32>
    %cst_560 = arith.constant 1.57079625 : f32
    %1241 = vector.broadcast %cst_560 : f32 to vector<8x16xf32>
    %1242 = arith.addf %1241, %1240 : vector<8x16xf32>
    %cst_561 = arith.constant 1.000000e+00 : f32
    %1243 = vector.broadcast %cst_561 : f32 to vector<8x16xf32>
    %1244 = arith.subf %1243, %1220 : vector<8x16xf32>
    %cst_562 = arith.constant 0.000000e+00 : f32
    %1245 = vector.broadcast %cst_562 : f32 to vector<8x16xf32>
    %1246 = arith.maximumf %1244, %1245 : vector<8x16xf32>
    %1247 = math.sqrt %1246 : vector<8x16xf32>
    %1248 = arith.mulf %1247, %1242 : vector<8x16xf32>
    %cst_563 = arith.constant 0.000000e+00 : f32
    %1249 = vector.broadcast %cst_563 : f32 to vector<8x16xf32>
    %1250 = arith.cmpf olt, %1203, %1249 : vector<8x16xf32>
    %cst_564 = arith.constant 3.14159274 : f32
    %1251 = vector.broadcast %cst_564 : f32 to vector<8x16xf32>
    %1252 = arith.subf %1251, %1248 : vector<8x16xf32>
    %1253 = arith.select %1250, %1252, %1248 : vector<8x16xi1>, vector<8x16xf32>
    %1254 = arith.mulf %1175, %1253 : vector<8x16xf32>
    %1255 = arith.select %1219, %1254, %1168 : vector<8x16xi1>, vector<8x16xf32>
    %1256 = arith.ori %1169, %1217 : vector<8x16xi1>
    %c14 = arith.constant 14 : index
    %c0_565 = arith.constant 0 : index
    %c0_566 = arith.constant 0 : index
    %c0_567 = arith.constant 0 : index
    %1257 = vector.load %arg3[%c14, %c0_565, %c0_566, %c0_567] : memref<24x3x8x16xf32, #tpu.memory_space<vmem>>, vector<1x1x8x16xf32>
    %1258 = vector.shape_cast %1257 : vector<1x1x8x16xf32> to vector<8x16xf32>
    %c14_568 = arith.constant 14 : index
    %c1_569 = arith.constant 1 : index
    %c0_570 = arith.constant 0 : index
    %c0_571 = arith.constant 0 : index
    %1259 = vector.load %arg3[%c14_568, %c1_569, %c0_570, %c0_571] : memref<24x3x8x16xf32, #tpu.memory_space<vmem>>, vector<1x1x8x16xf32>
    %1260 = vector.shape_cast %1259 : vector<1x1x8x16xf32> to vector<8x16xf32>
    %c14_572 = arith.constant 14 : index
    %c2_573 = arith.constant 2 : index
    %c0_574 = arith.constant 0 : index
    %c0_575 = arith.constant 0 : index
    %1261 = vector.load %arg3[%c14_572, %c2_573, %c0_574, %c0_575] : memref<24x3x8x16xf32, #tpu.memory_space<vmem>>, vector<1x1x8x16xf32>
    %1262 = vector.shape_cast %1261 : vector<1x1x8x16xf32> to vector<8x16xf32>
    %cst_576 = arith.constant 5.000000e-01 : f32
    %1263 = vector.broadcast %cst_576 : f32 to vector<8x16xf32>
    %1264 = arith.subf %1258, %1263 : vector<8x16xf32>
    %cst_577 = arith.constant 3.14159274 : f32
    %1265 = vector.broadcast %cst_577 : f32 to vector<8x16xf32>
    %1266 = arith.mulf %1265, %1264 : vector<8x16xf32>
    %1267 = arith.mulf %1266, %1266 : vector<8x16xf32>
    %cst_578 = arith.constant 2.75573188E-6 : f32
    %1268 = vector.broadcast %cst_578 : f32 to vector<8x16xf32>
    %1269 = arith.mulf %1267, %1268 : vector<8x16xf32>
    %cst_579 = arith.constant -1.98412701E-4 : f32
    %1270 = vector.broadcast %cst_579 : f32 to vector<8x16xf32>
    %1271 = arith.addf %1270, %1269 : vector<8x16xf32>
    %1272 = arith.mulf %1267, %1271 : vector<8x16xf32>
    %cst_580 = arith.constant 0.00833333377 : f32
    %1273 = vector.broadcast %cst_580 : f32 to vector<8x16xf32>
    %1274 = arith.addf %1273, %1272 : vector<8x16xf32>
    %1275 = arith.mulf %1267, %1274 : vector<8x16xf32>
    %cst_581 = arith.constant -0.166666672 : f32
    %1276 = vector.broadcast %cst_581 : f32 to vector<8x16xf32>
    %1277 = arith.addf %1276, %1275 : vector<8x16xf32>
    %1278 = arith.mulf %1267, %1277 : vector<8x16xf32>
    %cst_582 = arith.constant 1.000000e+00 : f32
    %1279 = vector.broadcast %cst_582 : f32 to vector<8x16xf32>
    %1280 = arith.addf %1279, %1278 : vector<8x16xf32>
    %1281 = arith.mulf %1266, %1280 : vector<8x16xf32>
    %cst_583 = arith.constant 0.000000e+00 : f32
    %1282 = vector.broadcast %cst_583 : f32 to vector<8x16xf32>
    %1283 = arith.subf %1282, %1281 : vector<8x16xf32>
    %cst_584 = arith.constant 1.00501251 : f32
    %1284 = vector.broadcast %cst_584 : f32 to vector<8x16xf32>
    %1285 = arith.mulf %1284, %1283 : vector<8x16xf32>
    %cst_585 = arith.constant 1.000000e+00 : f32
    %1286 = vector.broadcast %cst_585 : f32 to vector<8x16xf32>
    %1287 = arith.addf %1286, %1285 : vector<8x16xf32>
    %cst_586 = arith.constant 1.00501251 : f32
    %1288 = vector.broadcast %cst_586 : f32 to vector<8x16xf32>
    %1289 = arith.addf %1288, %1283 : vector<8x16xf32>
    %1290 = arith.divf %1287, %1289 : vector<8x16xf32>
    %cst_587 = arith.constant 1.00501251 : f32
    %1291 = vector.broadcast %cst_587 : f32 to vector<8x16xf32>
    %1292 = arith.subf %1291, %1290 : vector<8x16xf32>
    %cst_588 = arith.constant 1.000000e+02 : f32
    %1293 = vector.broadcast %cst_588 : f32 to vector<8x16xf32>
    %1294 = arith.mulf %1293, %1292 : vector<8x16xf32>
    %cst_589 = arith.constant 2.000000e+00 : f32
    %1295 = vector.broadcast %cst_589 : f32 to vector<8x16xf32>
    %1296 = arith.subf %1295, %1294 : vector<8x16xf32>
    %1297 = arith.mulf %1294, %1296 : vector<8x16xf32>
    %1298 = arith.cmpf ogt, %1297, %1260 : vector<8x16xf32>
    %cst_590 = arith.constant 1.000000e+00 : f32
    %1299 = vector.broadcast %cst_590 : f32 to vector<8x16xf32>
    %1300 = arith.subf %1299, %1294 : vector<8x16xf32>
    %1301 = math.exp %1300 : vector<8x16xf32>
    %1302 = arith.mulf %1294, %1301 : vector<8x16xf32>
    %1303 = arith.cmpf oge, %1302, %1260 : vector<8x16xf32>
    %1304 = arith.ori %1298, %1303 : vector<8x16xi1>
    %cst_591 = arith.constant dense<true> : vector<8x16xi1>
    %1305 = arith.xori %1256, %cst_591 : vector<8x16xi1>
    %1306 = arith.andi %1304, %1305 : vector<8x16xi1>
    %1307 = math.absf %1290 : vector<8x16xf32>
    %cst_592 = arith.constant -0.0012624911 : f32
    %1308 = vector.broadcast %cst_592 : f32 to vector<8x16xf32>
    %1309 = arith.mulf %1307, %1308 : vector<8x16xf32>
    %cst_593 = arith.constant 6.670090e-03 : f32
    %1310 = vector.broadcast %cst_593 : f32 to vector<8x16xf32>
    %1311 = arith.addf %1310, %1309 : vector<8x16xf32>
    %1312 = arith.mulf %1307, %1311 : vector<8x16xf32>
    %cst_594 = arith.constant -0.0170881264 : f32
    %1313 = vector.broadcast %cst_594 : f32 to vector<8x16xf32>
    %1314 = arith.addf %1313, %1312 : vector<8x16xf32>
    %1315 = arith.mulf %1307, %1314 : vector<8x16xf32>
    %cst_595 = arith.constant 0.0308918804 : f32
    %1316 = vector.broadcast %cst_595 : f32 to vector<8x16xf32>
    %1317 = arith.addf %1316, %1315 : vector<8x16xf32>
    %1318 = arith.mulf %1307, %1317 : vector<8x16xf32>
    %cst_596 = arith.constant -0.0501743034 : f32
    %1319 = vector.broadcast %cst_596 : f32 to vector<8x16xf32>
    %1320 = arith.addf %1319, %1318 : vector<8x16xf32>
    %1321 = arith.mulf %1307, %1320 : vector<8x16xf32>
    %cst_597 = arith.constant 0.0889789909 : f32
    %1322 = vector.broadcast %cst_597 : f32 to vector<8x16xf32>
    %1323 = arith.addf %1322, %1321 : vector<8x16xf32>
    %1324 = arith.mulf %1307, %1323 : vector<8x16xf32>
    %cst_598 = arith.constant -0.214598805 : f32
    %1325 = vector.broadcast %cst_598 : f32 to vector<8x16xf32>
    %1326 = arith.addf %1325, %1324 : vector<8x16xf32>
    %1327 = arith.mulf %1307, %1326 : vector<8x16xf32>
    %cst_599 = arith.constant 1.57079625 : f32
    %1328 = vector.broadcast %cst_599 : f32 to vector<8x16xf32>
    %1329 = arith.addf %1328, %1327 : vector<8x16xf32>
    %cst_600 = arith.constant 1.000000e+00 : f32
    %1330 = vector.broadcast %cst_600 : f32 to vector<8x16xf32>
    %1331 = arith.subf %1330, %1307 : vector<8x16xf32>
    %cst_601 = arith.constant 0.000000e+00 : f32
    %1332 = vector.broadcast %cst_601 : f32 to vector<8x16xf32>
    %1333 = arith.maximumf %1331, %1332 : vector<8x16xf32>
    %1334 = math.sqrt %1333 : vector<8x16xf32>
    %1335 = arith.mulf %1334, %1329 : vector<8x16xf32>
    %cst_602 = arith.constant 0.000000e+00 : f32
    %1336 = vector.broadcast %cst_602 : f32 to vector<8x16xf32>
    %1337 = arith.cmpf olt, %1290, %1336 : vector<8x16xf32>
    %cst_603 = arith.constant 3.14159274 : f32
    %1338 = vector.broadcast %cst_603 : f32 to vector<8x16xf32>
    %1339 = arith.subf %1338, %1335 : vector<8x16xf32>
    %1340 = arith.select %1337, %1339, %1335 : vector<8x16xi1>, vector<8x16xf32>
    %1341 = arith.mulf %1262, %1340 : vector<8x16xf32>
    %1342 = arith.select %1306, %1341, %1255 : vector<8x16xi1>, vector<8x16xf32>
    %1343 = arith.ori %1256, %1304 : vector<8x16xi1>
    %c15 = arith.constant 15 : index
    %c0_604 = arith.constant 0 : index
    %c0_605 = arith.constant 0 : index
    %c0_606 = arith.constant 0 : index
    %1344 = vector.load %arg3[%c15, %c0_604, %c0_605, %c0_606] : memref<24x3x8x16xf32, #tpu.memory_space<vmem>>, vector<1x1x8x16xf32>
    %1345 = vector.shape_cast %1344 : vector<1x1x8x16xf32> to vector<8x16xf32>
    %c15_607 = arith.constant 15 : index
    %c1_608 = arith.constant 1 : index
    %c0_609 = arith.constant 0 : index
    %c0_610 = arith.constant 0 : index
    %1346 = vector.load %arg3[%c15_607, %c1_608, %c0_609, %c0_610] : memref<24x3x8x16xf32, #tpu.memory_space<vmem>>, vector<1x1x8x16xf32>
    %1347 = vector.shape_cast %1346 : vector<1x1x8x16xf32> to vector<8x16xf32>
    %c15_611 = arith.constant 15 : index
    %c2_612 = arith.constant 2 : index
    %c0_613 = arith.constant 0 : index
    %c0_614 = arith.constant 0 : index
    %1348 = vector.load %arg3[%c15_611, %c2_612, %c0_613, %c0_614] : memref<24x3x8x16xf32, #tpu.memory_space<vmem>>, vector<1x1x8x16xf32>
    %1349 = vector.shape_cast %1348 : vector<1x1x8x16xf32> to vector<8x16xf32>
    %cst_615 = arith.constant 5.000000e-01 : f32
    %1350 = vector.broadcast %cst_615 : f32 to vector<8x16xf32>
    %1351 = arith.subf %1345, %1350 : vector<8x16xf32>
    %cst_616 = arith.constant 3.14159274 : f32
    %1352 = vector.broadcast %cst_616 : f32 to vector<8x16xf32>
    %1353 = arith.mulf %1352, %1351 : vector<8x16xf32>
    %1354 = arith.mulf %1353, %1353 : vector<8x16xf32>
    %cst_617 = arith.constant 2.75573188E-6 : f32
    %1355 = vector.broadcast %cst_617 : f32 to vector<8x16xf32>
    %1356 = arith.mulf %1354, %1355 : vector<8x16xf32>
    %cst_618 = arith.constant -1.98412701E-4 : f32
    %1357 = vector.broadcast %cst_618 : f32 to vector<8x16xf32>
    %1358 = arith.addf %1357, %1356 : vector<8x16xf32>
    %1359 = arith.mulf %1354, %1358 : vector<8x16xf32>
    %cst_619 = arith.constant 0.00833333377 : f32
    %1360 = vector.broadcast %cst_619 : f32 to vector<8x16xf32>
    %1361 = arith.addf %1360, %1359 : vector<8x16xf32>
    %1362 = arith.mulf %1354, %1361 : vector<8x16xf32>
    %cst_620 = arith.constant -0.166666672 : f32
    %1363 = vector.broadcast %cst_620 : f32 to vector<8x16xf32>
    %1364 = arith.addf %1363, %1362 : vector<8x16xf32>
    %1365 = arith.mulf %1354, %1364 : vector<8x16xf32>
    %cst_621 = arith.constant 1.000000e+00 : f32
    %1366 = vector.broadcast %cst_621 : f32 to vector<8x16xf32>
    %1367 = arith.addf %1366, %1365 : vector<8x16xf32>
    %1368 = arith.mulf %1353, %1367 : vector<8x16xf32>
    %cst_622 = arith.constant 0.000000e+00 : f32
    %1369 = vector.broadcast %cst_622 : f32 to vector<8x16xf32>
    %1370 = arith.subf %1369, %1368 : vector<8x16xf32>
    %cst_623 = arith.constant 1.00501251 : f32
    %1371 = vector.broadcast %cst_623 : f32 to vector<8x16xf32>
    %1372 = arith.mulf %1371, %1370 : vector<8x16xf32>
    %cst_624 = arith.constant 1.000000e+00 : f32
    %1373 = vector.broadcast %cst_624 : f32 to vector<8x16xf32>
    %1374 = arith.addf %1373, %1372 : vector<8x16xf32>
    %cst_625 = arith.constant 1.00501251 : f32
    %1375 = vector.broadcast %cst_625 : f32 to vector<8x16xf32>
    %1376 = arith.addf %1375, %1370 : vector<8x16xf32>
    %1377 = arith.divf %1374, %1376 : vector<8x16xf32>
    %cst_626 = arith.constant 1.00501251 : f32
    %1378 = vector.broadcast %cst_626 : f32 to vector<8x16xf32>
    %1379 = arith.subf %1378, %1377 : vector<8x16xf32>
    %cst_627 = arith.constant 1.000000e+02 : f32
    %1380 = vector.broadcast %cst_627 : f32 to vector<8x16xf32>
    %1381 = arith.mulf %1380, %1379 : vector<8x16xf32>
    %cst_628 = arith.constant 2.000000e+00 : f32
    %1382 = vector.broadcast %cst_628 : f32 to vector<8x16xf32>
    %1383 = arith.subf %1382, %1381 : vector<8x16xf32>
    %1384 = arith.mulf %1381, %1383 : vector<8x16xf32>
    %1385 = arith.cmpf ogt, %1384, %1347 : vector<8x16xf32>
    %cst_629 = arith.constant 1.000000e+00 : f32
    %1386 = vector.broadcast %cst_629 : f32 to vector<8x16xf32>
    %1387 = arith.subf %1386, %1381 : vector<8x16xf32>
    %1388 = math.exp %1387 : vector<8x16xf32>
    %1389 = arith.mulf %1381, %1388 : vector<8x16xf32>
    %1390 = arith.cmpf oge, %1389, %1347 : vector<8x16xf32>
    %1391 = arith.ori %1385, %1390 : vector<8x16xi1>
    %cst_630 = arith.constant dense<true> : vector<8x16xi1>
    %1392 = arith.xori %1343, %cst_630 : vector<8x16xi1>
    %1393 = arith.andi %1391, %1392 : vector<8x16xi1>
    %1394 = math.absf %1377 : vector<8x16xf32>
    %cst_631 = arith.constant -0.0012624911 : f32
    %1395 = vector.broadcast %cst_631 : f32 to vector<8x16xf32>
    %1396 = arith.mulf %1394, %1395 : vector<8x16xf32>
    %cst_632 = arith.constant 6.670090e-03 : f32
    %1397 = vector.broadcast %cst_632 : f32 to vector<8x16xf32>
    %1398 = arith.addf %1397, %1396 : vector<8x16xf32>
    %1399 = arith.mulf %1394, %1398 : vector<8x16xf32>
    %cst_633 = arith.constant -0.0170881264 : f32
    %1400 = vector.broadcast %cst_633 : f32 to vector<8x16xf32>
    %1401 = arith.addf %1400, %1399 : vector<8x16xf32>
    %1402 = arith.mulf %1394, %1401 : vector<8x16xf32>
    %cst_634 = arith.constant 0.0308918804 : f32
    %1403 = vector.broadcast %cst_634 : f32 to vector<8x16xf32>
    %1404 = arith.addf %1403, %1402 : vector<8x16xf32>
    %1405 = arith.mulf %1394, %1404 : vector<8x16xf32>
    %cst_635 = arith.constant -0.0501743034 : f32
    %1406 = vector.broadcast %cst_635 : f32 to vector<8x16xf32>
    %1407 = arith.addf %1406, %1405 : vector<8x16xf32>
    %1408 = arith.mulf %1394, %1407 : vector<8x16xf32>
    %cst_636 = arith.constant 0.0889789909 : f32
    %1409 = vector.broadcast %cst_636 : f32 to vector<8x16xf32>
    %1410 = arith.addf %1409, %1408 : vector<8x16xf32>
    %1411 = arith.mulf %1394, %1410 : vector<8x16xf32>
    %cst_637 = arith.constant -0.214598805 : f32
    %1412 = vector.broadcast %cst_637 : f32 to vector<8x16xf32>
    %1413 = arith.addf %1412, %1411 : vector<8x16xf32>
    %1414 = arith.mulf %1394, %1413 : vector<8x16xf32>
    %cst_638 = arith.constant 1.57079625 : f32
    %1415 = vector.broadcast %cst_638 : f32 to vector<8x16xf32>
    %1416 = arith.addf %1415, %1414 : vector<8x16xf32>
    %cst_639 = arith.constant 1.000000e+00 : f32
    %1417 = vector.broadcast %cst_639 : f32 to vector<8x16xf32>
    %1418 = arith.subf %1417, %1394 : vector<8x16xf32>
    %cst_640 = arith.constant 0.000000e+00 : f32
    %1419 = vector.broadcast %cst_640 : f32 to vector<8x16xf32>
    %1420 = arith.maximumf %1418, %1419 : vector<8x16xf32>
    %1421 = math.sqrt %1420 : vector<8x16xf32>
    %1422 = arith.mulf %1421, %1416 : vector<8x16xf32>
    %cst_641 = arith.constant 0.000000e+00 : f32
    %1423 = vector.broadcast %cst_641 : f32 to vector<8x16xf32>
    %1424 = arith.cmpf olt, %1377, %1423 : vector<8x16xf32>
    %cst_642 = arith.constant 3.14159274 : f32
    %1425 = vector.broadcast %cst_642 : f32 to vector<8x16xf32>
    %1426 = arith.subf %1425, %1422 : vector<8x16xf32>
    %1427 = arith.select %1424, %1426, %1422 : vector<8x16xi1>, vector<8x16xf32>
    %1428 = arith.mulf %1349, %1427 : vector<8x16xf32>
    %1429 = arith.select %1393, %1428, %1342 : vector<8x16xi1>, vector<8x16xf32>
    %1430 = arith.ori %1343, %1391 : vector<8x16xi1>
    %c16 = arith.constant 16 : index
    %c0_643 = arith.constant 0 : index
    %c0_644 = arith.constant 0 : index
    %c0_645 = arith.constant 0 : index
    %1431 = vector.load %arg3[%c16, %c0_643, %c0_644, %c0_645] : memref<24x3x8x16xf32, #tpu.memory_space<vmem>>, vector<1x1x8x16xf32>
    %1432 = vector.shape_cast %1431 : vector<1x1x8x16xf32> to vector<8x16xf32>
    %c16_646 = arith.constant 16 : index
    %c1_647 = arith.constant 1 : index
    %c0_648 = arith.constant 0 : index
    %c0_649 = arith.constant 0 : index
    %1433 = vector.load %arg3[%c16_646, %c1_647, %c0_648, %c0_649] : memref<24x3x8x16xf32, #tpu.memory_space<vmem>>, vector<1x1x8x16xf32>
    %1434 = vector.shape_cast %1433 : vector<1x1x8x16xf32> to vector<8x16xf32>
    %c16_650 = arith.constant 16 : index
    %c2_651 = arith.constant 2 : index
    %c0_652 = arith.constant 0 : index
    %c0_653 = arith.constant 0 : index
    %1435 = vector.load %arg3[%c16_650, %c2_651, %c0_652, %c0_653] : memref<24x3x8x16xf32, #tpu.memory_space<vmem>>, vector<1x1x8x16xf32>
    %1436 = vector.shape_cast %1435 : vector<1x1x8x16xf32> to vector<8x16xf32>
    %cst_654 = arith.constant 5.000000e-01 : f32
    %1437 = vector.broadcast %cst_654 : f32 to vector<8x16xf32>
    %1438 = arith.subf %1432, %1437 : vector<8x16xf32>
    %cst_655 = arith.constant 3.14159274 : f32
    %1439 = vector.broadcast %cst_655 : f32 to vector<8x16xf32>
    %1440 = arith.mulf %1439, %1438 : vector<8x16xf32>
    %1441 = arith.mulf %1440, %1440 : vector<8x16xf32>
    %cst_656 = arith.constant 2.75573188E-6 : f32
    %1442 = vector.broadcast %cst_656 : f32 to vector<8x16xf32>
    %1443 = arith.mulf %1441, %1442 : vector<8x16xf32>
    %cst_657 = arith.constant -1.98412701E-4 : f32
    %1444 = vector.broadcast %cst_657 : f32 to vector<8x16xf32>
    %1445 = arith.addf %1444, %1443 : vector<8x16xf32>
    %1446 = arith.mulf %1441, %1445 : vector<8x16xf32>
    %cst_658 = arith.constant 0.00833333377 : f32
    %1447 = vector.broadcast %cst_658 : f32 to vector<8x16xf32>
    %1448 = arith.addf %1447, %1446 : vector<8x16xf32>
    %1449 = arith.mulf %1441, %1448 : vector<8x16xf32>
    %cst_659 = arith.constant -0.166666672 : f32
    %1450 = vector.broadcast %cst_659 : f32 to vector<8x16xf32>
    %1451 = arith.addf %1450, %1449 : vector<8x16xf32>
    %1452 = arith.mulf %1441, %1451 : vector<8x16xf32>
    %cst_660 = arith.constant 1.000000e+00 : f32
    %1453 = vector.broadcast %cst_660 : f32 to vector<8x16xf32>
    %1454 = arith.addf %1453, %1452 : vector<8x16xf32>
    %1455 = arith.mulf %1440, %1454 : vector<8x16xf32>
    %cst_661 = arith.constant 0.000000e+00 : f32
    %1456 = vector.broadcast %cst_661 : f32 to vector<8x16xf32>
    %1457 = arith.subf %1456, %1455 : vector<8x16xf32>
    %cst_662 = arith.constant 1.00501251 : f32
    %1458 = vector.broadcast %cst_662 : f32 to vector<8x16xf32>
    %1459 = arith.mulf %1458, %1457 : vector<8x16xf32>
    %cst_663 = arith.constant 1.000000e+00 : f32
    %1460 = vector.broadcast %cst_663 : f32 to vector<8x16xf32>
    %1461 = arith.addf %1460, %1459 : vector<8x16xf32>
    %cst_664 = arith.constant 1.00501251 : f32
    %1462 = vector.broadcast %cst_664 : f32 to vector<8x16xf32>
    %1463 = arith.addf %1462, %1457 : vector<8x16xf32>
    %1464 = arith.divf %1461, %1463 : vector<8x16xf32>
    %cst_665 = arith.constant 1.00501251 : f32
    %1465 = vector.broadcast %cst_665 : f32 to vector<8x16xf32>
    %1466 = arith.subf %1465, %1464 : vector<8x16xf32>
    %cst_666 = arith.constant 1.000000e+02 : f32
    %1467 = vector.broadcast %cst_666 : f32 to vector<8x16xf32>
    %1468 = arith.mulf %1467, %1466 : vector<8x16xf32>
    %cst_667 = arith.constant 2.000000e+00 : f32
    %1469 = vector.broadcast %cst_667 : f32 to vector<8x16xf32>
    %1470 = arith.subf %1469, %1468 : vector<8x16xf32>
    %1471 = arith.mulf %1468, %1470 : vector<8x16xf32>
    %1472 = arith.cmpf ogt, %1471, %1434 : vector<8x16xf32>
    %cst_668 = arith.constant 1.000000e+00 : f32
    %1473 = vector.broadcast %cst_668 : f32 to vector<8x16xf32>
    %1474 = arith.subf %1473, %1468 : vector<8x16xf32>
    %1475 = math.exp %1474 : vector<8x16xf32>
    %1476 = arith.mulf %1468, %1475 : vector<8x16xf32>
    %1477 = arith.cmpf oge, %1476, %1434 : vector<8x16xf32>
    %1478 = arith.ori %1472, %1477 : vector<8x16xi1>
    %cst_669 = arith.constant dense<true> : vector<8x16xi1>
    %1479 = arith.xori %1430, %cst_669 : vector<8x16xi1>
    %1480 = arith.andi %1478, %1479 : vector<8x16xi1>
    %1481 = math.absf %1464 : vector<8x16xf32>
    %cst_670 = arith.constant -0.0012624911 : f32
    %1482 = vector.broadcast %cst_670 : f32 to vector<8x16xf32>
    %1483 = arith.mulf %1481, %1482 : vector<8x16xf32>
    %cst_671 = arith.constant 6.670090e-03 : f32
    %1484 = vector.broadcast %cst_671 : f32 to vector<8x16xf32>
    %1485 = arith.addf %1484, %1483 : vector<8x16xf32>
    %1486 = arith.mulf %1481, %1485 : vector<8x16xf32>
    %cst_672 = arith.constant -0.0170881264 : f32
    %1487 = vector.broadcast %cst_672 : f32 to vector<8x16xf32>
    %1488 = arith.addf %1487, %1486 : vector<8x16xf32>
    %1489 = arith.mulf %1481, %1488 : vector<8x16xf32>
    %cst_673 = arith.constant 0.0308918804 : f32
    %1490 = vector.broadcast %cst_673 : f32 to vector<8x16xf32>
    %1491 = arith.addf %1490, %1489 : vector<8x16xf32>
    %1492 = arith.mulf %1481, %1491 : vector<8x16xf32>
    %cst_674 = arith.constant -0.0501743034 : f32
    %1493 = vector.broadcast %cst_674 : f32 to vector<8x16xf32>
    %1494 = arith.addf %1493, %1492 : vector<8x16xf32>
    %1495 = arith.mulf %1481, %1494 : vector<8x16xf32>
    %cst_675 = arith.constant 0.0889789909 : f32
    %1496 = vector.broadcast %cst_675 : f32 to vector<8x16xf32>
    %1497 = arith.addf %1496, %1495 : vector<8x16xf32>
    %1498 = arith.mulf %1481, %1497 : vector<8x16xf32>
    %cst_676 = arith.constant -0.214598805 : f32
    %1499 = vector.broadcast %cst_676 : f32 to vector<8x16xf32>
    %1500 = arith.addf %1499, %1498 : vector<8x16xf32>
    %1501 = arith.mulf %1481, %1500 : vector<8x16xf32>
    %cst_677 = arith.constant 1.57079625 : f32
    %1502 = vector.broadcast %cst_677 : f32 to vector<8x16xf32>
    %1503 = arith.addf %1502, %1501 : vector<8x16xf32>
    %cst_678 = arith.constant 1.000000e+00 : f32
    %1504 = vector.broadcast %cst_678 : f32 to vector<8x16xf32>
    %1505 = arith.subf %1504, %1481 : vector<8x16xf32>
    %cst_679 = arith.constant 0.000000e+00 : f32
    %1506 = vector.broadcast %cst_679 : f32 to vector<8x16xf32>
    %1507 = arith.maximumf %1505, %1506 : vector<8x16xf32>
    %1508 = math.sqrt %1507 : vector<8x16xf32>
    %1509 = arith.mulf %1508, %1503 : vector<8x16xf32>
    %cst_680 = arith.constant 0.000000e+00 : f32
    %1510 = vector.broadcast %cst_680 : f32 to vector<8x16xf32>
    %1511 = arith.cmpf olt, %1464, %1510 : vector<8x16xf32>
    %cst_681 = arith.constant 3.14159274 : f32
    %1512 = vector.broadcast %cst_681 : f32 to vector<8x16xf32>
    %1513 = arith.subf %1512, %1509 : vector<8x16xf32>
    %1514 = arith.select %1511, %1513, %1509 : vector<8x16xi1>, vector<8x16xf32>
    %1515 = arith.mulf %1436, %1514 : vector<8x16xf32>
    %1516 = arith.select %1480, %1515, %1429 : vector<8x16xi1>, vector<8x16xf32>
    %1517 = arith.ori %1430, %1478 : vector<8x16xi1>
    %c17 = arith.constant 17 : index
    %c0_682 = arith.constant 0 : index
    %c0_683 = arith.constant 0 : index
    %c0_684 = arith.constant 0 : index
    %1518 = vector.load %arg3[%c17, %c0_682, %c0_683, %c0_684] : memref<24x3x8x16xf32, #tpu.memory_space<vmem>>, vector<1x1x8x16xf32>
    %1519 = vector.shape_cast %1518 : vector<1x1x8x16xf32> to vector<8x16xf32>
    %c17_685 = arith.constant 17 : index
    %c1_686 = arith.constant 1 : index
    %c0_687 = arith.constant 0 : index
    %c0_688 = arith.constant 0 : index
    %1520 = vector.load %arg3[%c17_685, %c1_686, %c0_687, %c0_688] : memref<24x3x8x16xf32, #tpu.memory_space<vmem>>, vector<1x1x8x16xf32>
    %1521 = vector.shape_cast %1520 : vector<1x1x8x16xf32> to vector<8x16xf32>
    %c17_689 = arith.constant 17 : index
    %c2_690 = arith.constant 2 : index
    %c0_691 = arith.constant 0 : index
    %c0_692 = arith.constant 0 : index
    %1522 = vector.load %arg3[%c17_689, %c2_690, %c0_691, %c0_692] : memref<24x3x8x16xf32, #tpu.memory_space<vmem>>, vector<1x1x8x16xf32>
    %1523 = vector.shape_cast %1522 : vector<1x1x8x16xf32> to vector<8x16xf32>
    %cst_693 = arith.constant 5.000000e-01 : f32
    %1524 = vector.broadcast %cst_693 : f32 to vector<8x16xf32>
    %1525 = arith.subf %1519, %1524 : vector<8x16xf32>
    %cst_694 = arith.constant 3.14159274 : f32
    %1526 = vector.broadcast %cst_694 : f32 to vector<8x16xf32>
    %1527 = arith.mulf %1526, %1525 : vector<8x16xf32>
    %1528 = arith.mulf %1527, %1527 : vector<8x16xf32>
    %cst_695 = arith.constant 2.75573188E-6 : f32
    %1529 = vector.broadcast %cst_695 : f32 to vector<8x16xf32>
    %1530 = arith.mulf %1528, %1529 : vector<8x16xf32>
    %cst_696 = arith.constant -1.98412701E-4 : f32
    %1531 = vector.broadcast %cst_696 : f32 to vector<8x16xf32>
    %1532 = arith.addf %1531, %1530 : vector<8x16xf32>
    %1533 = arith.mulf %1528, %1532 : vector<8x16xf32>
    %cst_697 = arith.constant 0.00833333377 : f32
    %1534 = vector.broadcast %cst_697 : f32 to vector<8x16xf32>
    %1535 = arith.addf %1534, %1533 : vector<8x16xf32>
    %1536 = arith.mulf %1528, %1535 : vector<8x16xf32>
    %cst_698 = arith.constant -0.166666672 : f32
    %1537 = vector.broadcast %cst_698 : f32 to vector<8x16xf32>
    %1538 = arith.addf %1537, %1536 : vector<8x16xf32>
    %1539 = arith.mulf %1528, %1538 : vector<8x16xf32>
    %cst_699 = arith.constant 1.000000e+00 : f32
    %1540 = vector.broadcast %cst_699 : f32 to vector<8x16xf32>
    %1541 = arith.addf %1540, %1539 : vector<8x16xf32>
    %1542 = arith.mulf %1527, %1541 : vector<8x16xf32>
    %cst_700 = arith.constant 0.000000e+00 : f32
    %1543 = vector.broadcast %cst_700 : f32 to vector<8x16xf32>
    %1544 = arith.subf %1543, %1542 : vector<8x16xf32>
    %cst_701 = arith.constant 1.00501251 : f32
    %1545 = vector.broadcast %cst_701 : f32 to vector<8x16xf32>
    %1546 = arith.mulf %1545, %1544 : vector<8x16xf32>
    %cst_702 = arith.constant 1.000000e+00 : f32
    %1547 = vector.broadcast %cst_702 : f32 to vector<8x16xf32>
    %1548 = arith.addf %1547, %1546 : vector<8x16xf32>
    %cst_703 = arith.constant 1.00501251 : f32
    %1549 = vector.broadcast %cst_703 : f32 to vector<8x16xf32>
    %1550 = arith.addf %1549, %1544 : vector<8x16xf32>
    %1551 = arith.divf %1548, %1550 : vector<8x16xf32>
    %cst_704 = arith.constant 1.00501251 : f32
    %1552 = vector.broadcast %cst_704 : f32 to vector<8x16xf32>
    %1553 = arith.subf %1552, %1551 : vector<8x16xf32>
    %cst_705 = arith.constant 1.000000e+02 : f32
    %1554 = vector.broadcast %cst_705 : f32 to vector<8x16xf32>
    %1555 = arith.mulf %1554, %1553 : vector<8x16xf32>
    %cst_706 = arith.constant 2.000000e+00 : f32
    %1556 = vector.broadcast %cst_706 : f32 to vector<8x16xf32>
    %1557 = arith.subf %1556, %1555 : vector<8x16xf32>
    %1558 = arith.mulf %1555, %1557 : vector<8x16xf32>
    %1559 = arith.cmpf ogt, %1558, %1521 : vector<8x16xf32>
    %cst_707 = arith.constant 1.000000e+00 : f32
    %1560 = vector.broadcast %cst_707 : f32 to vector<8x16xf32>
    %1561 = arith.subf %1560, %1555 : vector<8x16xf32>
    %1562 = math.exp %1561 : vector<8x16xf32>
    %1563 = arith.mulf %1555, %1562 : vector<8x16xf32>
    %1564 = arith.cmpf oge, %1563, %1521 : vector<8x16xf32>
    %1565 = arith.ori %1559, %1564 : vector<8x16xi1>
    %cst_708 = arith.constant dense<true> : vector<8x16xi1>
    %1566 = arith.xori %1517, %cst_708 : vector<8x16xi1>
    %1567 = arith.andi %1565, %1566 : vector<8x16xi1>
    %1568 = math.absf %1551 : vector<8x16xf32>
    %cst_709 = arith.constant -0.0012624911 : f32
    %1569 = vector.broadcast %cst_709 : f32 to vector<8x16xf32>
    %1570 = arith.mulf %1568, %1569 : vector<8x16xf32>
    %cst_710 = arith.constant 6.670090e-03 : f32
    %1571 = vector.broadcast %cst_710 : f32 to vector<8x16xf32>
    %1572 = arith.addf %1571, %1570 : vector<8x16xf32>
    %1573 = arith.mulf %1568, %1572 : vector<8x16xf32>
    %cst_711 = arith.constant -0.0170881264 : f32
    %1574 = vector.broadcast %cst_711 : f32 to vector<8x16xf32>
    %1575 = arith.addf %1574, %1573 : vector<8x16xf32>
    %1576 = arith.mulf %1568, %1575 : vector<8x16xf32>
    %cst_712 = arith.constant 0.0308918804 : f32
    %1577 = vector.broadcast %cst_712 : f32 to vector<8x16xf32>
    %1578 = arith.addf %1577, %1576 : vector<8x16xf32>
    %1579 = arith.mulf %1568, %1578 : vector<8x16xf32>
    %cst_713 = arith.constant -0.0501743034 : f32
    %1580 = vector.broadcast %cst_713 : f32 to vector<8x16xf32>
    %1581 = arith.addf %1580, %1579 : vector<8x16xf32>
    %1582 = arith.mulf %1568, %1581 : vector<8x16xf32>
    %cst_714 = arith.constant 0.0889789909 : f32
    %1583 = vector.broadcast %cst_714 : f32 to vector<8x16xf32>
    %1584 = arith.addf %1583, %1582 : vector<8x16xf32>
    %1585 = arith.mulf %1568, %1584 : vector<8x16xf32>
    %cst_715 = arith.constant -0.214598805 : f32
    %1586 = vector.broadcast %cst_715 : f32 to vector<8x16xf32>
    %1587 = arith.addf %1586, %1585 : vector<8x16xf32>
    %1588 = arith.mulf %1568, %1587 : vector<8x16xf32>
    %cst_716 = arith.constant 1.57079625 : f32
    %1589 = vector.broadcast %cst_716 : f32 to vector<8x16xf32>
    %1590 = arith.addf %1589, %1588 : vector<8x16xf32>
    %cst_717 = arith.constant 1.000000e+00 : f32
    %1591 = vector.broadcast %cst_717 : f32 to vector<8x16xf32>
    %1592 = arith.subf %1591, %1568 : vector<8x16xf32>
    %cst_718 = arith.constant 0.000000e+00 : f32
    %1593 = vector.broadcast %cst_718 : f32 to vector<8x16xf32>
    %1594 = arith.maximumf %1592, %1593 : vector<8x16xf32>
    %1595 = math.sqrt %1594 : vector<8x16xf32>
    %1596 = arith.mulf %1595, %1590 : vector<8x16xf32>
    %cst_719 = arith.constant 0.000000e+00 : f32
    %1597 = vector.broadcast %cst_719 : f32 to vector<8x16xf32>
    %1598 = arith.cmpf olt, %1551, %1597 : vector<8x16xf32>
    %cst_720 = arith.constant 3.14159274 : f32
    %1599 = vector.broadcast %cst_720 : f32 to vector<8x16xf32>
    %1600 = arith.subf %1599, %1596 : vector<8x16xf32>
    %1601 = arith.select %1598, %1600, %1596 : vector<8x16xi1>, vector<8x16xf32>
    %1602 = arith.mulf %1523, %1601 : vector<8x16xf32>
    %1603 = arith.select %1567, %1602, %1516 : vector<8x16xi1>, vector<8x16xf32>
    %1604 = arith.ori %1517, %1565 : vector<8x16xi1>
    %c18 = arith.constant 18 : index
    %c0_721 = arith.constant 0 : index
    %c0_722 = arith.constant 0 : index
    %c0_723 = arith.constant 0 : index
    %1605 = vector.load %arg3[%c18, %c0_721, %c0_722, %c0_723] : memref<24x3x8x16xf32, #tpu.memory_space<vmem>>, vector<1x1x8x16xf32>
    %1606 = vector.shape_cast %1605 : vector<1x1x8x16xf32> to vector<8x16xf32>
    %c18_724 = arith.constant 18 : index
    %c1_725 = arith.constant 1 : index
    %c0_726 = arith.constant 0 : index
    %c0_727 = arith.constant 0 : index
    %1607 = vector.load %arg3[%c18_724, %c1_725, %c0_726, %c0_727] : memref<24x3x8x16xf32, #tpu.memory_space<vmem>>, vector<1x1x8x16xf32>
    %1608 = vector.shape_cast %1607 : vector<1x1x8x16xf32> to vector<8x16xf32>
    %c18_728 = arith.constant 18 : index
    %c2_729 = arith.constant 2 : index
    %c0_730 = arith.constant 0 : index
    %c0_731 = arith.constant 0 : index
    %1609 = vector.load %arg3[%c18_728, %c2_729, %c0_730, %c0_731] : memref<24x3x8x16xf32, #tpu.memory_space<vmem>>, vector<1x1x8x16xf32>
    %1610 = vector.shape_cast %1609 : vector<1x1x8x16xf32> to vector<8x16xf32>
    %cst_732 = arith.constant 5.000000e-01 : f32
    %1611 = vector.broadcast %cst_732 : f32 to vector<8x16xf32>
    %1612 = arith.subf %1606, %1611 : vector<8x16xf32>
    %cst_733 = arith.constant 3.14159274 : f32
    %1613 = vector.broadcast %cst_733 : f32 to vector<8x16xf32>
    %1614 = arith.mulf %1613, %1612 : vector<8x16xf32>
    %1615 = arith.mulf %1614, %1614 : vector<8x16xf32>
    %cst_734 = arith.constant 2.75573188E-6 : f32
    %1616 = vector.broadcast %cst_734 : f32 to vector<8x16xf32>
    %1617 = arith.mulf %1615, %1616 : vector<8x16xf32>
    %cst_735 = arith.constant -1.98412701E-4 : f32
    %1618 = vector.broadcast %cst_735 : f32 to vector<8x16xf32>
    %1619 = arith.addf %1618, %1617 : vector<8x16xf32>
    %1620 = arith.mulf %1615, %1619 : vector<8x16xf32>
    %cst_736 = arith.constant 0.00833333377 : f32
    %1621 = vector.broadcast %cst_736 : f32 to vector<8x16xf32>
    %1622 = arith.addf %1621, %1620 : vector<8x16xf32>
    %1623 = arith.mulf %1615, %1622 : vector<8x16xf32>
    %cst_737 = arith.constant -0.166666672 : f32
    %1624 = vector.broadcast %cst_737 : f32 to vector<8x16xf32>
    %1625 = arith.addf %1624, %1623 : vector<8x16xf32>
    %1626 = arith.mulf %1615, %1625 : vector<8x16xf32>
    %cst_738 = arith.constant 1.000000e+00 : f32
    %1627 = vector.broadcast %cst_738 : f32 to vector<8x16xf32>
    %1628 = arith.addf %1627, %1626 : vector<8x16xf32>
    %1629 = arith.mulf %1614, %1628 : vector<8x16xf32>
    %cst_739 = arith.constant 0.000000e+00 : f32
    %1630 = vector.broadcast %cst_739 : f32 to vector<8x16xf32>
    %1631 = arith.subf %1630, %1629 : vector<8x16xf32>
    %cst_740 = arith.constant 1.00501251 : f32
    %1632 = vector.broadcast %cst_740 : f32 to vector<8x16xf32>
    %1633 = arith.mulf %1632, %1631 : vector<8x16xf32>
    %cst_741 = arith.constant 1.000000e+00 : f32
    %1634 = vector.broadcast %cst_741 : f32 to vector<8x16xf32>
    %1635 = arith.addf %1634, %1633 : vector<8x16xf32>
    %cst_742 = arith.constant 1.00501251 : f32
    %1636 = vector.broadcast %cst_742 : f32 to vector<8x16xf32>
    %1637 = arith.addf %1636, %1631 : vector<8x16xf32>
    %1638 = arith.divf %1635, %1637 : vector<8x16xf32>
    %cst_743 = arith.constant 1.00501251 : f32
    %1639 = vector.broadcast %cst_743 : f32 to vector<8x16xf32>
    %1640 = arith.subf %1639, %1638 : vector<8x16xf32>
    %cst_744 = arith.constant 1.000000e+02 : f32
    %1641 = vector.broadcast %cst_744 : f32 to vector<8x16xf32>
    %1642 = arith.mulf %1641, %1640 : vector<8x16xf32>
    %cst_745 = arith.constant 2.000000e+00 : f32
    %1643 = vector.broadcast %cst_745 : f32 to vector<8x16xf32>
    %1644 = arith.subf %1643, %1642 : vector<8x16xf32>
    %1645 = arith.mulf %1642, %1644 : vector<8x16xf32>
    %1646 = arith.cmpf ogt, %1645, %1608 : vector<8x16xf32>
    %cst_746 = arith.constant 1.000000e+00 : f32
    %1647 = vector.broadcast %cst_746 : f32 to vector<8x16xf32>
    %1648 = arith.subf %1647, %1642 : vector<8x16xf32>
    %1649 = math.exp %1648 : vector<8x16xf32>
    %1650 = arith.mulf %1642, %1649 : vector<8x16xf32>
    %1651 = arith.cmpf oge, %1650, %1608 : vector<8x16xf32>
    %1652 = arith.ori %1646, %1651 : vector<8x16xi1>
    %cst_747 = arith.constant dense<true> : vector<8x16xi1>
    %1653 = arith.xori %1604, %cst_747 : vector<8x16xi1>
    %1654 = arith.andi %1652, %1653 : vector<8x16xi1>
    %1655 = math.absf %1638 : vector<8x16xf32>
    %cst_748 = arith.constant -0.0012624911 : f32
    %1656 = vector.broadcast %cst_748 : f32 to vector<8x16xf32>
    %1657 = arith.mulf %1655, %1656 : vector<8x16xf32>
    %cst_749 = arith.constant 6.670090e-03 : f32
    %1658 = vector.broadcast %cst_749 : f32 to vector<8x16xf32>
    %1659 = arith.addf %1658, %1657 : vector<8x16xf32>
    %1660 = arith.mulf %1655, %1659 : vector<8x16xf32>
    %cst_750 = arith.constant -0.0170881264 : f32
    %1661 = vector.broadcast %cst_750 : f32 to vector<8x16xf32>
    %1662 = arith.addf %1661, %1660 : vector<8x16xf32>
    %1663 = arith.mulf %1655, %1662 : vector<8x16xf32>
    %cst_751 = arith.constant 0.0308918804 : f32
    %1664 = vector.broadcast %cst_751 : f32 to vector<8x16xf32>
    %1665 = arith.addf %1664, %1663 : vector<8x16xf32>
    %1666 = arith.mulf %1655, %1665 : vector<8x16xf32>
    %cst_752 = arith.constant -0.0501743034 : f32
    %1667 = vector.broadcast %cst_752 : f32 to vector<8x16xf32>
    %1668 = arith.addf %1667, %1666 : vector<8x16xf32>
    %1669 = arith.mulf %1655, %1668 : vector<8x16xf32>
    %cst_753 = arith.constant 0.0889789909 : f32
    %1670 = vector.broadcast %cst_753 : f32 to vector<8x16xf32>
    %1671 = arith.addf %1670, %1669 : vector<8x16xf32>
    %1672 = arith.mulf %1655, %1671 : vector<8x16xf32>
    %cst_754 = arith.constant -0.214598805 : f32
    %1673 = vector.broadcast %cst_754 : f32 to vector<8x16xf32>
    %1674 = arith.addf %1673, %1672 : vector<8x16xf32>
    %1675 = arith.mulf %1655, %1674 : vector<8x16xf32>
    %cst_755 = arith.constant 1.57079625 : f32
    %1676 = vector.broadcast %cst_755 : f32 to vector<8x16xf32>
    %1677 = arith.addf %1676, %1675 : vector<8x16xf32>
    %cst_756 = arith.constant 1.000000e+00 : f32
    %1678 = vector.broadcast %cst_756 : f32 to vector<8x16xf32>
    %1679 = arith.subf %1678, %1655 : vector<8x16xf32>
    %cst_757 = arith.constant 0.000000e+00 : f32
    %1680 = vector.broadcast %cst_757 : f32 to vector<8x16xf32>
    %1681 = arith.maximumf %1679, %1680 : vector<8x16xf32>
    %1682 = math.sqrt %1681 : vector<8x16xf32>
    %1683 = arith.mulf %1682, %1677 : vector<8x16xf32>
    %cst_758 = arith.constant 0.000000e+00 : f32
    %1684 = vector.broadcast %cst_758 : f32 to vector<8x16xf32>
    %1685 = arith.cmpf olt, %1638, %1684 : vector<8x16xf32>
    %cst_759 = arith.constant 3.14159274 : f32
    %1686 = vector.broadcast %cst_759 : f32 to vector<8x16xf32>
    %1687 = arith.subf %1686, %1683 : vector<8x16xf32>
    %1688 = arith.select %1685, %1687, %1683 : vector<8x16xi1>, vector<8x16xf32>
    %1689 = arith.mulf %1610, %1688 : vector<8x16xf32>
    %1690 = arith.select %1654, %1689, %1603 : vector<8x16xi1>, vector<8x16xf32>
    %1691 = arith.ori %1604, %1652 : vector<8x16xi1>
    %c19 = arith.constant 19 : index
    %c0_760 = arith.constant 0 : index
    %c0_761 = arith.constant 0 : index
    %c0_762 = arith.constant 0 : index
    %1692 = vector.load %arg3[%c19, %c0_760, %c0_761, %c0_762] : memref<24x3x8x16xf32, #tpu.memory_space<vmem>>, vector<1x1x8x16xf32>
    %1693 = vector.shape_cast %1692 : vector<1x1x8x16xf32> to vector<8x16xf32>
    %c19_763 = arith.constant 19 : index
    %c1_764 = arith.constant 1 : index
    %c0_765 = arith.constant 0 : index
    %c0_766 = arith.constant 0 : index
    %1694 = vector.load %arg3[%c19_763, %c1_764, %c0_765, %c0_766] : memref<24x3x8x16xf32, #tpu.memory_space<vmem>>, vector<1x1x8x16xf32>
    %1695 = vector.shape_cast %1694 : vector<1x1x8x16xf32> to vector<8x16xf32>
    %c19_767 = arith.constant 19 : index
    %c2_768 = arith.constant 2 : index
    %c0_769 = arith.constant 0 : index
    %c0_770 = arith.constant 0 : index
    %1696 = vector.load %arg3[%c19_767, %c2_768, %c0_769, %c0_770] : memref<24x3x8x16xf32, #tpu.memory_space<vmem>>, vector<1x1x8x16xf32>
    %1697 = vector.shape_cast %1696 : vector<1x1x8x16xf32> to vector<8x16xf32>
    %cst_771 = arith.constant 5.000000e-01 : f32
    %1698 = vector.broadcast %cst_771 : f32 to vector<8x16xf32>
    %1699 = arith.subf %1693, %1698 : vector<8x16xf32>
    %cst_772 = arith.constant 3.14159274 : f32
    %1700 = vector.broadcast %cst_772 : f32 to vector<8x16xf32>
    %1701 = arith.mulf %1700, %1699 : vector<8x16xf32>
    %1702 = arith.mulf %1701, %1701 : vector<8x16xf32>
    %cst_773 = arith.constant 2.75573188E-6 : f32
    %1703 = vector.broadcast %cst_773 : f32 to vector<8x16xf32>
    %1704 = arith.mulf %1702, %1703 : vector<8x16xf32>
    %cst_774 = arith.constant -1.98412701E-4 : f32
    %1705 = vector.broadcast %cst_774 : f32 to vector<8x16xf32>
    %1706 = arith.addf %1705, %1704 : vector<8x16xf32>
    %1707 = arith.mulf %1702, %1706 : vector<8x16xf32>
    %cst_775 = arith.constant 0.00833333377 : f32
    %1708 = vector.broadcast %cst_775 : f32 to vector<8x16xf32>
    %1709 = arith.addf %1708, %1707 : vector<8x16xf32>
    %1710 = arith.mulf %1702, %1709 : vector<8x16xf32>
    %cst_776 = arith.constant -0.166666672 : f32
    %1711 = vector.broadcast %cst_776 : f32 to vector<8x16xf32>
    %1712 = arith.addf %1711, %1710 : vector<8x16xf32>
    %1713 = arith.mulf %1702, %1712 : vector<8x16xf32>
    %cst_777 = arith.constant 1.000000e+00 : f32
    %1714 = vector.broadcast %cst_777 : f32 to vector<8x16xf32>
    %1715 = arith.addf %1714, %1713 : vector<8x16xf32>
    %1716 = arith.mulf %1701, %1715 : vector<8x16xf32>
    %cst_778 = arith.constant 0.000000e+00 : f32
    %1717 = vector.broadcast %cst_778 : f32 to vector<8x16xf32>
    %1718 = arith.subf %1717, %1716 : vector<8x16xf32>
    %cst_779 = arith.constant 1.00501251 : f32
    %1719 = vector.broadcast %cst_779 : f32 to vector<8x16xf32>
    %1720 = arith.mulf %1719, %1718 : vector<8x16xf32>
    %cst_780 = arith.constant 1.000000e+00 : f32
    %1721 = vector.broadcast %cst_780 : f32 to vector<8x16xf32>
    %1722 = arith.addf %1721, %1720 : vector<8x16xf32>
    %cst_781 = arith.constant 1.00501251 : f32
    %1723 = vector.broadcast %cst_781 : f32 to vector<8x16xf32>
    %1724 = arith.addf %1723, %1718 : vector<8x16xf32>
    %1725 = arith.divf %1722, %1724 : vector<8x16xf32>
    %cst_782 = arith.constant 1.00501251 : f32
    %1726 = vector.broadcast %cst_782 : f32 to vector<8x16xf32>
    %1727 = arith.subf %1726, %1725 : vector<8x16xf32>
    %cst_783 = arith.constant 1.000000e+02 : f32
    %1728 = vector.broadcast %cst_783 : f32 to vector<8x16xf32>
    %1729 = arith.mulf %1728, %1727 : vector<8x16xf32>
    %cst_784 = arith.constant 2.000000e+00 : f32
    %1730 = vector.broadcast %cst_784 : f32 to vector<8x16xf32>
    %1731 = arith.subf %1730, %1729 : vector<8x16xf32>
    %1732 = arith.mulf %1729, %1731 : vector<8x16xf32>
    %1733 = arith.cmpf ogt, %1732, %1695 : vector<8x16xf32>
    %cst_785 = arith.constant 1.000000e+00 : f32
    %1734 = vector.broadcast %cst_785 : f32 to vector<8x16xf32>
    %1735 = arith.subf %1734, %1729 : vector<8x16xf32>
    %1736 = math.exp %1735 : vector<8x16xf32>
    %1737 = arith.mulf %1729, %1736 : vector<8x16xf32>
    %1738 = arith.cmpf oge, %1737, %1695 : vector<8x16xf32>
    %1739 = arith.ori %1733, %1738 : vector<8x16xi1>
    %cst_786 = arith.constant dense<true> : vector<8x16xi1>
    %1740 = arith.xori %1691, %cst_786 : vector<8x16xi1>
    %1741 = arith.andi %1739, %1740 : vector<8x16xi1>
    %1742 = math.absf %1725 : vector<8x16xf32>
    %cst_787 = arith.constant -0.0012624911 : f32
    %1743 = vector.broadcast %cst_787 : f32 to vector<8x16xf32>
    %1744 = arith.mulf %1742, %1743 : vector<8x16xf32>
    %cst_788 = arith.constant 6.670090e-03 : f32
    %1745 = vector.broadcast %cst_788 : f32 to vector<8x16xf32>
    %1746 = arith.addf %1745, %1744 : vector<8x16xf32>
    %1747 = arith.mulf %1742, %1746 : vector<8x16xf32>
    %cst_789 = arith.constant -0.0170881264 : f32
    %1748 = vector.broadcast %cst_789 : f32 to vector<8x16xf32>
    %1749 = arith.addf %1748, %1747 : vector<8x16xf32>
    %1750 = arith.mulf %1742, %1749 : vector<8x16xf32>
    %cst_790 = arith.constant 0.0308918804 : f32
    %1751 = vector.broadcast %cst_790 : f32 to vector<8x16xf32>
    %1752 = arith.addf %1751, %1750 : vector<8x16xf32>
    %1753 = arith.mulf %1742, %1752 : vector<8x16xf32>
    %cst_791 = arith.constant -0.0501743034 : f32
    %1754 = vector.broadcast %cst_791 : f32 to vector<8x16xf32>
    %1755 = arith.addf %1754, %1753 : vector<8x16xf32>
    %1756 = arith.mulf %1742, %1755 : vector<8x16xf32>
    %cst_792 = arith.constant 0.0889789909 : f32
    %1757 = vector.broadcast %cst_792 : f32 to vector<8x16xf32>
    %1758 = arith.addf %1757, %1756 : vector<8x16xf32>
    %1759 = arith.mulf %1742, %1758 : vector<8x16xf32>
    %cst_793 = arith.constant -0.214598805 : f32
    %1760 = vector.broadcast %cst_793 : f32 to vector<8x16xf32>
    %1761 = arith.addf %1760, %1759 : vector<8x16xf32>
    %1762 = arith.mulf %1742, %1761 : vector<8x16xf32>
    %cst_794 = arith.constant 1.57079625 : f32
    %1763 = vector.broadcast %cst_794 : f32 to vector<8x16xf32>
    %1764 = arith.addf %1763, %1762 : vector<8x16xf32>
    %cst_795 = arith.constant 1.000000e+00 : f32
    %1765 = vector.broadcast %cst_795 : f32 to vector<8x16xf32>
    %1766 = arith.subf %1765, %1742 : vector<8x16xf32>
    %cst_796 = arith.constant 0.000000e+00 : f32
    %1767 = vector.broadcast %cst_796 : f32 to vector<8x16xf32>
    %1768 = arith.maximumf %1766, %1767 : vector<8x16xf32>
    %1769 = math.sqrt %1768 : vector<8x16xf32>
    %1770 = arith.mulf %1769, %1764 : vector<8x16xf32>
    %cst_797 = arith.constant 0.000000e+00 : f32
    %1771 = vector.broadcast %cst_797 : f32 to vector<8x16xf32>
    %1772 = arith.cmpf olt, %1725, %1771 : vector<8x16xf32>
    %cst_798 = arith.constant 3.14159274 : f32
    %1773 = vector.broadcast %cst_798 : f32 to vector<8x16xf32>
    %1774 = arith.subf %1773, %1770 : vector<8x16xf32>
    %1775 = arith.select %1772, %1774, %1770 : vector<8x16xi1>, vector<8x16xf32>
    %1776 = arith.mulf %1697, %1775 : vector<8x16xf32>
    %1777 = arith.select %1741, %1776, %1690 : vector<8x16xi1>, vector<8x16xf32>
    %1778 = arith.ori %1691, %1739 : vector<8x16xi1>
    %c20 = arith.constant 20 : index
    %c0_799 = arith.constant 0 : index
    %c0_800 = arith.constant 0 : index
    %c0_801 = arith.constant 0 : index
    %1779 = vector.load %arg3[%c20, %c0_799, %c0_800, %c0_801] : memref<24x3x8x16xf32, #tpu.memory_space<vmem>>, vector<1x1x8x16xf32>
    %1780 = vector.shape_cast %1779 : vector<1x1x8x16xf32> to vector<8x16xf32>
    %c20_802 = arith.constant 20 : index
    %c1_803 = arith.constant 1 : index
    %c0_804 = arith.constant 0 : index
    %c0_805 = arith.constant 0 : index
    %1781 = vector.load %arg3[%c20_802, %c1_803, %c0_804, %c0_805] : memref<24x3x8x16xf32, #tpu.memory_space<vmem>>, vector<1x1x8x16xf32>
    %1782 = vector.shape_cast %1781 : vector<1x1x8x16xf32> to vector<8x16xf32>
    %c20_806 = arith.constant 20 : index
    %c2_807 = arith.constant 2 : index
    %c0_808 = arith.constant 0 : index
    %c0_809 = arith.constant 0 : index
    %1783 = vector.load %arg3[%c20_806, %c2_807, %c0_808, %c0_809] : memref<24x3x8x16xf32, #tpu.memory_space<vmem>>, vector<1x1x8x16xf32>
    %1784 = vector.shape_cast %1783 : vector<1x1x8x16xf32> to vector<8x16xf32>
    %cst_810 = arith.constant 5.000000e-01 : f32
    %1785 = vector.broadcast %cst_810 : f32 to vector<8x16xf32>
    %1786 = arith.subf %1780, %1785 : vector<8x16xf32>
    %cst_811 = arith.constant 3.14159274 : f32
    %1787 = vector.broadcast %cst_811 : f32 to vector<8x16xf32>
    %1788 = arith.mulf %1787, %1786 : vector<8x16xf32>
    %1789 = arith.mulf %1788, %1788 : vector<8x16xf32>
    %cst_812 = arith.constant 2.75573188E-6 : f32
    %1790 = vector.broadcast %cst_812 : f32 to vector<8x16xf32>
    %1791 = arith.mulf %1789, %1790 : vector<8x16xf32>
    %cst_813 = arith.constant -1.98412701E-4 : f32
    %1792 = vector.broadcast %cst_813 : f32 to vector<8x16xf32>
    %1793 = arith.addf %1792, %1791 : vector<8x16xf32>
    %1794 = arith.mulf %1789, %1793 : vector<8x16xf32>
    %cst_814 = arith.constant 0.00833333377 : f32
    %1795 = vector.broadcast %cst_814 : f32 to vector<8x16xf32>
    %1796 = arith.addf %1795, %1794 : vector<8x16xf32>
    %1797 = arith.mulf %1789, %1796 : vector<8x16xf32>
    %cst_815 = arith.constant -0.166666672 : f32
    %1798 = vector.broadcast %cst_815 : f32 to vector<8x16xf32>
    %1799 = arith.addf %1798, %1797 : vector<8x16xf32>
    %1800 = arith.mulf %1789, %1799 : vector<8x16xf32>
    %cst_816 = arith.constant 1.000000e+00 : f32
    %1801 = vector.broadcast %cst_816 : f32 to vector<8x16xf32>
    %1802 = arith.addf %1801, %1800 : vector<8x16xf32>
    %1803 = arith.mulf %1788, %1802 : vector<8x16xf32>
    %cst_817 = arith.constant 0.000000e+00 : f32
    %1804 = vector.broadcast %cst_817 : f32 to vector<8x16xf32>
    %1805 = arith.subf %1804, %1803 : vector<8x16xf32>
    %cst_818 = arith.constant 1.00501251 : f32
    %1806 = vector.broadcast %cst_818 : f32 to vector<8x16xf32>
    %1807 = arith.mulf %1806, %1805 : vector<8x16xf32>
    %cst_819 = arith.constant 1.000000e+00 : f32
    %1808 = vector.broadcast %cst_819 : f32 to vector<8x16xf32>
    %1809 = arith.addf %1808, %1807 : vector<8x16xf32>
    %cst_820 = arith.constant 1.00501251 : f32
    %1810 = vector.broadcast %cst_820 : f32 to vector<8x16xf32>
    %1811 = arith.addf %1810, %1805 : vector<8x16xf32>
    %1812 = arith.divf %1809, %1811 : vector<8x16xf32>
    %cst_821 = arith.constant 1.00501251 : f32
    %1813 = vector.broadcast %cst_821 : f32 to vector<8x16xf32>
    %1814 = arith.subf %1813, %1812 : vector<8x16xf32>
    %cst_822 = arith.constant 1.000000e+02 : f32
    %1815 = vector.broadcast %cst_822 : f32 to vector<8x16xf32>
    %1816 = arith.mulf %1815, %1814 : vector<8x16xf32>
    %cst_823 = arith.constant 2.000000e+00 : f32
    %1817 = vector.broadcast %cst_823 : f32 to vector<8x16xf32>
    %1818 = arith.subf %1817, %1816 : vector<8x16xf32>
    %1819 = arith.mulf %1816, %1818 : vector<8x16xf32>
    %1820 = arith.cmpf ogt, %1819, %1782 : vector<8x16xf32>
    %cst_824 = arith.constant 1.000000e+00 : f32
    %1821 = vector.broadcast %cst_824 : f32 to vector<8x16xf32>
    %1822 = arith.subf %1821, %1816 : vector<8x16xf32>
    %1823 = math.exp %1822 : vector<8x16xf32>
    %1824 = arith.mulf %1816, %1823 : vector<8x16xf32>
    %1825 = arith.cmpf oge, %1824, %1782 : vector<8x16xf32>
    %1826 = arith.ori %1820, %1825 : vector<8x16xi1>
    %cst_825 = arith.constant dense<true> : vector<8x16xi1>
    %1827 = arith.xori %1778, %cst_825 : vector<8x16xi1>
    %1828 = arith.andi %1826, %1827 : vector<8x16xi1>
    %1829 = math.absf %1812 : vector<8x16xf32>
    %cst_826 = arith.constant -0.0012624911 : f32
    %1830 = vector.broadcast %cst_826 : f32 to vector<8x16xf32>
    %1831 = arith.mulf %1829, %1830 : vector<8x16xf32>
    %cst_827 = arith.constant 6.670090e-03 : f32
    %1832 = vector.broadcast %cst_827 : f32 to vector<8x16xf32>
    %1833 = arith.addf %1832, %1831 : vector<8x16xf32>
    %1834 = arith.mulf %1829, %1833 : vector<8x16xf32>
    %cst_828 = arith.constant -0.0170881264 : f32
    %1835 = vector.broadcast %cst_828 : f32 to vector<8x16xf32>
    %1836 = arith.addf %1835, %1834 : vector<8x16xf32>
    %1837 = arith.mulf %1829, %1836 : vector<8x16xf32>
    %cst_829 = arith.constant 0.0308918804 : f32
    %1838 = vector.broadcast %cst_829 : f32 to vector<8x16xf32>
    %1839 = arith.addf %1838, %1837 : vector<8x16xf32>
    %1840 = arith.mulf %1829, %1839 : vector<8x16xf32>
    %cst_830 = arith.constant -0.0501743034 : f32
    %1841 = vector.broadcast %cst_830 : f32 to vector<8x16xf32>
    %1842 = arith.addf %1841, %1840 : vector<8x16xf32>
    %1843 = arith.mulf %1829, %1842 : vector<8x16xf32>
    %cst_831 = arith.constant 0.0889789909 : f32
    %1844 = vector.broadcast %cst_831 : f32 to vector<8x16xf32>
    %1845 = arith.addf %1844, %1843 : vector<8x16xf32>
    %1846 = arith.mulf %1829, %1845 : vector<8x16xf32>
    %cst_832 = arith.constant -0.214598805 : f32
    %1847 = vector.broadcast %cst_832 : f32 to vector<8x16xf32>
    %1848 = arith.addf %1847, %1846 : vector<8x16xf32>
    %1849 = arith.mulf %1829, %1848 : vector<8x16xf32>
    %cst_833 = arith.constant 1.57079625 : f32
    %1850 = vector.broadcast %cst_833 : f32 to vector<8x16xf32>
    %1851 = arith.addf %1850, %1849 : vector<8x16xf32>
    %cst_834 = arith.constant 1.000000e+00 : f32
    %1852 = vector.broadcast %cst_834 : f32 to vector<8x16xf32>
    %1853 = arith.subf %1852, %1829 : vector<8x16xf32>
    %cst_835 = arith.constant 0.000000e+00 : f32
    %1854 = vector.broadcast %cst_835 : f32 to vector<8x16xf32>
    %1855 = arith.maximumf %1853, %1854 : vector<8x16xf32>
    %1856 = math.sqrt %1855 : vector<8x16xf32>
    %1857 = arith.mulf %1856, %1851 : vector<8x16xf32>
    %cst_836 = arith.constant 0.000000e+00 : f32
    %1858 = vector.broadcast %cst_836 : f32 to vector<8x16xf32>
    %1859 = arith.cmpf olt, %1812, %1858 : vector<8x16xf32>
    %cst_837 = arith.constant 3.14159274 : f32
    %1860 = vector.broadcast %cst_837 : f32 to vector<8x16xf32>
    %1861 = arith.subf %1860, %1857 : vector<8x16xf32>
    %1862 = arith.select %1859, %1861, %1857 : vector<8x16xi1>, vector<8x16xf32>
    %1863 = arith.mulf %1784, %1862 : vector<8x16xf32>
    %1864 = arith.select %1828, %1863, %1777 : vector<8x16xi1>, vector<8x16xf32>
    %1865 = arith.ori %1778, %1826 : vector<8x16xi1>
    %c21 = arith.constant 21 : index
    %c0_838 = arith.constant 0 : index
    %c0_839 = arith.constant 0 : index
    %c0_840 = arith.constant 0 : index
    %1866 = vector.load %arg3[%c21, %c0_838, %c0_839, %c0_840] : memref<24x3x8x16xf32, #tpu.memory_space<vmem>>, vector<1x1x8x16xf32>
    %1867 = vector.shape_cast %1866 : vector<1x1x8x16xf32> to vector<8x16xf32>
    %c21_841 = arith.constant 21 : index
    %c1_842 = arith.constant 1 : index
    %c0_843 = arith.constant 0 : index
    %c0_844 = arith.constant 0 : index
    %1868 = vector.load %arg3[%c21_841, %c1_842, %c0_843, %c0_844] : memref<24x3x8x16xf32, #tpu.memory_space<vmem>>, vector<1x1x8x16xf32>
    %1869 = vector.shape_cast %1868 : vector<1x1x8x16xf32> to vector<8x16xf32>
    %c21_845 = arith.constant 21 : index
    %c2_846 = arith.constant 2 : index
    %c0_847 = arith.constant 0 : index
    %c0_848 = arith.constant 0 : index
    %1870 = vector.load %arg3[%c21_845, %c2_846, %c0_847, %c0_848] : memref<24x3x8x16xf32, #tpu.memory_space<vmem>>, vector<1x1x8x16xf32>
    %1871 = vector.shape_cast %1870 : vector<1x1x8x16xf32> to vector<8x16xf32>
    %cst_849 = arith.constant 5.000000e-01 : f32
    %1872 = vector.broadcast %cst_849 : f32 to vector<8x16xf32>
    %1873 = arith.subf %1867, %1872 : vector<8x16xf32>
    %cst_850 = arith.constant 3.14159274 : f32
    %1874 = vector.broadcast %cst_850 : f32 to vector<8x16xf32>
    %1875 = arith.mulf %1874, %1873 : vector<8x16xf32>
    %1876 = arith.mulf %1875, %1875 : vector<8x16xf32>
    %cst_851 = arith.constant 2.75573188E-6 : f32
    %1877 = vector.broadcast %cst_851 : f32 to vector<8x16xf32>
    %1878 = arith.mulf %1876, %1877 : vector<8x16xf32>
    %cst_852 = arith.constant -1.98412701E-4 : f32
    %1879 = vector.broadcast %cst_852 : f32 to vector<8x16xf32>
    %1880 = arith.addf %1879, %1878 : vector<8x16xf32>
    %1881 = arith.mulf %1876, %1880 : vector<8x16xf32>
    %cst_853 = arith.constant 0.00833333377 : f32
    %1882 = vector.broadcast %cst_853 : f32 to vector<8x16xf32>
    %1883 = arith.addf %1882, %1881 : vector<8x16xf32>
    %1884 = arith.mulf %1876, %1883 : vector<8x16xf32>
    %cst_854 = arith.constant -0.166666672 : f32
    %1885 = vector.broadcast %cst_854 : f32 to vector<8x16xf32>
    %1886 = arith.addf %1885, %1884 : vector<8x16xf32>
    %1887 = arith.mulf %1876, %1886 : vector<8x16xf32>
    %cst_855 = arith.constant 1.000000e+00 : f32
    %1888 = vector.broadcast %cst_855 : f32 to vector<8x16xf32>
    %1889 = arith.addf %1888, %1887 : vector<8x16xf32>
    %1890 = arith.mulf %1875, %1889 : vector<8x16xf32>
    %cst_856 = arith.constant 0.000000e+00 : f32
    %1891 = vector.broadcast %cst_856 : f32 to vector<8x16xf32>
    %1892 = arith.subf %1891, %1890 : vector<8x16xf32>
    %cst_857 = arith.constant 1.00501251 : f32
    %1893 = vector.broadcast %cst_857 : f32 to vector<8x16xf32>
    %1894 = arith.mulf %1893, %1892 : vector<8x16xf32>
    %cst_858 = arith.constant 1.000000e+00 : f32
    %1895 = vector.broadcast %cst_858 : f32 to vector<8x16xf32>
    %1896 = arith.addf %1895, %1894 : vector<8x16xf32>
    %cst_859 = arith.constant 1.00501251 : f32
    %1897 = vector.broadcast %cst_859 : f32 to vector<8x16xf32>
    %1898 = arith.addf %1897, %1892 : vector<8x16xf32>
    %1899 = arith.divf %1896, %1898 : vector<8x16xf32>
    %cst_860 = arith.constant 1.00501251 : f32
    %1900 = vector.broadcast %cst_860 : f32 to vector<8x16xf32>
    %1901 = arith.subf %1900, %1899 : vector<8x16xf32>
    %cst_861 = arith.constant 1.000000e+02 : f32
    %1902 = vector.broadcast %cst_861 : f32 to vector<8x16xf32>
    %1903 = arith.mulf %1902, %1901 : vector<8x16xf32>
    %cst_862 = arith.constant 2.000000e+00 : f32
    %1904 = vector.broadcast %cst_862 : f32 to vector<8x16xf32>
    %1905 = arith.subf %1904, %1903 : vector<8x16xf32>
    %1906 = arith.mulf %1903, %1905 : vector<8x16xf32>
    %1907 = arith.cmpf ogt, %1906, %1869 : vector<8x16xf32>
    %cst_863 = arith.constant 1.000000e+00 : f32
    %1908 = vector.broadcast %cst_863 : f32 to vector<8x16xf32>
    %1909 = arith.subf %1908, %1903 : vector<8x16xf32>
    %1910 = math.exp %1909 : vector<8x16xf32>
    %1911 = arith.mulf %1903, %1910 : vector<8x16xf32>
    %1912 = arith.cmpf oge, %1911, %1869 : vector<8x16xf32>
    %1913 = arith.ori %1907, %1912 : vector<8x16xi1>
    %cst_864 = arith.constant dense<true> : vector<8x16xi1>
    %1914 = arith.xori %1865, %cst_864 : vector<8x16xi1>
    %1915 = arith.andi %1913, %1914 : vector<8x16xi1>
    %1916 = math.absf %1899 : vector<8x16xf32>
    %cst_865 = arith.constant -0.0012624911 : f32
    %1917 = vector.broadcast %cst_865 : f32 to vector<8x16xf32>
    %1918 = arith.mulf %1916, %1917 : vector<8x16xf32>
    %cst_866 = arith.constant 6.670090e-03 : f32
    %1919 = vector.broadcast %cst_866 : f32 to vector<8x16xf32>
    %1920 = arith.addf %1919, %1918 : vector<8x16xf32>
    %1921 = arith.mulf %1916, %1920 : vector<8x16xf32>
    %cst_867 = arith.constant -0.0170881264 : f32
    %1922 = vector.broadcast %cst_867 : f32 to vector<8x16xf32>
    %1923 = arith.addf %1922, %1921 : vector<8x16xf32>
    %1924 = arith.mulf %1916, %1923 : vector<8x16xf32>
    %cst_868 = arith.constant 0.0308918804 : f32
    %1925 = vector.broadcast %cst_868 : f32 to vector<8x16xf32>
    %1926 = arith.addf %1925, %1924 : vector<8x16xf32>
    %1927 = arith.mulf %1916, %1926 : vector<8x16xf32>
    %cst_869 = arith.constant -0.0501743034 : f32
    %1928 = vector.broadcast %cst_869 : f32 to vector<8x16xf32>
    %1929 = arith.addf %1928, %1927 : vector<8x16xf32>
    %1930 = arith.mulf %1916, %1929 : vector<8x16xf32>
    %cst_870 = arith.constant 0.0889789909 : f32
    %1931 = vector.broadcast %cst_870 : f32 to vector<8x16xf32>
    %1932 = arith.addf %1931, %1930 : vector<8x16xf32>
    %1933 = arith.mulf %1916, %1932 : vector<8x16xf32>
    %cst_871 = arith.constant -0.214598805 : f32
    %1934 = vector.broadcast %cst_871 : f32 to vector<8x16xf32>
    %1935 = arith.addf %1934, %1933 : vector<8x16xf32>
    %1936 = arith.mulf %1916, %1935 : vector<8x16xf32>
    %cst_872 = arith.constant 1.57079625 : f32
    %1937 = vector.broadcast %cst_872 : f32 to vector<8x16xf32>
    %1938 = arith.addf %1937, %1936 : vector<8x16xf32>
    %cst_873 = arith.constant 1.000000e+00 : f32
    %1939 = vector.broadcast %cst_873 : f32 to vector<8x16xf32>
    %1940 = arith.subf %1939, %1916 : vector<8x16xf32>
    %cst_874 = arith.constant 0.000000e+00 : f32
    %1941 = vector.broadcast %cst_874 : f32 to vector<8x16xf32>
    %1942 = arith.maximumf %1940, %1941 : vector<8x16xf32>
    %1943 = math.sqrt %1942 : vector<8x16xf32>
    %1944 = arith.mulf %1943, %1938 : vector<8x16xf32>
    %cst_875 = arith.constant 0.000000e+00 : f32
    %1945 = vector.broadcast %cst_875 : f32 to vector<8x16xf32>
    %1946 = arith.cmpf olt, %1899, %1945 : vector<8x16xf32>
    %cst_876 = arith.constant 3.14159274 : f32
    %1947 = vector.broadcast %cst_876 : f32 to vector<8x16xf32>
    %1948 = arith.subf %1947, %1944 : vector<8x16xf32>
    %1949 = arith.select %1946, %1948, %1944 : vector<8x16xi1>, vector<8x16xf32>
    %1950 = arith.mulf %1871, %1949 : vector<8x16xf32>
    %1951 = arith.select %1915, %1950, %1864 : vector<8x16xi1>, vector<8x16xf32>
    %1952 = arith.ori %1865, %1913 : vector<8x16xi1>
    %c22 = arith.constant 22 : index
    %c0_877 = arith.constant 0 : index
    %c0_878 = arith.constant 0 : index
    %c0_879 = arith.constant 0 : index
    %1953 = vector.load %arg3[%c22, %c0_877, %c0_878, %c0_879] : memref<24x3x8x16xf32, #tpu.memory_space<vmem>>, vector<1x1x8x16xf32>
    %1954 = vector.shape_cast %1953 : vector<1x1x8x16xf32> to vector<8x16xf32>
    %c22_880 = arith.constant 22 : index
    %c1_881 = arith.constant 1 : index
    %c0_882 = arith.constant 0 : index
    %c0_883 = arith.constant 0 : index
    %1955 = vector.load %arg3[%c22_880, %c1_881, %c0_882, %c0_883] : memref<24x3x8x16xf32, #tpu.memory_space<vmem>>, vector<1x1x8x16xf32>
    %1956 = vector.shape_cast %1955 : vector<1x1x8x16xf32> to vector<8x16xf32>
    %c22_884 = arith.constant 22 : index
    %c2_885 = arith.constant 2 : index
    %c0_886 = arith.constant 0 : index
    %c0_887 = arith.constant 0 : index
    %1957 = vector.load %arg3[%c22_884, %c2_885, %c0_886, %c0_887] : memref<24x3x8x16xf32, #tpu.memory_space<vmem>>, vector<1x1x8x16xf32>
    %1958 = vector.shape_cast %1957 : vector<1x1x8x16xf32> to vector<8x16xf32>
    %cst_888 = arith.constant 5.000000e-01 : f32
    %1959 = vector.broadcast %cst_888 : f32 to vector<8x16xf32>
    %1960 = arith.subf %1954, %1959 : vector<8x16xf32>
    %cst_889 = arith.constant 3.14159274 : f32
    %1961 = vector.broadcast %cst_889 : f32 to vector<8x16xf32>
    %1962 = arith.mulf %1961, %1960 : vector<8x16xf32>
    %1963 = arith.mulf %1962, %1962 : vector<8x16xf32>
    %cst_890 = arith.constant 2.75573188E-6 : f32
    %1964 = vector.broadcast %cst_890 : f32 to vector<8x16xf32>
    %1965 = arith.mulf %1963, %1964 : vector<8x16xf32>
    %cst_891 = arith.constant -1.98412701E-4 : f32
    %1966 = vector.broadcast %cst_891 : f32 to vector<8x16xf32>
    %1967 = arith.addf %1966, %1965 : vector<8x16xf32>
    %1968 = arith.mulf %1963, %1967 : vector<8x16xf32>
    %cst_892 = arith.constant 0.00833333377 : f32
    %1969 = vector.broadcast %cst_892 : f32 to vector<8x16xf32>
    %1970 = arith.addf %1969, %1968 : vector<8x16xf32>
    %1971 = arith.mulf %1963, %1970 : vector<8x16xf32>
    %cst_893 = arith.constant -0.166666672 : f32
    %1972 = vector.broadcast %cst_893 : f32 to vector<8x16xf32>
    %1973 = arith.addf %1972, %1971 : vector<8x16xf32>
    %1974 = arith.mulf %1963, %1973 : vector<8x16xf32>
    %cst_894 = arith.constant 1.000000e+00 : f32
    %1975 = vector.broadcast %cst_894 : f32 to vector<8x16xf32>
    %1976 = arith.addf %1975, %1974 : vector<8x16xf32>
    %1977 = arith.mulf %1962, %1976 : vector<8x16xf32>
    %cst_895 = arith.constant 0.000000e+00 : f32
    %1978 = vector.broadcast %cst_895 : f32 to vector<8x16xf32>
    %1979 = arith.subf %1978, %1977 : vector<8x16xf32>
    %cst_896 = arith.constant 1.00501251 : f32
    %1980 = vector.broadcast %cst_896 : f32 to vector<8x16xf32>
    %1981 = arith.mulf %1980, %1979 : vector<8x16xf32>
    %cst_897 = arith.constant 1.000000e+00 : f32
    %1982 = vector.broadcast %cst_897 : f32 to vector<8x16xf32>
    %1983 = arith.addf %1982, %1981 : vector<8x16xf32>
    %cst_898 = arith.constant 1.00501251 : f32
    %1984 = vector.broadcast %cst_898 : f32 to vector<8x16xf32>
    %1985 = arith.addf %1984, %1979 : vector<8x16xf32>
    %1986 = arith.divf %1983, %1985 : vector<8x16xf32>
    %cst_899 = arith.constant 1.00501251 : f32
    %1987 = vector.broadcast %cst_899 : f32 to vector<8x16xf32>
    %1988 = arith.subf %1987, %1986 : vector<8x16xf32>
    %cst_900 = arith.constant 1.000000e+02 : f32
    %1989 = vector.broadcast %cst_900 : f32 to vector<8x16xf32>
    %1990 = arith.mulf %1989, %1988 : vector<8x16xf32>
    %cst_901 = arith.constant 2.000000e+00 : f32
    %1991 = vector.broadcast %cst_901 : f32 to vector<8x16xf32>
    %1992 = arith.subf %1991, %1990 : vector<8x16xf32>
    %1993 = arith.mulf %1990, %1992 : vector<8x16xf32>
    %1994 = arith.cmpf ogt, %1993, %1956 : vector<8x16xf32>
    %cst_902 = arith.constant 1.000000e+00 : f32
    %1995 = vector.broadcast %cst_902 : f32 to vector<8x16xf32>
    %1996 = arith.subf %1995, %1990 : vector<8x16xf32>
    %1997 = math.exp %1996 : vector<8x16xf32>
    %1998 = arith.mulf %1990, %1997 : vector<8x16xf32>
    %1999 = arith.cmpf oge, %1998, %1956 : vector<8x16xf32>
    %2000 = arith.ori %1994, %1999 : vector<8x16xi1>
    %cst_903 = arith.constant dense<true> : vector<8x16xi1>
    %2001 = arith.xori %1952, %cst_903 : vector<8x16xi1>
    %2002 = arith.andi %2000, %2001 : vector<8x16xi1>
    %2003 = math.absf %1986 : vector<8x16xf32>
    %cst_904 = arith.constant -0.0012624911 : f32
    %2004 = vector.broadcast %cst_904 : f32 to vector<8x16xf32>
    %2005 = arith.mulf %2003, %2004 : vector<8x16xf32>
    %cst_905 = arith.constant 6.670090e-03 : f32
    %2006 = vector.broadcast %cst_905 : f32 to vector<8x16xf32>
    %2007 = arith.addf %2006, %2005 : vector<8x16xf32>
    %2008 = arith.mulf %2003, %2007 : vector<8x16xf32>
    %cst_906 = arith.constant -0.0170881264 : f32
    %2009 = vector.broadcast %cst_906 : f32 to vector<8x16xf32>
    %2010 = arith.addf %2009, %2008 : vector<8x16xf32>
    %2011 = arith.mulf %2003, %2010 : vector<8x16xf32>
    %cst_907 = arith.constant 0.0308918804 : f32
    %2012 = vector.broadcast %cst_907 : f32 to vector<8x16xf32>
    %2013 = arith.addf %2012, %2011 : vector<8x16xf32>
    %2014 = arith.mulf %2003, %2013 : vector<8x16xf32>
    %cst_908 = arith.constant -0.0501743034 : f32
    %2015 = vector.broadcast %cst_908 : f32 to vector<8x16xf32>
    %2016 = arith.addf %2015, %2014 : vector<8x16xf32>
    %2017 = arith.mulf %2003, %2016 : vector<8x16xf32>
    %cst_909 = arith.constant 0.0889789909 : f32
    %2018 = vector.broadcast %cst_909 : f32 to vector<8x16xf32>
    %2019 = arith.addf %2018, %2017 : vector<8x16xf32>
    %2020 = arith.mulf %2003, %2019 : vector<8x16xf32>
    %cst_910 = arith.constant -0.214598805 : f32
    %2021 = vector.broadcast %cst_910 : f32 to vector<8x16xf32>
    %2022 = arith.addf %2021, %2020 : vector<8x16xf32>
    %2023 = arith.mulf %2003, %2022 : vector<8x16xf32>
    %cst_911 = arith.constant 1.57079625 : f32
    %2024 = vector.broadcast %cst_911 : f32 to vector<8x16xf32>
    %2025 = arith.addf %2024, %2023 : vector<8x16xf32>
    %cst_912 = arith.constant 1.000000e+00 : f32
    %2026 = vector.broadcast %cst_912 : f32 to vector<8x16xf32>
    %2027 = arith.subf %2026, %2003 : vector<8x16xf32>
    %cst_913 = arith.constant 0.000000e+00 : f32
    %2028 = vector.broadcast %cst_913 : f32 to vector<8x16xf32>
    %2029 = arith.maximumf %2027, %2028 : vector<8x16xf32>
    %2030 = math.sqrt %2029 : vector<8x16xf32>
    %2031 = arith.mulf %2030, %2025 : vector<8x16xf32>
    %cst_914 = arith.constant 0.000000e+00 : f32
    %2032 = vector.broadcast %cst_914 : f32 to vector<8x16xf32>
    %2033 = arith.cmpf olt, %1986, %2032 : vector<8x16xf32>
    %cst_915 = arith.constant 3.14159274 : f32
    %2034 = vector.broadcast %cst_915 : f32 to vector<8x16xf32>
    %2035 = arith.subf %2034, %2031 : vector<8x16xf32>
    %2036 = arith.select %2033, %2035, %2031 : vector<8x16xi1>, vector<8x16xf32>
    %2037 = arith.mulf %1958, %2036 : vector<8x16xf32>
    %2038 = arith.select %2002, %2037, %1951 : vector<8x16xi1>, vector<8x16xf32>
    %2039 = arith.ori %1952, %2000 : vector<8x16xi1>
    %c23 = arith.constant 23 : index
    %c0_916 = arith.constant 0 : index
    %c0_917 = arith.constant 0 : index
    %c0_918 = arith.constant 0 : index
    %2040 = vector.load %arg3[%c23, %c0_916, %c0_917, %c0_918] : memref<24x3x8x16xf32, #tpu.memory_space<vmem>>, vector<1x1x8x16xf32>
    %2041 = vector.shape_cast %2040 : vector<1x1x8x16xf32> to vector<8x16xf32>
    %c23_919 = arith.constant 23 : index
    %c1_920 = arith.constant 1 : index
    %c0_921 = arith.constant 0 : index
    %c0_922 = arith.constant 0 : index
    %2042 = vector.load %arg3[%c23_919, %c1_920, %c0_921, %c0_922] : memref<24x3x8x16xf32, #tpu.memory_space<vmem>>, vector<1x1x8x16xf32>
    %2043 = vector.shape_cast %2042 : vector<1x1x8x16xf32> to vector<8x16xf32>
    %c23_923 = arith.constant 23 : index
    %c2_924 = arith.constant 2 : index
    %c0_925 = arith.constant 0 : index
    %c0_926 = arith.constant 0 : index
    %2044 = vector.load %arg3[%c23_923, %c2_924, %c0_925, %c0_926] : memref<24x3x8x16xf32, #tpu.memory_space<vmem>>, vector<1x1x8x16xf32>
    %2045 = vector.shape_cast %2044 : vector<1x1x8x16xf32> to vector<8x16xf32>
    %cst_927 = arith.constant 5.000000e-01 : f32
    %2046 = vector.broadcast %cst_927 : f32 to vector<8x16xf32>
    %2047 = arith.subf %2041, %2046 : vector<8x16xf32>
    %cst_928 = arith.constant 3.14159274 : f32
    %2048 = vector.broadcast %cst_928 : f32 to vector<8x16xf32>
    %2049 = arith.mulf %2048, %2047 : vector<8x16xf32>
    %2050 = arith.mulf %2049, %2049 : vector<8x16xf32>
    %cst_929 = arith.constant 2.75573188E-6 : f32
    %2051 = vector.broadcast %cst_929 : f32 to vector<8x16xf32>
    %2052 = arith.mulf %2050, %2051 : vector<8x16xf32>
    %cst_930 = arith.constant -1.98412701E-4 : f32
    %2053 = vector.broadcast %cst_930 : f32 to vector<8x16xf32>
    %2054 = arith.addf %2053, %2052 : vector<8x16xf32>
    %2055 = arith.mulf %2050, %2054 : vector<8x16xf32>
    %cst_931 = arith.constant 0.00833333377 : f32
    %2056 = vector.broadcast %cst_931 : f32 to vector<8x16xf32>
    %2057 = arith.addf %2056, %2055 : vector<8x16xf32>
    %2058 = arith.mulf %2050, %2057 : vector<8x16xf32>
    %cst_932 = arith.constant -0.166666672 : f32
    %2059 = vector.broadcast %cst_932 : f32 to vector<8x16xf32>
    %2060 = arith.addf %2059, %2058 : vector<8x16xf32>
    %2061 = arith.mulf %2050, %2060 : vector<8x16xf32>
    %cst_933 = arith.constant 1.000000e+00 : f32
    %2062 = vector.broadcast %cst_933 : f32 to vector<8x16xf32>
    %2063 = arith.addf %2062, %2061 : vector<8x16xf32>
    %2064 = arith.mulf %2049, %2063 : vector<8x16xf32>
    %cst_934 = arith.constant 0.000000e+00 : f32
    %2065 = vector.broadcast %cst_934 : f32 to vector<8x16xf32>
    %2066 = arith.subf %2065, %2064 : vector<8x16xf32>
    %cst_935 = arith.constant 1.00501251 : f32
    %2067 = vector.broadcast %cst_935 : f32 to vector<8x16xf32>
    %2068 = arith.mulf %2067, %2066 : vector<8x16xf32>
    %cst_936 = arith.constant 1.000000e+00 : f32
    %2069 = vector.broadcast %cst_936 : f32 to vector<8x16xf32>
    %2070 = arith.addf %2069, %2068 : vector<8x16xf32>
    %cst_937 = arith.constant 1.00501251 : f32
    %2071 = vector.broadcast %cst_937 : f32 to vector<8x16xf32>
    %2072 = arith.addf %2071, %2066 : vector<8x16xf32>
    %2073 = arith.divf %2070, %2072 : vector<8x16xf32>
    %cst_938 = arith.constant 1.00501251 : f32
    %2074 = vector.broadcast %cst_938 : f32 to vector<8x16xf32>
    %2075 = arith.subf %2074, %2073 : vector<8x16xf32>
    %cst_939 = arith.constant 1.000000e+02 : f32
    %2076 = vector.broadcast %cst_939 : f32 to vector<8x16xf32>
    %2077 = arith.mulf %2076, %2075 : vector<8x16xf32>
    %cst_940 = arith.constant 2.000000e+00 : f32
    %2078 = vector.broadcast %cst_940 : f32 to vector<8x16xf32>
    %2079 = arith.subf %2078, %2077 : vector<8x16xf32>
    %2080 = arith.mulf %2077, %2079 : vector<8x16xf32>
    %2081 = arith.cmpf ogt, %2080, %2043 : vector<8x16xf32>
    %cst_941 = arith.constant 1.000000e+00 : f32
    %2082 = vector.broadcast %cst_941 : f32 to vector<8x16xf32>
    %2083 = arith.subf %2082, %2077 : vector<8x16xf32>
    %2084 = math.exp %2083 : vector<8x16xf32>
    %2085 = arith.mulf %2077, %2084 : vector<8x16xf32>
    %2086 = arith.cmpf oge, %2085, %2043 : vector<8x16xf32>
    %2087 = arith.ori %2081, %2086 : vector<8x16xi1>
    %cst_942 = arith.constant dense<true> : vector<8x16xi1>
    %2088 = arith.xori %2039, %cst_942 : vector<8x16xi1>
    %2089 = arith.andi %2087, %2088 : vector<8x16xi1>
    %2090 = math.absf %2073 : vector<8x16xf32>
    %cst_943 = arith.constant -0.0012624911 : f32
    %2091 = vector.broadcast %cst_943 : f32 to vector<8x16xf32>
    %2092 = arith.mulf %2090, %2091 : vector<8x16xf32>
    %cst_944 = arith.constant 6.670090e-03 : f32
    %2093 = vector.broadcast %cst_944 : f32 to vector<8x16xf32>
    %2094 = arith.addf %2093, %2092 : vector<8x16xf32>
    %2095 = arith.mulf %2090, %2094 : vector<8x16xf32>
    %cst_945 = arith.constant -0.0170881264 : f32
    %2096 = vector.broadcast %cst_945 : f32 to vector<8x16xf32>
    %2097 = arith.addf %2096, %2095 : vector<8x16xf32>
    %2098 = arith.mulf %2090, %2097 : vector<8x16xf32>
    %cst_946 = arith.constant 0.0308918804 : f32
    %2099 = vector.broadcast %cst_946 : f32 to vector<8x16xf32>
    %2100 = arith.addf %2099, %2098 : vector<8x16xf32>
    %2101 = arith.mulf %2090, %2100 : vector<8x16xf32>
    %cst_947 = arith.constant -0.0501743034 : f32
    %2102 = vector.broadcast %cst_947 : f32 to vector<8x16xf32>
    %2103 = arith.addf %2102, %2101 : vector<8x16xf32>
    %2104 = arith.mulf %2090, %2103 : vector<8x16xf32>
    %cst_948 = arith.constant 0.0889789909 : f32
    %2105 = vector.broadcast %cst_948 : f32 to vector<8x16xf32>
    %2106 = arith.addf %2105, %2104 : vector<8x16xf32>
    %2107 = arith.mulf %2090, %2106 : vector<8x16xf32>
    %cst_949 = arith.constant -0.214598805 : f32
    %2108 = vector.broadcast %cst_949 : f32 to vector<8x16xf32>
    %2109 = arith.addf %2108, %2107 : vector<8x16xf32>
    %2110 = arith.mulf %2090, %2109 : vector<8x16xf32>
    %cst_950 = arith.constant 1.57079625 : f32
    %2111 = vector.broadcast %cst_950 : f32 to vector<8x16xf32>
    %2112 = arith.addf %2111, %2110 : vector<8x16xf32>
    %cst_951 = arith.constant 1.000000e+00 : f32
    %2113 = vector.broadcast %cst_951 : f32 to vector<8x16xf32>
    %2114 = arith.subf %2113, %2090 : vector<8x16xf32>
    %cst_952 = arith.constant 0.000000e+00 : f32
    %2115 = vector.broadcast %cst_952 : f32 to vector<8x16xf32>
    %2116 = arith.maximumf %2114, %2115 : vector<8x16xf32>
    %2117 = math.sqrt %2116 : vector<8x16xf32>
    %2118 = arith.mulf %2117, %2112 : vector<8x16xf32>
    %cst_953 = arith.constant 0.000000e+00 : f32
    %2119 = vector.broadcast %cst_953 : f32 to vector<8x16xf32>
    %2120 = arith.cmpf olt, %2073, %2119 : vector<8x16xf32>
    %cst_954 = arith.constant 3.14159274 : f32
    %2121 = vector.broadcast %cst_954 : f32 to vector<8x16xf32>
    %2122 = arith.subf %2121, %2118 : vector<8x16xf32>
    %2123 = arith.select %2120, %2122, %2118 : vector<8x16xi1>, vector<8x16xf32>
    %2124 = arith.mulf %2045, %2123 : vector<8x16xf32>
    %2125 = arith.select %2089, %2124, %2038 : vector<8x16xi1>, vector<8x16xf32>
    %cst_955 = arith.constant 3.14159274 : f32
    %2126 = vector.broadcast %cst_955 : f32 to vector<8x16xf32>
    %2127 = arith.addf %2125, %2126 : vector<8x16xf32>
    %2128 = arith.addf %2127, %36 : vector<8x16xf32>
    %cst_956 = arith.constant 0.159154937 : f32
    %2129 = vector.broadcast %cst_956 : f32 to vector<8x16xf32>
    %2130 = arith.mulf %2128, %2129 : vector<8x16xf32>
    %2131 = math.floor %2130 : vector<8x16xf32>
    %cst_957 = arith.constant 6.28318548 : f32
    %2132 = vector.broadcast %cst_957 : f32 to vector<8x16xf32>
    %2133 = arith.mulf %2132, %2131 : vector<8x16xf32>
    %2134 = arith.subf %2128, %2133 : vector<8x16xf32>
    %cst_958 = arith.constant 3.14159274 : f32
    %2135 = vector.broadcast %cst_958 : f32 to vector<8x16xf32>
    %2136 = arith.subf %2134, %2135 : vector<8x16xf32>
    %c0_959 = arith.constant 0 : index
    %c0_960 = arith.constant 0 : index
    %2137 = vector.load %arg4[%c0_959, %c0_960] : memref<8x16xf32, #tpu.memory_space<vmem>>, vector<8x16xf32>
    tpu.vector_store %arg4[%c0_959, %c0_960], %2136 {strides = array<i32>} : memref<8x16xf32, #tpu.memory_space<vmem>>, vector<8x16xf32>,
    return
  }
}

</mosaic_0001>

<bundles_post_ra>
// kernel: tpu_custom_call.1
= control target key start
LH: loop header
LB: loop body
LE: loop exit
PB: predicated region body
PF: predicated region fallthrough
CT: control target
= control target key end

     0   :  { %9 = vsyncpa [#allocation3], 0  ;;  %v2095_v4 = vmov 0.0|0.0   ;;  %vm2096_vm0 = vmmov 0   ;;  %v2097_v6 = vmov 0.0   ;;  %vm30_vm1 = vcmask 261120   ;;  %s4322_s0 = inlined_call_operand.vmem [shape: f32[8,32], index: 0, kind: input, shape index: {}]   ;;  %s4323_s1 = inlined_call_operand.vmem [shape: f32[32,16], index: 1, kind: input, shape index: {}]   ;;  %s4324_s2 = inlined_call_operand.vmem [shape: f32[3,16], index: 2, kind: input, shape index: {}]   ;;  %s4325_s3 = inlined_call_operand.vmem [shape: f32[24,3,8,16], index: 3, kind: input, shape index: {}]   ;;  %s4326_s4 = inlined_call_operand.hbm [shape: f32[8,16], index: 4, kind: output, shape index: {}]  }
   0x1   :  { %v22_v0 = vld [vmem:[%s4323_s1] sm:$0xff]  ;;  %v23_v1 = vld [vmem:[%s4323_s1 + $0x8] sm:$0xff]  ;;  %v24_v2 = vld [vmem:[%s4323_s1 + $0x10] sm:$0xff]  ;;  %1910 = vmatprep.subr.bf16.mxu0 %v2095_v4  ;;  %1907 = vmatprep.mubr.msk.f32.mxu0 %vm2096_vm0, %v2097_v6  ;;  %s2099_s30 = smov [#allocation2]  }
   0x2   :  { %v25_v3 = vld [vmem:[%s4323_s1 + $0x18] sm:$0xff]  ;;  %v1911_v5 = vpack.c.bf16 %v23_v1, %v22_v0  ;;  %v21_v8 = vld [vmem:[%s4322_s0] sm:$0xff]  ;;  %v1805_v13 = vld [vmem:[%s4325_s3 + $0x30] sm:$0xff]  ;;  %s1786_s5 = sshll.u32 %s2099_s30, 4  ;;  %s1787_s5 = int_to_ptr.vmem [resolvable:$true] %s1786_s5 }
   0x3   :  { %v1914_v7 = vpack.c.bf16 %v25_v3, %v24_v2  ;;  %v145_v9 = vld [vmem:[%s4325_s3] sm:$0xff]  ;;  %v1801_v11 = vld [vmem:[%s4325_s3 + $0x18] sm:$0xff]  ;;  %v1808_v15 = vadd.f32 -0.5, %v1805_v13  ;;  %v1809_v16 = vld [vmem:[%s4325_s3 + $0x48] sm:$0xff]  ;;  %p2076_p1 = scmp.lt.s32.totalorder %s1787_s5, %s1787_s5 }
   0x4   :  { %1912 = vmatpush3.bf16.msra.mxu0 %v1911_v5  ;;  %v1800_v10 = vadd.f32 -0.5, %v145_v9  ;;  %v1804_v12 = vadd.f32 -0.5, %v1801_v11  ;;  %v1812_v18 = vadd.f32 -0.5, %v1809_v16  ;;  %v1813_v33 = vld [vmem:[%s4325_s3 + $0x60] sm:$0xff]  ;;  %v1817_v50 = vld [vmem:[%s4325_s3 + $0x78] sm:$0xff]  ;;  %v1821_v62 = vld [vmem:[%s4325_s3 + $0x90] sm:$0xff] }
   0x5   :  { %1913 = vmatprep.subr.bf16.mxu0 %v2095_v4  ;;  %v284_v20 = vmul.f32 3.1415927, %v1808_v15  ;;  %v1816_v40 = vadd.f32 -0.5, %v1813_v33  ;;  %v1820_v58 = vadd.f32 -0.5, %v1817_v50  ;;  %v1825_v1 = vld [vmem:[%s4325_s3 + $0xa8] sm:$0xff]  ;;  %v1824_v6 = vadd.f32 -0.5, %v1821_v62 }
   0x6   :  { %v151_v14 = vmul.f32 3.1415927, %v1800_v10  ;;  %v216_v17 = vmul.f32 3.1415927, %v1804_v12  ;;  %v2152_v22 = vmul.f32 3.1415927, %v1812_v18 }
   0x7   :  { %v285_v24 = vmul.f32 %v284_v20, %v284_v20  ;;  %v2159_v48 = vmul.f32 3.1415927, %v1816_v40  ;;  %v2175_v4 = vmul.f32 3.1415927, %v1820_v58  ;;  %v2179_v12 = vmul.f32 3.1415927, %v1824_v6 }
   0x8   :  { %1915 = vmatpush3.bf16.msra.mxu0 %v1914_v7  ;;  %v152_v19 = vmul.f32 %v151_v14, %v151_v14  ;;  %v217_v21 = vmul.f32 %v216_v17, %v216_v17  ;;  %v353_v28 = vmul.f32 %v2152_v22, %v2152_v22 }
   0x9   :  { %v286_v27 = vmul.f32 2.7557319e-06, %v285_v24  ;;  %v2166_v57 = vmul.f32 %v2159_v48, %v2159_v48  ;;  %v489_v11 = vmul.f32 %v2175_v4, %v2175_v4 }
   0xa   :  { %v153_v23 = vmul.f32 2.7557319e-06, %v152_v19  ;;  %v218_v25 = vmul.f32 2.7557319e-06, %v217_v21  ;;  %v354_v36 = vmul.f32 2.7557319e-06, %v353_v28 }
   0xb   :  { %1908 = vmatmul.mubr.msk.f32.vlgmr.msra.gmra.mrb[0].mxu0 %vm30_vm1, %v21_v8  ;;  %v287_v31 = vadd.f32 -0.0001984127, %v286_v27  ;;  %v422_v3 = vmul.f32 2.7557319e-06, %v2166_v57  ;;  %v1828_v8 = vadd.f32 -0.5, %v1825_v1  ;;  %vm4328_vm1 = vmmov 1  }
   0xc   :  { %v154_v26 = vadd.f32 -0.0001984127, %v153_v23  ;;  %v219_v29 = vadd.f32 -0.0001984127, %v218_v25  ;;  %v355_v44 = vadd.f32 -0.0001984127, %v354_v36 }
   0xd   :  { %v288_v35 = vmul.f32 %v287_v31, %v285_v24  ;;  %v423_v10 = vadd.f32 -0.0001984127, %v422_v3 }
   0xe   :  { %v155_v30 = vmul.f32 %v154_v26, %v152_v19  ;;  %v220_v32 = vmul.f32 %v219_v29, %v217_v21  ;;  %v356_v53 = vmul.f32 %v355_v44, %v353_v28 }
   0xf   :  { %v289_v39 = vadd.f32 0.008333334, %v288_v35  ;;  %v424_v16 = vmul.f32 %v423_v10, %v2166_v57 }
  0x10   :  { %v156_v34 = vadd.f32 0.008333334, %v155_v30  ;;  %v221_v37 = vadd.f32 0.008333334, %v220_v32  ;;  %v357_v61 = vadd.f32 0.008333334, %v356_v53 }
  0x11   :  { %v290_v43 = vmul.f32 %v289_v39, %v285_v24  ;;  %v425_v27 = vadd.f32 0.008333334, %v424_v16 }
  0x12   :  { %v157_v38 = vmul.f32 %v156_v34, %v152_v19  ;;  %v222_v41 = vmul.f32 %v221_v37, %v217_v21  ;;  %v358_v7 = vmul.f32 %v357_v61, %v353_v28 }
  0x13   :  { %v291_v47 = vadd.f32 -0.16666667, %v290_v43  ;;  %v426_v37 = vmul.f32 %v425_v27, %v2166_v57 }
  0x14   :  { %v158_v42 = vadd.f32 -0.16666667, %v157_v38  ;;  %v223_v45 = vadd.f32 -0.16666667, %v222_v41  ;;  %v359_v13 = vadd.f32 -0.16666667, %v358_v7 }
  0x15   :  { %v292_v52 = vmul.f32 %v291_v47, %v285_v24 }
  0x16   :  { %v159_v46 = vmul.f32 %v158_v42, %v152_v19  ;;  %v224_v49 = vmul.f32 %v223_v45, %v217_v21  ;;  %v557_v19 = vmul.f32 %v2179_v12, %v2179_v12  ;;  %v360_v21 = vmul.f32 %v359_v13, %v353_v28 }
  0x17   :  { %v293_v56 = vadd.f32 1.0, %v292_v52  ;;  %v427_v45 = vadd.f32 -0.16666667, %v426_v37 }
  0x18   :  { %v160_v51 = vadd.f32 1.0, %v159_v46  ;;  %v225_v54 = vadd.f32 1.0, %v224_v49  ;;  %v558_v32 = vmul.f32 2.7557319e-06, %v557_v19  ;;  %v361_v33 = vadd.f32 1.0, %v360_v21 }
  0x19   :  { %v294_v0 = vmul.f32 %v293_v56, %v284_v20 }
  0x1a   :  { %v161_v55 = vmul.f32 %v160_v51, %v151_v14  ;;  %v226_v59 = vmul.f32 %v225_v54, %v216_v17  ;;  %v2181_v14 = vmul.f32 3.1415927, %v1828_v8  ;;  %v490_v17 = vmul.f32 2.7557319e-06, %v489_v11 }
  0x1b   :  { %v295_v9 = vsub.f32 0.0, %v294_v0  ;;  %v559_v39 = vadd.f32 -0.0001984127, %v558_v32  ;;  %v362_v41 = vmul.f32 %v361_v33, %v2152_v22 }
  0x1c   :  { %v162_v60 = vsub.f32 0.0, %v161_v55  ;;  %v227_v63 = vsub.f32 0.0, %v226_v59  ;;  %v625_v23 = vmul.f32 %v2181_v14, %v2181_v14  ;;  %v491_v29 = vadd.f32 -0.0001984127, %v490_v17 }
  0x1d   :  { %v298_v15 = vadd.f32 1.0050125, %v295_v9  ;;  %v296_v28 = vmul.f32 1.0050125, %v295_v9  ;;  %v560_v49 = vmul.f32 %v559_v39, %v557_v19  ;;  %v363_v51 = vsub.f32 0.0, %v362_v41 }
  0x1e   :  { %v165_v2 = vadd.f32 1.0050125, %v162_v60  ;;  %v230_v5 = vadd.f32 1.0050125, %v227_v63  ;;  %v163_v18 = vmul.f32 1.0050125, %v162_v60  ;;  %v492_v38 = vmul.f32 %v491_v29, %v489_v11 }
  0x1f   :  { %v228_v20 = vmul.f32 1.0050125, %v227_v63  ;;  %v626_v34 = vmul.f32 2.7557319e-06, %v625_v23  ;;  %v297_v44 = vadd.f32 1.0, %v296_v28  ;;  %v428_v55 = vmul.f32 %v427_v45, %v2166_v57 }
  0x20   :  { %1921 = vrcp.f32 %v165_v2  ;;  %v164_v24 = vadd.f32 1.0, %v163_v18  ;;  %v493_v46 = vadd.f32 0.008333334, %v492_v38  ;;  %v561_v22 = vadd.f32 0.008333334, %v560_v49 }
  0x21   :  { %1923 = vrcp.f32 %v230_v5  ;;  %v229_v26 = vadd.f32 1.0, %v228_v20  ;;  %v627_v42 = vadd.f32 -0.0001984127, %v626_v34  ;;  %v366_v59 = vadd.f32 1.0050125, %v363_v51 }
  0x22   :  { %1925 = vrcp.f32 %v298_v15  ;;  %v494_v56 = vmul.f32 %v493_v46, %v489_v11  ;;  %v429_v63 = vadd.f32 1.0, %v428_v55  ;;  %v562_v1 = vmul.f32 %v561_v22, %v557_v19 }
  0x23   :  { %v628_v52 = vmul.f32 %v627_v42, %v625_v23  ;;  %1927 = vrcp.f32 %v366_v59  ;;  %v364_v15 = vmul.f32 1.0050125, %v363_v51  ;;  %v1833_v42 = vld [vmem:[%s4325_s3 + $0xd8] sm:$0xff] }
  0x24   :  { %v495_v0 = vadd.f32 -0.16666667, %v494_v56  ;;  %v430_v6 = vmul.f32 %v429_v63, %v2159_v48  ;;  %v563_v8 = vadd.f32 -0.16666667, %v562_v1 }
  0x25   :  { %v629_v60 = vadd.f32 0.008333334, %v628_v52 }
  0x26   :  { %v496_v7 = vmul.f32 %v495_v0, %v489_v11  ;;  %v431_v17 = vsub.f32 0.0, %v430_v6  ;;  %v564_v20 = vmul.f32 %v563_v8, %v557_v19  ;;  %v1829_v19 = vld [vmem:[%s4325_s3 + $0xc0] sm:$0xff] }
  0x27   :  { %v630_v3 = vmul.f32 %v629_v60, %v625_v23  ;;  %v1832_v41 = vadd.f32 -0.5, %v1829_v19 }
  0x28   :  { %v497_v18 = vadd.f32 1.0, %v496_v7  ;;  %v434_v48 = vadd.f32 1.0050125, %v431_v17  ;;  %v432_v51 = vmul.f32 1.0050125, %v431_v17 }
  0x29   :  { %v631_v10 = vadd.f32 -0.16666667, %v630_v3  ;;  %v2247_v22 = vmul.f32 3.1415927, %v1832_v41 }
  0x2a   :  { %v1922_v25 = vpop.eup %1921  ;;  %v498_v11 = vmul.f32 %v497_v18, %v2175_v4  ;;  %1929 = vrcp.f32 %v434_v48  ;;  %v433_v3 = vadd.f32 1.0, %v432_v51 }
  0x2b   :  { %v1924_v30 = vpop.eup %1923  ;;  %v2188_v31 = vmul.f32 %v1922_v25, %v164_v24  ;;  %v632_v24 = vmul.f32 %v631_v10, %v625_v23  ;;  %v1845_v10 = vld [vmem:[%s4325_s3 + $0x120] sm:$0xff]  ;;  %v2268_v17 = vmul.f32 %v2247_v22, %v2247_v22 }
  0x2c   :  { %v2193_v36 = vmul.f32 %v1924_v30, %v229_v26  ;;  %v1926_v47 = vpop.eup %1925  ;;  %v365_v26 = vadd.f32 1.0, %v364_v15  ;;  %v565_v30 = vadd.f32 1.0, %v564_v20  ;;  %v499_v38 = vsub.f32 0.0, %v498_v11 }
  0x2d   :  { %v2191_v35 = vand.u32 2147483647, %v2188_v31  ;;  %v2202_v54 = vmul.f32 %v1926_v47, %v297_v44  ;;  %v1928_v27 = vpop.eup %1927  ;;  %v633_v33 = vadd.f32 1.0, %v632_v24  ;;  %vm204_vm6 = vcmp.lt.f32.partialorder %v2188_v31, 0.0 }
  0x2e   :  { %v2199_v43 = vand.u32 2147483647, %v2193_v36  ;;  %v2218_v37 = vmul.f32 %v1928_v27, %v365_v26  ;;  %v2224_v39 = vmul.f32 %v565_v30, %v2179_v12  ;;  %v502_v49 = vadd.f32 1.0050125, %v499_v38 }
  0x2f   :  { %v180_v40 = vmul.f32 -0.0012624911, %v2191_v35  ;;  %v2207_v62 = vand.u32 2147483647, %v2202_v54  ;;  %v194_v34 = vsub.f32 1.0, %v2191_v35  ;;  %v2280_v27 = vadd.f32 -0.5, %v1845_v10 }
  0x30   :  { %v247_v53 = vmul.f32 -0.0012624911, %v2199_v43  ;;  %v2236_v46 = vand.u32 2147483647, %v2218_v37  ;;  %v261_v47 = vsub.f32 1.0, %v2199_v43  ;;  %v567_v52 = vsub.f32 0.0, %v2224_v39 }
  0x31   :  { %v181_v50 = vadd.f32 0.00667009, %v180_v40  ;;  %v315_v57 = vmul.f32 -0.0012624911, %v2207_v62  ;;  %v2227_v40 = vmul.f32 %v633_v33, %v2181_v14  ;;  %v2232_v44 = vmax.f32 %v194_v34, 0.0  ;;  %v1837_v14 = vld [vmem:[%s4325_s3 + $0xf0] sm:$0xff] }
  0x32   :  { %v248_v61 = vadd.f32 0.00667009, %v247_v53  ;;  %v1836_v53 = vadd.f32 -0.5, %v1833_v42  ;;  %v383_v59 = vmul.f32 -0.0012624911, %v2236_v46  ;;  %v1840_v60 = vadd.f32 -0.5, %v1837_v14 }
  0x33   :  { %v182_v58 = vmul.f32 %v181_v50, %v2191_v35  ;;  %v316_v16 = vadd.f32 0.00667009, %v315_v57  ;;  %v168_v50 = vsub.f32 1.0050125, %v2188_v31  ;;  %v635_v56 = vsub.f32 0.0, %v2227_v40 }
  0x34   :  { %v249_v5 = vmul.f32 %v248_v61, %v2199_v43  ;;  %1931 = vrsqrt.f32 %v2232_v44  ;;  %v1841_v61 = vld [vmem:[%s4325_s3 + $0x108] sm:$0xff]  ;;  %v233_v63 = vsub.f32 1.0050125, %v2193_v36  ;;  %v2255_v0 = vmax.f32 %v261_v47, 0.0  ;;  %v1930_v6 = vpop.eup %1929 }
  0x35   :  { %v183_v2 = vadd.f32 -0.017088126, %v182_v58  ;;  %v317_v29 = vmul.f32 %v316_v16, %v2207_v62  ;;  %1933 = vrcp.f32 %v502_v49  ;;  %v2259_v57 = vmul.f32 3.1415927, %v1836_v53 }
  0x36   :  { %v250_v13 = vadd.f32 -0.017088126, %v249_v5  ;;  %v570_v5 = vadd.f32 1.0050125, %v567_v52  ;;  %v301_v8 = vsub.f32 1.0050125, %v2202_v54  ;;  %1935 = vrsqrt.f32 %v2255_v0 }
  0x37   :  { %v184_v9 = vmul.f32 %v183_v2, %v2191_v35  ;;  %v318_v23 = vadd.f32 -0.017088126, %v317_v29  ;;  %v2257_v2 = vmul.f32 100.0, %v168_v50  ;;  %v384_v15 = vadd.f32 0.00667009, %v383_v59 }
  0x38   :  { %v251_v25 = vmul.f32 %v250_v13, %v2199_v43  ;;  %v638_v16 = vadd.f32 1.0050125, %v635_v56  ;;  %v2270_v18 = vmul.f32 100.0, %v233_v63  ;;  %v2278_v26 = vmul.f32 3.1415927, %v1840_v60 }
  0x39   :  { %v185_v21 = vadd.f32 0.03089188, %v184_v9  ;;  %v319_v12 = vmul.f32 %v318_v23, %v2207_v62  ;;  %v1844_v9 = vadd.f32 -0.5, %v1841_v61  ;;  %v173_v24 = vsub.f32 1.0, %v2257_v2 }
  0x3a   :  { %v252_v28 = vadd.f32 0.03089188, %v251_v25  ;;  %v2276_v25 = vmul.f32 %v1930_v6, %v433_v3  ;;  %v2283_v48 = vmul.f32 100.0, %v301_v8  ;;  %v500_v11 = vmul.f32 1.0050125, %v499_v38 }
  0x3b   :  { %v186_v32 = vmul.f32 %v185_v21, %v2191_v35  ;;  %v320_v1 = vadd.f32 0.03089188, %v319_v12  ;;  %v329_v21 = vsub.f32 1.0, %v2207_v62  ;;  %1937 = vrcp.f32 %v570_v5 }
  0x3c   :  { %v253_v45 = vmul.f32 %v252_v28, %v2199_v43  ;;  %v2288_v33 = vmul.f32 %v2259_v57, %v2259_v57  ;;  %v2290_v34 = vmul.f32 3.1415927, %v1844_v9  ;;  %v238_v28 = vsub.f32 1.0, %v2270_v18 }
  0x3d   :  { %v187_v4 = vadd.f32 -0.050174303, %v186_v32  ;;  %v321_v20 = vmul.f32 %v320_v1, %v2207_v62  ;;  %v385_v32 = vmul.f32 %v384_v15, %v2236_v46  ;;  %v2293_v23 = vmax.f32 %v329_v21, 0.0 }
  0x3e   :  { %v254_v58 = vadd.f32 -0.050174303, %v253_v45  ;;  %v694_v39 = vmul.f32 2.7557319e-06, %v2268_v17  ;;  %v174_v40 = vmul.f32 1.442695, %v173_v24  ;;  %1939 = vrcp.f32 %v638_v16 }
  0x3f   :  { %v188_v55 = vmul.f32 %v187_v4, %v2191_v35  ;;  %v322_v19 = vadd.f32 -0.050174303, %v321_v20  ;;  %v1932_v4 = vpop.eup %1931  ;;  %v369_v38 = vsub.f32 1.0050125, %v2218_v37  ;;  %v2298_v41 = vand.u32 2147483647, %v2276_v25 }
  0x40   :  { %v255_v13 = vmul.f32 %v254_v58, %v2199_v43  ;;  %v1934_v42 = vpop.eup %1933  ;;  %v306_v47 = vsub.f32 1.0, %v2283_v48  ;;  %v501_v12 = vadd.f32 1.0, %v500_v11  ;;  %v568_v49 = vmul.f32 1.0050125, %v567_v52 }
  0x41   :  { %v189_v7 = vadd.f32 0.08897899, %v188_v55  ;;  %v386_v50 = vadd.f32 -0.017088126, %v385_v32  ;;  %v636_v51 = vmul.f32 1.0050125, %v635_v56  ;;  %v2304_v53 = vmul.f32 %v2278_v26, %v2278_v26  ;;  %v1936_v61 = vpop.eup %1935 }
  0x42   :  { %v256_v30 = vadd.f32 0.08897899, %v255_v13  ;;  %v197_v55 = vmul.f32 %v1932_v4, %v2232_v44  ;;  %v239_v58 = vmul.f32 1.442695, %v238_v28  ;;  %v323_v59 = vmul.f32 %v322_v19, %v2207_v62 }
  0x43   :  { %v190_v29 = vmul.f32 %v189_v7, %v2191_v35  ;;  %1941 = vrsqrt.f32 %v2293_v23  ;;  %vm198_vm2 = vcmp.eq.f32.partialorder %v2232_v44, inf  ;;  %v2310_v60 = vmul.f32 100.0, %v369_v38 }
  0x44   :  { %v257_v14 = vmul.f32 %v256_v30, %v2199_v43  ;;  %1943 = vpow2.f32 %v174_v40  ;;  %v451_v52 = vmul.f32 -0.0012624911, %v2298_v41  ;;  %v307_v63 = vmul.f32 1.442695, %v306_v47 }
  0x45   :  { %v191_v45 = vadd.f32 -0.2145988, %v190_v29  ;;  %v2314_v1 = vmul.f32 %v1934_v42, %v501_v12  ;;  %v569_v3 = vadd.f32 1.0, %v568_v49  ;;  %v201_v5 = vand.u32 2147483648, %v2232_v44  ;;  %v1938_v9 = vpop.eup %1937 }
  0x46   :  { %v258_v6 = vadd.f32 -0.2145988, %v257_v14  ;;  %v387_v7 = vmul.f32 %v386_v50, %v2236_v46  ;;  %v397_v8 = vsub.f32 1.0, %v2236_v46  ;;  %v199_v10 = vsel %vm198_vm2, %v2232_v44, %v197_v55 }
  0x47   :  { %v192_v56 = vmul.f32 %v191_v45, %v2191_v35  ;;  %vm200_vm3 = vcmp.eq.f32.partialorder %v2232_v44, 0.0  ;;  %1945 = vpow2.f32 %v239_v58  ;;  %v324_v13 = vadd.f32 0.08897899, %v323_v59 }
  0x48   :  { %v264_v35 = vmul.f32 %v1936_v61, %v2255_v0  ;;  %v374_v15 = vsub.f32 1.0, %v2310_v60  ;;  %v452_v16 = vadd.f32 0.00667009, %v451_v52  ;;  %v762_v20 = vmul.f32 2.7557319e-06, %v2288_v33  ;;  %v1940_v11 = vpop.eup %1939 }
  0x49   :  { %v193_v21 = vadd.f32 1.5707963, %v192_v56  ;;  %vm265_vm4 = vcmp.eq.f32.partialorder %v2255_v0, inf  ;;  %v2326_v24 = vand.u32 2147483647, %v2314_v1  ;;  %v637_v29 = vadd.f32 1.0, %v636_v51 }
  0x4a   :  { %v202_v30 = vsel %vm200_vm3, %v201_v5, %v199_v10  ;;  %v259_v44 = vmul.f32 %v258_v6, %v2199_v43  ;;  %v388_v32 = vadd.f32 0.03089188, %v387_v7  ;;  %v2329_v28 = vmul.f32 %v1938_v9, %v569_v3 }
  0x4b   :  { %v268_v19 = vand.u32 2147483648, %v2255_v0  ;;  %1947 = vpow2.f32 %v307_v63  ;;  %v325_v4 = vmul.f32 %v324_v13, %v2207_v62  ;;  %v2333_v40 = vmax.f32 %v397_v8, 0.0  ;;  %v1798_v13 = vld [vmem:[%s4325_s3 + $0x8] sm:$0xff] }
  0x4c   :  { %v266_v38 = vsel %vm265_vm4, %v2255_v0, %v264_v35  ;;  %vm267_vm5 = vcmp.eq.f32.partialorder %v2255_v0, 0.0  ;;  %v375_v42 = vmul.f32 1.442695, %v374_v15  ;;  %v453_v45 = vmul.f32 %v452_v16, %v2298_v41 }
  0x4d   :  { %v1942_v47 = vpop.eup %1941  ;;  %v170_v43 = vsub.f32 2.0, %v2257_v2  ;;  %v203_v12 = vmul.f32 %v202_v30, %v193_v21  ;;  %v695_v49 = vadd.f32 -0.0001984127, %v694_v39  ;;  %v2341_v14 = vmul.f32 %v2290_v34, %v2290_v34 }
  0x4e   :  { %v1944_v50 = vpop.eup %1943  ;;  %v260_v51 = vadd.f32 1.5707963, %v259_v44  ;;  %v389_v55 = vmul.f32 %v388_v32, %v2236_v46  ;;  %v2344_v58 = vmul.f32 %v1940_v11, %v637_v29  ;;  %v763_v59 = vadd.f32 -0.0001984127, %v762_v20  ;;  %v1802_v20 = vld [vmem:[%s4325_s3 + $0x20] sm:$0xff]  ;;  %v1799_v32 = vld [vmem:[%s4325_s3 + $0x10] sm:$0xff] }
  0x4f   :  { %v235_v0 = vsub.f32 2.0, %v2270_v18  ;;  %v269_v52 = vsel %vm267_vm5, %v268_v19, %v266_v38  ;;  %v326_v61 = vadd.f32 -0.2145988, %v325_v4  ;;  %1949 = vrsqrt.f32 %v2333_v40 }
  0x50   :  { %1951 = vpow2.f32 %v375_v42  ;;  %v454_v56 = vadd.f32 -0.017088126, %v453_v45  ;;  %v519_v39 = vmul.f32 -0.0012624911, %v2326_v24  ;;  %v2350_v63 = vand.u32 2147483647, %v2329_v28 }
  0x51   :  { %v1946_v3 = vpop.eup %1945  ;;  %v171_v5 = vmul.f32 %v170_v43, %v2257_v2  ;;  %v176_v6 = vmul.f32 %v1944_v50, %v2257_v2  ;;  %v205_v7 = vsub.f32 3.1415927, %v203_v12  ;;  %v332_v8 = vmul.f32 %v1942_v47, %v2293_v23  ;;  %v1849_v42 = vld [vmem:[%s4325_s3 + $0x138] sm:$0xff] }
  0x52   :  { %v270_v9 = vmul.f32 %v269_v52, %v260_v51  ;;  %vm333_vm7 = vcmp.eq.f32.partialorder %v2293_v23, inf  ;;  %v390_v10 = vadd.f32 -0.050174303, %v389_v55  ;;  %v236_v35 = vmul.f32 %v235_v0, %v2270_v18 }
  0x53   :  { %v303_v15 = vsub.f32 2.0, %v2283_v48  ;;  %v327_v16 = vmul.f32 %v326_v61, %v2207_v62  ;;  %v2364_v2 = vand.u32 2147483647, %v2344_v58  ;;  %v241_v21 = vmul.f32 %v1946_v3, %v2270_v18  ;;  %v1803_v61 = vld [vmem:[%s4325_s3 + $0x28] sm:$0xff] }
  0x54   :  { %v336_v29 = vand.u32 2147483648, %v2293_v23  ;;  %v520_v11 = vadd.f32 0.00667009, %v519_v39  ;;  %v587_v30 = vmul.f32 -0.0012624911, %v2350_v63  ;;  %v206_v62 = vsel %vm204_vm6, %v205_v7, %v203_v12 }
  0x55   :  { %v1948_v44 = vpop.eup %1947  ;;  %v334_v19 = vsel %vm333_vm7, %v2293_v23, %v332_v8  ;;  %vm335_vm8 = vcmp.eq.f32.partialorder %v2293_v23, 0.0  ;;  %v455_v4 = vmul.f32 %v454_v56, %v2298_v41  ;;  %vm172_vm9 = vcmp.gt.f32.partialorder %v171_v5, %v1798_v13  ;;  %v1806_v23 = vld [vmem:[%s4325_s3 + $0x38] sm:$0xff] }
  0x56   :  { %vm177_vm10 = vcmp.ge.f32.partialorder %v176_v6, %v1798_v13  ;;  %v272_v18 = vsub.f32 3.1415927, %v270_v9  ;;  %v391_v38 = vmul.f32 %v390_v10, %v2236_v46  ;;  %vm237_vm11 = vcmp.gt.f32.partialorder %v236_v35, %v1802_v20 }
  0x57   :  { %vm271_vm12 = vcmp.lt.f32.partialorder %v2193_v36, 0.0  ;;  %v2386_v31 = vmul.f32 %v303_v15, %v2283_v48  ;;  %v328_v45 = vadd.f32 1.5707963, %v327_v16  ;;  %v207_v47 = vmul.f32 %v1799_v32, %v206_v62  ;;  %vm2393_vm14 = vmor %vm172_vm9, %vm177_vm10 }
  0x58   :  { %vm242_vm13 = vcmp.ge.f32.partialorder %v241_v21, %v1802_v20  ;;  %v309_v43 = vmul.f32 %v1948_v44, %v2283_v48  ;;  %v337_v12 = vsel %vm335_vm8, %v336_v29, %v334_v19  ;;  %v696_v36 = vmul.f32 %v695_v49, %v2268_v17  ;;  %vm2420_vm2 = vmxor %vm2393_vm14, %vm4328_vm1 }
  0x59   :  { %v1950_v50 = vpop.eup %1949  ;;  %v764_v55 = vmul.f32 %v763_v59, %v2288_v33  ;;  %v2399_v0 = vadd.f32 -0.5, %v1849_v42  ;;  %v273_v56 = vsel %vm271_vm12, %v272_v18, %v270_v9  ;;  %v392_v48 = vadd.f32 0.08897899, %v391_v38  ;;  %vm2408_vm15 = vmor %vm237_vm11, %vm242_vm13 }
  0x5a   :  { %v1952_v52 = vpop.eup %1951  ;;  %v521_v39 = vmul.f32 %v520_v11, %v2326_v24  ;;  %v655_v3 = vmul.f32 -0.0012624911, %v2364_v2  ;;  %vm305_vm0 = vcmp.gt.f32.partialorder %v2386_v31, %v1806_v23  ;;  %v338_v49 = vmul.f32 %v337_v12, %v328_v45  ;;  %vm245_vm6 = vmand %vm2408_vm15, %vm2420_vm2 }
  0x5b   :  { %v371_v59 = vsub.f32 2.0, %v2310_v60  ;;  %v437_v6 = vsub.f32 1.0050125, %v2276_v25  ;;  %v208_v7 = vsel %vm2393_vm14, %v207_v47, 0.0  ;;  %vm310_vm3 = vcmp.ge.f32.partialorder %v309_v43, %v1806_v23  ;;  %vm276_vm7 = vmor %vm2393_vm14, %vm2408_vm15 }
  0x5c   :  { %v456_v9 = vadd.f32 0.03089188, %v455_v4  ;;  %v588_v10 = vadd.f32 0.00667009, %v587_v30  ;;  %v274_v13 = vmul.f32 %v1803_v61, %v273_v56  ;;  %vm339_vm4 = vcmp.lt.f32.partialorder %v2202_v54, 0.0  ;;  %vm2464_vm8 = vmor %vm305_vm0, %vm310_vm3 }
  0x5d   :  { %v2426_v35 = vmul.f32 %v1952_v52, %v2310_v60  ;;  %v400_v15 = vmul.f32 %v1950_v50, %v2333_v40  ;;  %v393_v16 = vmul.f32 %v392_v48, %v2236_v46  ;;  %vm401_vm5 = vcmp.eq.f32.partialorder %v2333_v40, inf  ;;  %vm2477_vm9 = vmxor %vm276_vm7, %vm4328_vm1 }
  0x5e   :  { %v697_v20 = vadd.f32 0.008333334, %v696_v36  ;;  %v765_v21 = vadd.f32 0.008333334, %v764_v55  ;;  %v340_v29 = vsub.f32 3.1415927, %v338_v49  ;;  %v2436_v11 = vmul.f32 %v371_v59, %v2310_v60  ;;  %vm313_vm11 = vmand %vm2464_vm8, %vm2477_vm9 }
  0x5f   :  { %v830_v30 = vmul.f32 2.7557319e-06, %v2304_v53  ;;  %v898_v44 = vmul.f32 2.7557319e-06, %v2341_v14  ;;  %v457_v32 = vmul.f32 %v456_v9, %v2298_v41  ;;  %v522_v62 = vadd.f32 -0.017088126, %v521_v39 }
  0x60   :  { %v589_v19 = vmul.f32 %v588_v10, %v2350_v63  ;;  %v698_v4 = vmul.f32 %v697_v20, %v2268_v17  ;;  %v656_v18 = vadd.f32 0.00667009, %v655_v3  ;;  %v766_v38 = vmul.f32 %v765_v21, %v2288_v33  ;;  %v1807_v59 = vld [vmem:[%s4325_s3 + $0x40] sm:$0xff] }
  0x61   :  { %v831_v42 = vadd.f32 -0.0001984127, %v830_v30  ;;  %v899_v45 = vadd.f32 -0.0001984127, %v898_v44  ;;  %v275_v47 = vsel %vm245_vm6, %v274_v13, %v208_v7  ;;  %v394_v12 = vadd.f32 -0.2145988, %v393_v16 }
  0x62   :  { %v402_v60 = vsel %vm401_vm5, %v2333_v40, %v400_v15  ;;  %v699_v50 = vadd.f32 -0.16666667, %v698_v4  ;;  %v465_v36 = vsub.f32 1.0, %v2298_v41  ;;  %v767_v55 = vadd.f32 -0.16666667, %v766_v38 }
  0x63   :  { %v832_v52 = vmul.f32 %v831_v42, %v2304_v53  ;;  %v900_v61 = vmul.f32 %v899_v45, %v2341_v14  ;;  %v2454_v56 = vmul.f32 100.0, %v437_v6  ;;  %v458_v48 = vadd.f32 -0.050174303, %v457_v32 }
  0x64   :  { %v523_v39 = vmul.f32 %v522_v62, %v2326_v24  ;;  %v700_v3 = vmul.f32 %v699_v50, %v2268_v17  ;;  %v341_v6 = vsel %vm339_vm4, %v340_v29, %v338_v49  ;;  %v590_v8 = vadd.f32 -0.017088126, %v589_v19 }
  0x65   :  { %v657_v9 = vmul.f32 %v656_v18, %v2364_v2  ;;  %v833_v10 = vadd.f32 0.008333334, %v832_v52  ;;  %v395_v31 = vmul.f32 %v394_v12, %v2236_v46  ;;  %v505_v23 = vsub.f32 1.0050125, %v2314_v1 }
  0x66   :  { %v701_v54 = vadd.f32 1.0, %v700_v3  ;;  %v901_v43 = vadd.f32 0.008333334, %v900_v61  ;;  %v404_v49 = vand.u32 2147483648, %v2333_v40  ;;  %v2484_v13 = vmax.f32 %v465_v36, 0.0 }
  0x67   :  { %v768_v15 = vmul.f32 %v767_v55, %v2288_v33  ;;  %v834_v16 = vmul.f32 %v833_v10, %v2304_v53  ;;  %v342_v20 = vmul.f32 %v1807_v59, %v341_v6  ;;  %vm403_vm10 = vcmp.eq.f32.partialorder %v2333_v40, 0.0 }
  0x68   :  { %v459_v21 = vmul.f32 %v458_v48, %v2298_v41  ;;  %v524_v29 = vadd.f32 0.03089188, %v523_v39  ;;  %v591_v46 = vmul.f32 %v590_v8, %v2350_v63  ;;  %v658_v30 = vadd.f32 -0.017088126, %v657_v9 }
  0x69   :  { %v2496_v44 = vmul.f32 %v701_v54, %v2247_v22  ;;  %v902_v33 = vmul.f32 %v901_v43, %v2341_v14  ;;  %v396_v32 = vadd.f32 1.5707963, %v395_v31  ;;  %v442_v62 = vsub.f32 1.0, %v2454_v56 }
  0x6a   :  { %v2500_v40 = vmul.f32 100.0, %v505_v23  ;;  %v835_v19 = vadd.f32 -0.16666667, %v834_v16  ;;  %v405_v4 = vsel %vm403_vm10, %v404_v49, %v402_v60  ;;  %vm407_vm12 = vcmp.lt.f32.partialorder %v2218_v37, 0.0 }
  0x6b   :  { %v439_v18 = vsub.f32 2.0, %v2454_v56  ;;  %1953 = vrsqrt.f32 %v2484_v13  ;;  %v769_v38 = vadd.f32 1.0, %v768_v15  ;;  %v2505_v42 = vsel %vm313_vm11, %v342_v20, %v275_v47 }
  0x6c   :  { %v460_v22 = vadd.f32 0.08897899, %v459_v21  ;;  %v525_v45 = vmul.f32 %v524_v29, %v2326_v24  ;;  %v533_v12 = vsub.f32 1.0, %v2326_v24  ;;  %v592_v50 = vadd.f32 0.03089188, %v591_v46 }
  0x6d   :  { %v659_v36 = vmul.f32 %v658_v30, %v2364_v2  ;;  %v703_v55 = vsub.f32 0.0, %v2496_v44  ;;  %v903_v60 = vadd.f32 -0.16666667, %v902_v33  ;;  %v406_v52 = vmul.f32 %v405_v4, %v396_v32 }
  0x6e   :  { %v443_v61 = vmul.f32 1.442695, %v442_v62  ;;  %v510_v48 = vsub.f32 1.0, %v2500_v40  ;;  %v836_v39 = vmul.f32 %v835_v19, %v2304_v53  ;;  %v2514_v47 = vmul.f32 %v439_v18, %v2454_v56  ;;  %v1811_v18 = vld [vmem:[%s4325_s3 + $0x58] sm:$0xff] }
  0x6f   :  { %v507_v3 = vsub.f32 2.0, %v2500_v40  ;;  %v573_v59 = vsub.f32 1.0050125, %v2329_v28  ;;  %v2519_v6 = vmul.f32 %v769_v38, %v2259_v57  ;;  %v461_v8 = vmul.f32 %v460_v22, %v2298_v41 }
  0x70   :  { %v526_v9 = vadd.f32 -0.050174303, %v525_v45  ;;  %v2522_v10 = vmax.f32 %v533_v12, 0.0  ;;  %v601_v17 = vsub.f32 1.0, %v2350_v63  ;;  %vm469_vm13 = vcmp.eq.f32.partialorder %v2484_v13, inf }
  0x71   :  { %v593_v53 = vmul.f32 %v592_v50, %v2350_v63  ;;  %v660_v31 = vadd.f32 0.03089188, %v659_v36  ;;  %v706_v23 = vadd.f32 1.0050125, %v703_v55  ;;  %v904_v54 = vmul.f32 %v903_v60, %v2341_v14 }
  0x72   :  { %vm4327_vm0 = vcmask 130048   ;;  %v408_v43 = vsub.f32 3.1415927, %v406_v52  ;;  %1955 = vpow2.f32 %v443_v61  ;;  %v511_v57 = vmul.f32 1.442695, %v510_v48 }
  0x73   :  { %v837_v49 = vadd.f32 1.0, %v836_v39  ;;  %v472_v15 = vand.u32 2147483648, %v2484_v13  ;;  %v2530_v16 = vmul.f32 %v507_v3, %v2500_v40  ;;  %v2532_v20 = vmul.f32 100.0, %v573_v59 }
  0x74   :  { %v771_v21 = vsub.f32 0.0, %v2519_v6  ;;  %v462_v29 = vadd.f32 -0.2145988, %v461_v8  ;;  %vm471_vm2 = vcmp.eq.f32.partialorder %v2484_v13, 0.0  ;;  %v527_v46 = vmul.f32 %v526_v9, %v2326_v24 }
  0x75   :  { %1957 = vrsqrt.f32 %v2522_v10  ;;  %v2538_v14 = vmax.f32 %v601_v17, 0.0  ;;  %v1954_v30 = vpop.eup %1953  ;;  %v594_v44 = vadd.f32 -0.050174303, %v593_v53  ;;  %v661_v33 = vmul.f32 %v660_v31, %v2364_v2 }
  0x76   :  { %1959 = vrcp.f32 %v706_v23  ;;  %v905_v32 = vadd.f32 1.0, %v904_v54  ;;  %v409_v62 = vsel %vm407_vm12, %v408_v43, %v406_v52  ;;  %v2544_v19 = vmul.f32 %v837_v49, %v2278_v26  ;;  %v1794_v26 = vld [vmem:[%s4324_s2] ss:$0 sm:$0xff] }
  0x77   :  { %1961 = vpow2.f32 %v511_v57  ;;  %v2547_v4 = vmul.f32 3.1415927, %v2280_v27  ;;  %v540_v38 = vand.u32 2147483648, %v2522_v10  ;;  %v575_v22 = vsub.f32 2.0, %v2532_v20  ;;  %v2590_v57 = vld [vmem:[%s4325_s3 + $0x50] sm:$0xff] }
  0x78   :  { %v669_v45 = vsub.f32 1.0, %v2364_v2  ;;  %v774_v37 = vadd.f32 1.0050125, %v771_v21  ;;  %v463_v27 = vmul.f32 %v462_v29, %v2298_v41  ;;  %v468_v12 = vmul.f32 %v1954_v30, %v2484_v13 }
  0x79   :  { %v528_v50 = vadd.f32 0.08897899, %v527_v46  ;;  %v578_v36 = vsub.f32 1.0, %v2532_v20  ;;  %v595_v60 = vmul.f32 %v594_v44, %v2350_v63  ;;  %1963 = vrsqrt.f32 %v2538_v14 }
  0x7a   :  { %v662_v52 = vadd.f32 -0.050174303, %v661_v33  ;;  %v2566_v61 = vmul.f32 %v905_v32, %v2290_v34  ;;  %v2568_v39 = vmul.f32 %v1811_v18, %v409_v62  ;;  %v704_v3 = vmul.f32 1.0050125, %v703_v55 }
  0x7b   :  { %v839_v59 = vsub.f32 0.0, %v2544_v19  ;;  %v2573_v41 = vmul.f32 %v2547_v4, %v2547_v4  ;;  %vm537_vm3 = vcmp.eq.f32.partialorder %v2522_v10, inf  ;;  %v641_v17 = vsub.f32 1.0050125, %v2344_v58 }
  0x7c   :  { %v2579_v53 = vmax.f32 %v669_v45, 0.0  ;;  %1965 = vrcp.f32 %v774_v37  ;;  %v1956_v34 = vpop.eup %1955  ;;  %v464_v31 = vadd.f32 1.5707963, %v463_v27  ;;  %v470_v55 = vsel %vm469_vm13, %v2484_v13, %v468_v12 }
  0x7d   :  { %v529_v23 = vmul.f32 %v528_v50, %v2326_v24  ;;  %v579_v54 = vmul.f32 1.442695, %v578_v36  ;;  %v596_v49 = vadd.f32 0.08897899, %v595_v60  ;;  %v663_v29 = vmul.f32 %v662_v52, %v2364_v2 }
  0x7e   :  { %v907_v46 = vsub.f32 0.0, %v2566_v61  ;;  %vm539_vm4 = vcmp.eq.f32.partialorder %v2522_v10, 0.0  ;;  %v705_v33 = vadd.f32 1.0, %v704_v3  ;;  %v842_v32 = vadd.f32 1.0050125, %v839_v59  ;;  %v2622_v3 = vld [vmem:[%s4325_s3 + $0x68] sm:$0xff] }
  0x7f   :  { %v1958_v30 = vpop.eup %1957  ;;  %v966_v62 = vmul.f32 2.7557319e-06, %v2573_v41  ;;  %v2599_v45 = vmul.f32 %v1956_v34, %v2454_v56  ;;  %v473_v37 = vsel %vm471_vm2, %v472_v15, %v470_v55  ;;  %1967 = vrsqrt.f32 %v2579_v53  ;;  %vm2672_vm2 = vmor %vm276_vm7, %vm2464_vm8 }
  0x80   :  { %v1960_v18 = vpop.eup %1959  ;;  %vm373_vm5 = vcmp.gt.f32.partialorder %v2436_v11, %v2590_v57  ;;  %vm378_vm6 = vcmp.ge.f32.partialorder %v2426_v35, %v2590_v57  ;;  %v530_v50 = vadd.f32 -0.2145988, %v529_v23  ;;  %v772_v56 = vmul.f32 1.0050125, %v771_v21  ;;  %vm2705_vm15 = vmxor %vm2672_vm2, %vm4328_vm1 }
  0x81   :  { %v1962_v27 = vpop.eup %1961  ;;  %v2613_v36 = vmul.f32 3.1415927, %v2399_v0  ;;  %v536_v13 = vmul.f32 %v1958_v30, %v2522_v10  ;;  %v597_v15 = vmul.f32 %v596_v49, %v2350_v63  ;;  %v664_v60 = vadd.f32 0.08897899, %v663_v29  ;;  %vm2696_vm14 = vmor %vm373_vm5, %vm378_vm6 }
  0x82   :  { %v910_v52 = vadd.f32 1.0050125, %v907_v46  ;;  %1969 = vrcp.f32 %v842_v32  ;;  %v967_v6 = vadd.f32 -0.0001984127, %v966_v62  ;;  %v2626_v21 = vmul.f32 %v473_v37, %v464_v31  ;;  %vm412_vm8 = vmor %vm2672_vm2, %vm2696_vm14 }
  0x83   :  { %v1964_v0 = vpop.eup %1963  ;;  %1971 = vpow2.f32 %v579_v54  ;;  %vm475_vm9 = vcmp.lt.f32.partialorder %v2276_v25, 0.0  ;;  %v531_v55 = vmul.f32 %v530_v50, %v2326_v24  ;;  %vm605_vm10 = vcmp.eq.f32.partialorder %v2538_v14, inf  ;;  %v2647_v24 = vld [vmem:[%s4325_s3 + $0x80] sm:$0xff]  ;;  %vm381_vm5 = vmand %vm2696_vm14, %vm2705_vm15 }
  0x84   :  { %v773_v23 = vadd.f32 1.0, %v772_v56  ;;  %vm441_vm11 = vcmp.gt.f32.partialorder %v2514_v47, %v2622_v3  ;;  %vm446_vm12 = vcmp.ge.f32.partialorder %v2599_v45, %v2622_v3  ;;  %v665_v54 = vmul.f32 %v664_v60, %v2364_v2  ;;  %v1822_v3 = vld [vmem:[%s4325_s3 + $0x98] sm:$0xff] }
  0x85   :  { %1973 = vrcp.f32 %v910_v52  ;;  %v538_v29 = vsel %vm537_vm3, %v2522_v10, %v536_v13  ;;  %v604_v30 = vmul.f32 %v1964_v0, %v2538_v14  ;;  %vm607_vm13 = vcmp.eq.f32.partialorder %v2538_v14, 0.0  ;;  %vm2742_vm6 = vmor %vm441_vm11, %vm446_vm12 }
  0x86   :  { %v1966_v49 = vpop.eup %1965  ;;  %v608_v32 = vand.u32 2147483648, %v2538_v14  ;;  %v476_v37 = vsub.f32 3.1415927, %v2626_v21  ;;  %v541_v19 = vsel %vm539_vm4, %v540_v38, %v538_v29  ;;  %v666_v52 = vadd.f32 -0.2145988, %v665_v54  ;;  %vm2777_vm12 = vmor %vm412_vm8, %vm2742_vm6 }
  0x87   :  { %v2662_v50 = vmul.f32 %v1966_v49, %v773_v23  ;;  %vm509_vm3 = vcmp.gt.f32.partialorder %v2530_v16, %v2647_v24  ;;  %v606_v51 = vsel %vm605_vm10, %v2538_v14, %v604_v30  ;;  %v908_v7 = vmul.f32 1.0050125, %v907_v46  ;;  %vm2821_vm15 = vmxor %vm2777_vm12, %vm4328_vm1 }
  0x88   :  { %v513_v10 = vmul.f32 %v1962_v27, %v2500_v40  ;;  %v1853_v40 = vld [vmem:[%s4325_s3 + $0x150] sm:$0xff]  ;;  %v609_v23 = vsel %vm607_vm13, %v608_v32, %v606_v51  ;;  %vm673_vm7 = vcmp.eq.f32.partialorder %v2579_v53, inf  ;;  %vm611_vm4 = vcmp.lt.f32.partialorder %v2329_v28, 0.0 }
  0x89   :  { %v1968_v13 = vpop.eup %1967  ;;  %v2711_v57 = vand.u32 2147483647, %v2662_v50  ;;  %v667_v49 = vmul.f32 %v666_v52, %v2364_v2  ;;  %v909_v54 = vadd.f32 1.0, %v908_v7  ;;  %v477_v14 = vsel %vm475_vm9, %v476_v37, %v2626_v21  ;;  %vm2756_vm9 = vmxor %vm412_vm8, %vm4328_vm1 }
  0x8a   :  { %v672_v11 = vmul.f32 %v1968_v13, %v2579_v53  ;;  %v676_v30 = vand.u32 2147483648, %v2579_v53  ;;  %v1856_v32 = vadd.f32 -0.5, %v1853_v40  ;;  %vm675_vm10 = vcmp.eq.f32.partialorder %v2579_v53, 0.0  ;;  %vm449_vm13 = vmand %vm2742_vm6, %vm2756_vm9 }
  0x8b   :  { %v791_v25 = vmul.f32 -0.0012624911, %v2711_v57  ;;  %vm514_vm11 = vcmp.ge.f32.partialorder %v513_v10, %v2647_v24  ;;  %v411_v60 = vsel %vm381_vm5, %v2568_v39, %v2505_v42  ;;  %vm679_vm6 = vcmp.lt.f32.partialorder %v2344_v58, 0.0 }
  0x8c   :  { %v1970_v0 = vpop.eup %1969  ;;  %v2787_v7 = vmul.f32 3.1415927, %v1856_v32  ;;  %vm2812_vm14 = vmor %vm509_vm3, %vm514_vm11  ;;  %vm4360_vm9 = vcmask 130048  }
  0x8d   :  { %v1972_v27 = vpop.eup %1971  ;;  %vm548_vm3 = vmor %vm2777_vm12, %vm2812_vm14 }
  0x8e   :  { %v581_v52 = vmul.f32 %v1972_v27, %v2532_v20  ;;  %v2838_v40 = vmul.f32 %v2787_v7, %v2787_v7 }
  0xde   :  { %v100_v48 = vpop.f32.mrb[0].mxu0 }
  0xdf   :  { %v1909_v8 = vpop.f32.mrb[1].mxu0  ;;  %v2575_v9 = vadd.f32 %v1794_v26, %v100_v48  ;;  %v2603_v26 = vmul.f32 100.0, %v641_v17  ;;  %v2629_v17 = vmul.f32 %v575_v22, %v2532_v20  ;;  %v598_v22 = vadd.f32 -0.2145988, %v597_v15 }
  0xe0   :  { %v2624_v8 = vmul.f32 %v1960_v18, %v705_v33  ;;  %v968_v33 = vmul.f32 %v967_v6, %v2573_v41  ;;  %v840_v18 = vmul.f32 1.0050125, %v839_v59  ;;  %v792_v20 = vadd.f32 0.00667009, %v791_v25 }
  0xe1   :  { %v105_v43 = vsel %vm4327_vm0, %v2575_v9, 0.0  ;;  %v646_v34 = vsub.f32 1.0, %v2603_v26  ;;  %v599_v59 = vmul.f32 %v598_v22, %v2350_v63  ;;  %vm543_vm0 = vcmp.lt.f32.partialorder %v2314_v1, 0.0  ;;  %v1819_v63 = vld [vmem:[%s4325_s3 + $0x88] sm:$0xff] }
  0xe2   :  { %v106_v44 = vrot.slane %v105_v43, 4  ;;  %v643_v38 = vsub.f32 2.0, %v2603_v26  ;;  %v841_v6 = vadd.f32 1.0, %v840_v18  ;;  %vm577_vm2 = vcmp.gt.f32.partialorder %v2629_v17, %v1822_v3  ;;  %v1857_v1 = vld [vmem:[%s4325_s3 + $0x168] sm:$0xff] }
  0xe3   :  { %v647_v62 = vmul.f32 1.442695, %v646_v34 }
  0xe4   :  { %v107_v12 = vadd.f32 %v106_v44, %v105_v43  ;;  %v2637_v43 = vmul.f32 %v2613_v36, %v2613_v36  ;;  %v2654_v44 = vand.u32 2147483647, %v2624_v8  ;;  %v644_v24 = vmul.f32 %v643_v38, %v2603_v26 }
  0xe5   :  { %1975 = vpow2.f32 %v647_v62  ;;  %v674_v62 = vsel %vm673_vm7, %v2579_v53, %v672_v11  ;;  %v793_v38 = vmul.f32 %v792_v20, %v2711_v57  ;;  %vm517_vm7 = vmand %vm2812_vm14, %vm2821_vm15 }
  0xe6   :  { %v108_v48 = vrot.slane %v107_v12, 2  ;;  %v1034_v56 = vmul.f32 2.7557319e-06, %v2637_v43  ;;  %v723_v5 = vmul.f32 -0.0012624911, %v2654_v44  ;;  %v677_v51 = vsel %vm675_vm10, %v676_v30, %v674_v62 }
  0xe7   :  { %v1102_v62 = vmul.f32 2.7557319e-06, %v2838_v40 }
  0xe8   :  { %v109_v31 = vadd.f32 %v108_v48, %v107_v12  ;;  %v532_v12 = vadd.f32 1.5707963, %v531_v55  ;;  %v969_v48 = vadd.f32 0.008333334, %v968_v33  ;;  %v1035_v46 = vadd.f32 -0.0001984127, %v1034_v56 }
  0xe9   :  { %v600_v55 = vadd.f32 1.5707963, %v599_v59  ;;  %v724_v22 = vadd.f32 0.00667009, %v723_v5  ;;  %v2734_v33 = vmul.f32 %v1970_v0, %v841_v6  ;;  %v668_v56 = vadd.f32 1.5707963, %v667_v49 }
  0xea   :  { %v110_v15 = vrot.slane %v109_v31, 1  ;;  %v542_v35 = vmul.f32 %v541_v19, %v532_v12  ;;  %v970_v29 = vmul.f32 %v969_v48, %v2573_v41  ;;  %v1036_v21 = vmul.f32 %v1035_v46, %v2637_v43  ;;  %v1815_v12 = vld [vmem:[%s4325_s3 + $0x70] sm:$0xff] }
  0xeb   :  { %v610_v37 = vmul.f32 %v609_v23, %v600_v55  ;;  %v725_v13 = vmul.f32 %v724_v22, %v2654_v44  ;;  %v2785_v5 = vand.u32 2147483647, %v2734_v33  ;;  %v478_v0 = vmul.f32 %v1815_v12, %v477_v14  ;;  %v1827_v12 = vld [vmem:[%s4325_s3 + $0xb8] sm:$0xff] }
  0xec   :  { %v111_v34 = vadd.f32 %v110_v15, %v109_v31  ;;  %v1974_v31 = vpop.eup %1973  ;;  %v544_v45 = vsub.f32 3.1415927, %v542_v35  ;;  %v971_v19 = vadd.f32 -0.16666667, %v970_v29  ;;  %v1037_v53 = vadd.f32 0.008333334, %v1036_v21 }
  0xed   :  { %v2768_v15 = vmul.f32 %v1974_v31, %v909_v54  ;;  %v612_v61 = vsub.f32 3.1415927, %v610_v37  ;;  %v678_v11 = vmul.f32 %v677_v51, %v668_v56  ;;  %v726_v10 = vadd.f32 -0.017088126, %v725_v13  ;;  %v1861_v54 = vld [vmem:[%s4325_s3 + $0x180] sm:$0xff] }
  0xee   :  { %v113_v18 = vmul.f32 0.125, %v111_v34  ;;  %v545_v39 = vsel %vm543_vm0, %v544_v45, %v542_v35  ;;  %v972_v16 = vmul.f32 %v971_v19, %v2573_v41  ;;  %vm582_vm0 = vcmp.ge.f32.partialorder %v581_v52, %v1822_v3  ;;  %v1826_v41 = vld [vmem:[%s4325_s3 + $0xb0] sm:$0xff]  ;;  %v1823_v29 = vld [vmem:[%s4325_s3 + $0xa0] sm:$0xff] }
  0xef   :  { %v1976_v48 = vpop.eup %1975  ;;  %v2826_v46 = vand.u32 2147483647, %v2768_v15  ;;  %v859_v35 = vmul.f32 -0.0012624911, %v2785_v5  ;;  %v546_v27 = vmul.f32 %v1819_v63, %v545_v39  ;;  %v1038_v55 = vmul.f32 %v1037_v53, %v2637_v43  ;;  %vm2872_vm8 = vmor %vm577_vm2, %vm582_vm0 }
  0xf0   :  { %v2802_v6 = vsub.f32 %v2575_v9, %v113_v18  ;;  %v649_v34 = vmul.f32 %v1976_v48, %v2603_v26  ;;  %v479_v49 = vsel %vm449_vm13, %v478_v0, %v411_v60  ;;  %v613_v26 = vsel %vm611_vm4, %v612_v61, %v610_v37  ;;  %vm2884_vm4 = vmxor %vm548_vm3, %vm4328_vm1 }
  0xf1   :  { %v1860_v22 = vadd.f32 -0.5, %v1857_v1  ;;  %v680_v14 = vsub.f32 3.1415927, %v678_v11  ;;  %v727_v28 = vmul.f32 %v726_v10, %v2654_v44  ;;  %v927_v30 = vmul.f32 -0.0012624911, %v2826_v46  ;;  %vm2898_vm11 = vmor %vm548_vm3, %vm2872_vm8 }
  0xf2   :  { %v115_v23 = vmul.f32 %v2802_v6, %v2802_v6  ;;  %v973_v32 = vadd.f32 1.0, %v972_v16  ;;  %vm645_vm5 = vcmp.gt.f32.partialorder %v644_v24, %v1826_v41  ;;  %v860_v17 = vadd.f32 0.00667009, %v859_v35  ;;  %vm585_vm13 = vmand %vm2872_vm8, %vm2884_vm4 }
  0xf3   :  { %v547_v25 = vsel %vm517_vm7, %v546_v27, %v479_v49  ;;  %vm650_vm10 = vcmp.ge.f32.partialorder %v649_v34, %v1826_v41  ;;  %v794_v21 = vadd.f32 -0.017088126, %v793_v38  ;;  %v1039_v18 = vadd.f32 -0.16666667, %v1038_v55  ;;  %vm2917_vm12 = vmxor %vm2898_vm11, %vm4328_vm1 }
  0xf4   :  { %v116_v47 = vsel %vm4360_vm9, %v115_v23, 0.0  ;;  %v614_v45 = vmul.f32 %v1823_v29, %v613_v26  ;;  %v2902_v58 = vmul.f32 3.1415927, %v1860_v22  ;;  %v1864_v37 = vadd.f32 -0.5, %v1861_v54  ;;  %vm2928_vm2 = vmor %vm645_vm5, %vm650_vm10 }
  0xf5   :  { %v681_v56 = vsel %vm679_vm6, %v680_v14, %v678_v11  ;;  %v728_v13 = vadd.f32 0.03089188, %v727_v28  ;;  %v928_v19 = vadd.f32 0.00667009, %v927_v30  ;;  %v974_v59 = vmul.f32 %v973_v32, %v2547_v4  ;;  %v1865_v4 = vld [vmem:[%s4325_s3 + $0x198] sm:$0xff]  ;;  %vm653_vm14 = vmand %vm2928_vm2, %vm2917_vm12 }
  0xf6   :  { %v709_v52 = vsub.f32 1.0050125, %v2624_v8  ;;  %v861_v51 = vmul.f32 %v860_v17, %v2785_v5  ;;  %v1103_v60 = vadd.f32 -0.0001984127, %v1102_v62  ;;  %v117_v20 = vrot.slane %v116_v47, 4  ;;  %vm684_vm12 = vmor %vm2898_vm11, %vm2928_vm2 }
  0xf7   :  { %v795_v48 = vmul.f32 %v794_v21, %v2711_v57  ;;  %v1040_v0 = vmul.f32 %v1039_v18, %v2637_v43  ;;  %v615_v63 = vsel %vm585_vm13, %v614_v45, %v547_v25  ;;  %v682_v39 = vmul.f32 %v1827_v12, %v681_v56 }
  0xf8   :  { %v737_v61 = vsub.f32 1.0, %v2654_v44  ;;  %v2935_v9 = vmul.f32 %v2902_v58, %v2902_v58  ;;  %v729_v43 = vmul.f32 %v728_v13, %v2654_v44  ;;  %v929_v11 = vmul.f32 %v928_v19, %v2826_v46 }
  0xf9   :  { %v975_v10 = vsub.f32 0.0, %v974_v59  ;;  %v2939_v16 = vmul.f32 3.1415927, %v1864_v37  ;;  %v2941_v1 = vmul.f32 100.0, %v709_v52  ;;  %v862_v24 = vadd.f32 -0.017088126, %v861_v51 }
  0xfa   :  { %v1104_v35 = vmul.f32 %v1103_v60, %v2838_v40  ;;  %v1868_v27 = vadd.f32 -0.5, %v1865_v4  ;;  %v118_v41 = vadd.f32 %v117_v20, %v116_v47  ;;  %v796_v34 = vadd.f32 0.03089188, %v795_v48 }
  0xfb   :  { %v978_v38 = vadd.f32 1.0050125, %v975_v10  ;;  %v1041_v55 = vadd.f32 1.0, %v1040_v0  ;;  %v2948_v23 = vmax.f32 %v737_v61, 0.0  ;;  %v777_v49 = vsub.f32 1.0050125, %v2662_v50 }
  0xfc   :  { %v1170_v26 = vmul.f32 2.7557319e-06, %v2935_v9  ;;  %v730_v22 = vadd.f32 -0.050174303, %v729_v43  ;;  %v930_v54 = vadd.f32 -0.017088126, %v929_v11  ;;  %v2954_v29 = vmul.f32 %v2939_v16, %v2939_v16 }
  0xfd   :  { %1977 = vrcp.f32 %v978_v38  ;;  %v2956_v31 = vsel %vm653_vm14, %v682_v39, %v615_v63  ;;  %v714_v14 = vsub.f32 1.0, %v2941_v1  ;;  %v863_v28 = vmul.f32 %v862_v24, %v2785_v5 }
  0xfe   :  { %v1105_v30 = vadd.f32 0.008333334, %v1104_v35  ;;  %v119_v32 = vrot.slane %v118_v41, 2  ;;  %v797_v2 = vmul.f32 %v796_v34, %v2711_v57  ;;  %v2962_v17 = vmul.f32 %v1041_v55, %v2613_v36 }
  0xff   :  { %v2964_v62 = vmul.f32 3.1415927, %v1868_v27  ;;  %1979 = vrsqrt.f32 %v2948_v23  ;;  %v2967_v25 = vmul.f32 100.0, %v777_v49  ;;  %v805_v21 = vsub.f32 1.0, %v2711_v57 }
 0x100   :  { %v1171_v18 = vadd.f32 -0.0001984127, %v1170_v26  ;;  %v711_v47 = vsub.f32 2.0, %v2941_v1  ;;  %v731_v45 = vmul.f32 %v730_v22, %v2654_v44  ;;  %v931_v37 = vmul.f32 %v930_v54, %v2826_v46 }
 0x101   :  { %v1238_v12 = vmul.f32 2.7557319e-06, %v2954_v29  ;;  %v715_v56 = vmul.f32 1.442695, %v714_v14  ;;  %v864_v36 = vadd.f32 0.03089188, %v863_v28  ;;  %v1106_v19 = vmul.f32 %v1105_v30, %v2838_v40 }
 0x102   :  { %v976_v13 = vmul.f32 1.0050125, %v975_v10  ;;  %v120_v59 = vadd.f32 %v119_v32, %v118_v41  ;;  %v779_v52 = vsub.f32 2.0, %v2967_v25  ;;  %v798_v51 = vadd.f32 -0.050174303, %v797_v2 }
 0x103   :  { %v1043_v60 = vsub.f32 0.0, %v2962_v17  ;;  %v744_v20 = vand.u32 2147483648, %v2948_v23  ;;  %v782_v53 = vsub.f32 1.0, %v2967_v25  ;;  %v2979_v48 = vmax.f32 %v805_v21, 0.0 }
 0x104   :  { %v1172_v0 = vmul.f32 %v1171_v18, %v2935_v9  ;;  %v2983_v4 = vmul.f32 %v711_v47, %v2941_v1  ;;  %v732_v63 = vadd.f32 0.08897899, %v731_v45  ;;  %v932_v39 = vadd.f32 0.03089188, %v931_v37 }
 0x105   :  { %v1239_v61 = vadd.f32 -0.0001984127, %v1238_v12  ;;  %1981 = vpow2.f32 %v715_v56  ;;  %vm741_vm15 = vcmp.eq.f32.partialorder %v2948_v23, inf  ;;  %v865_v43 = vmul.f32 %v864_v36, %v2785_v5 }
 0x106   :  { %v977_v11 = vadd.f32 1.0, %v976_v13  ;;  %v1107_v10 = vadd.f32 -0.16666667, %v1106_v19  ;;  %v121_v35 = vrot.slane %v120_v59, 1  ;;  %v799_v27 = vmul.f32 %v798_v51, %v2711_v57 }
 0x107   :  { %v1978_v24 = vpop.eup %1977  ;;  %v873_v41 = vsub.f32 1.0, %v2785_v5  ;;  %v1046_v34 = vadd.f32 1.0050125, %v1043_v60  ;;  %v783_v38 = vmul.f32 1.442695, %v782_v53  ;;  %1983 = vrsqrt.f32 %v2979_v48 }
 0x108   :  { %v845_v55 = vsub.f32 1.0050125, %v2734_v33  ;;  %v1173_v49 = vadd.f32 0.008333334, %v1172_v0  ;;  %v733_v26 = vmul.f32 %v732_v63, %v2654_v44  ;;  %vm743_vm0 = vcmp.eq.f32.partialorder %v2948_v23, 0.0 }
 0x109   :  { %v2994_v22 = vmul.f32 %v779_v52, %v2967_v25  ;;  %v933_v54 = vmul.f32 %v932_v39, %v2826_v46  ;;  %v1240_v14 = vmul.f32 %v1239_v61, %v2954_v29  ;;  %v1980_v28 = vpop.eup %1979  ;;  %v866_v30 = vadd.f32 -0.050174303, %v865_v43 }
 0x10a   :  { %v941_v32 = vsub.f32 1.0, %v2826_v46  ;;  %v2999_v2 = vmul.f32 %v1978_v24, %v977_v11  ;;  %v1108_v17 = vmul.f32 %v1107_v10, %v2838_v40  ;;  %v122_v21 = vadd.f32 %v121_v35, %v120_v59 }
 0x10b   :  { %v800_v18 = vadd.f32 0.08897899, %v799_v27  ;;  %v3002_v47 = vmax.f32 %v873_v41, 0.0  ;;  %1985 = vrcp.f32 %v1046_v34  ;;  %v812_v45 = vand.u32 2147483648, %v2979_v48 }
 0x10c   :  { %1987 = vpow2.f32 %v783_v38  ;;  %v3005_v37 = vmul.f32 100.0, %v845_v55  ;;  %v1174_v12 = vmul.f32 %v1173_v49, %v2935_v9  ;;  %v734_v56 = vadd.f32 -0.2145988, %v733_v26 }
 0x10d   :  { %v740_v36 = vmul.f32 %v1980_v28, %v2948_v23  ;;  %v934_v13 = vadd.f32 -0.050174303, %v933_v54  ;;  %v1241_v19 = vadd.f32 0.008333334, %v1240_v14  ;;  %vm809_vm3 = vcmp.eq.f32.partialorder %v2979_v48, inf  ;;  %v3041_v14 = vld [vmem:[%s4325_s3 + $0xc8] sm:$0xff] }
 0x10e   :  { %v867_v40 = vmul.f32 %v866_v30, %v2785_v5  ;;  %v3011_v59 = vmax.f32 %v941_v32, 0.0  ;;  %v3014_v52 = vand.u32 2147483647, %v2999_v2  ;;  %v1109_v51 = vadd.f32 1.0, %v1108_v17 }
 0x10f   :  { %v123_v53 = vmul.f32 0.125, %v122_v21  ;;  %v801_v0 = vmul.f32 %v800_v18, %v2711_v57  ;;  %1989 = vrsqrt.f32 %v3002_v47  ;;  %v913_v63 = vsub.f32 1.0050125, %v2768_v15  ;;  %v1982_v39 = vpop.eup %1981 }
 0x110   :  { %v847_v61 = vsub.f32 2.0, %v3005_v37  ;;  %v850_v43 = vsub.f32 1.0, %v3005_v37  ;;  %v1044_v11 = vmul.f32 1.0050125, %v1043_v60  ;;  %v1175_v10 = vadd.f32 -0.16666667, %v1174_v12 }
 0x111   :  { %v735_v24 = vmul.f32 %v734_v56, %v2654_v44  ;;  %v742_v35 = vsel %vm741_vm15, %v2948_v23, %v740_v36  ;;  %vm811_vm7 = vcmp.eq.f32.partialorder %v2979_v48, 0.0  ;;  %v935_v27 = vmul.f32 %v934_v13, %v2826_v46  ;;  %v1984_v34 = vpop.eup %1983 }
 0x112   :  { %v1242_v41 = vmul.f32 %v1241_v19, %v2954_v29  ;;  %v868_v38 = vadd.f32 0.08897899, %v867_v40  ;;  %1991 = vrsqrt.f32 %v3011_v59  ;;  %v995_v55 = vmul.f32 -0.0012624911, %v3014_v52 }
 0x113   :  { %v3031_v60 = vmul.f32 %v1109_v51, %v2787_v7  ;;  %v124_v44 = vadd.f32 0.0001, %v123_v53  ;;  %v3034_v49 = vmul.f32 %v1982_v39, %v2941_v1  ;;  %v802_v26 = vadd.f32 -0.2145988, %v801_v0  ;;  %v3070_v39 = vld [vmem:[%s4325_s3 + $0xe0] sm:$0xff] }
 0x114   :  { %v3036_v54 = vmul.f32 100.0, %v913_v63  ;;  %v745_v28 = vsel %vm743_vm0, %v744_v20, %v742_v35  ;;  %v851_v30 = vmul.f32 1.442695, %v850_v43  ;;  %v1045_v7 = vadd.f32 1.0, %v1044_v11 }
 0x115   :  { %v1176_v32 = vmul.f32 %v1175_v10, %v2935_v9  ;;  %v1986_v17 = vpop.eup %1985  ;;  %v736_v1 = vadd.f32 1.5707963, %v735_v24  ;;  %v808_v21 = vmul.f32 %v1984_v34, %v2979_v48  ;;  %v936_v18 = vadd.f32 0.08897899, %v935_v27 }
 0x116   :  { %v1243_v12 = vadd.f32 -0.16666667, %v1242_v41  ;;  %v1988_v56 = vpop.eup %1987  ;;  %vm747_vm8 = vcmp.lt.f32.partialorder %v2624_v8, 0.0  ;;  %v3051_v36 = vmul.f32 %v847_v61, %v3005_v37  ;;  %v869_v13 = vmul.f32 %v868_v38, %v2785_v5 }
 0x117   :  { %v996_v23 = vadd.f32 0.00667009, %v995_v55  ;;  %v1111_v20 = vsub.f32 0.0, %v3031_v60  ;;  %1993 = vrsqrt.f32 %v124_v44  ;;  %vm713_vm4 = vcmp.gt.f32.partialorder %v2983_v4, %v3041_v14  ;;  %v1838_v4 = vld [vmem:[%s4325_s3 + $0xf8] sm:$0xff] }
 0x118   :  { %v803_v9 = vmul.f32 %v802_v26, %v2711_v57  ;;  %v918_v19 = vsub.f32 1.0, %v3036_v54  ;;  %v3061_v40 = vmul.f32 %v2964_v62, %v2964_v62  ;;  %vm718_vm5 = vcmp.ge.f32.partialorder %v3034_v49, %v3041_v14  ;;  %v1843_v60 = vld [vmem:[%s4325_s3 + $0x118] sm:$0xff] }
 0x119   :  { %1995 = vpow2.f32 %v851_v30  ;;  %v3065_v51 = vmul.f32 %v1986_v17, %v1045_v7  ;;  %v1177_v53 = vadd.f32 1.0, %v1176_v32  ;;  %v1990_v0 = vpop.eup %1989  ;;  %v746_v63 = vmul.f32 %v745_v28, %v736_v1  ;;  %vm3130_vm0 = vmor %vm713_vm4, %vm718_vm5 }
 0x11a   :  { %v810_v57 = vsel %vm809_vm3, %v2979_v48, %v808_v21  ;;  %v937_v61 = vmul.f32 %v936_v18, %v2826_v46  ;;  %v1244_v43 = vmul.f32 %v1243_v12, %v2954_v29  ;;  %v870_v11 = vadd.f32 -0.2145988, %v869_v13  ;;  %vm3175_vm4 = vmor %vm684_vm12, %vm3130_vm0 }
 0x11b   :  { %vm877_vm6 = vcmp.eq.f32.partialorder %v3002_v47, inf  ;;  %v997_v10 = vmul.f32 %v996_v23, %v3014_v52  ;;  %v1114_v24 = vadd.f32 1.0050125, %v1111_v20  ;;  %v3082_v35 = vmul.f32 %v1988_v56, %v2967_v25 }
 0x11c   :  { %v804_v27 = vadd.f32 1.5707963, %v803_v9  ;;  %v919_v41 = vmul.f32 1.442695, %v918_v19  ;;  %v1306_v34 = vmul.f32 2.7557319e-06, %v3061_v40  ;;  %v1992_v38 = vpop.eup %1991  ;;  %vm781_vm10 = vcmp.gt.f32.partialorder %v2994_v22, %v3070_v39 }
 0x11d   :  { %v813_v29 = vsel %vm811_vm7, %v812_v45, %v810_v57  ;;  %v876_v55 = vmul.f32 %v1990_v0, %v3002_v47  ;;  %v3093_v44 = vand.u32 2147483647, %v3065_v51  ;;  %v3096_v25 = vmul.f32 %v1177_v53, %v2902_v58  ;;  %v1831_v9 = vld [vmem:[%s4325_s3 + $0xd0] sm:$0xff]  ;;  %vm3143_vm7 = vmxor %vm684_vm12, %vm4328_vm1 }
 0x11e   :  { %v748_v26 = vsub.f32 3.1415927, %v746_v63  ;;  %vm815_vm9 = vcmp.lt.f32.partialorder %v2662_v50, 0.0  ;;  %vm879_vm13 = vcmp.eq.f32.partialorder %v3002_v47, 0.0  ;;  %v938_v28 = vadd.f32 -0.2145988, %v937_v61  ;;  %vm721_vm5 = vmand %vm3130_vm0, %vm3143_vm7 }
 0x11f   :  { %v1245_v30 = vadd.f32 1.0, %v1244_v43  ;;  %v871_v7 = vmul.f32 %v870_v11, %v2785_v5  ;;  %v880_v48 = vand.u32 2147483648, %v3002_v47  ;;  %v998_v45 = vadd.f32 -0.017088126, %v997_v10  ;;  %v1869_v57 = vld [vmem:[%s4325_s3 + $0x1b0] sm:$0xff] }
 0x120   :  { %1997 = vrcp.f32 %v1114_v24  ;;  %v814_v32 = vmul.f32 %v813_v29, %v804_v27  ;;  %v944_v17 = vmul.f32 %v1992_v38, %v3011_v59  ;;  %v1307_v1 = vadd.f32 -0.0001984127, %v1306_v34  ;;  %v1796_v10 = vld [vmem:[%s4324_s2 + $0x1] ss:$0 sm:$0xff] }
 0x121   :  { %1999 = vpow2.f32 %v919_v41  ;;  %v878_v58 = vsel %vm877_vm6, %v3002_v47, %v876_v55  ;;  %vm945_vm14 = vcmp.eq.f32.partialorder %v3011_v59, inf  ;;  %v1063_v5 = vmul.f32 -0.0012624911, %v3093_v44  ;;  %v1994_v18 = vpop.eup %1993  ;;  %vm3205_vm6 = vmxor %vm3175_vm4, %vm4328_vm1 }
 0x122   :  { %v1179_v21 = vsub.f32 0.0, %v3096_v25  ;;  %v749_v12 = vsel %vm747_vm8, %v748_v26, %v746_v63  ;;  %vm786_vm15 = vcmp.ge.f32.partialorder %v3082_v35, %v3070_v39  ;;  %v939_v56 = vmul.f32 %v938_v28, %v2826_v46 }
 0x123   :  { %v3119_v13 = vmul.f32 %v1245_v30, %v2939_v16  ;;  %v1996_v23 = vpop.eup %1995  ;;  %v872_v19 = vadd.f32 1.5707963, %v871_v7  ;;  %vm947_vm3 = vcmp.eq.f32.partialorder %v3011_v59, 0.0  ;;  %v948_v46 = vand.u32 2147483648, %v3011_v59  ;;  %vm3194_vm11 = vmor %vm781_vm10, %vm786_vm15  ;;  %v1797_v7 = vld [vmem:[%s4324_s2 + $0x2] ss:$0 sm:$0xff] }
 0x124   :  { %v999_v16 = vmul.f32 %v998_v45, %v3014_v52  ;;  %v881_v14 = vsel %vm879_vm13, %v880_v48, %v878_v58  ;;  %vm883_vm8 = vcmp.lt.f32.partialorder %v2734_v33, 0.0  ;;  %v946_v53 = vsel %vm945_vm14, %v3011_v59, %v944_v17  ;;  %v1835_v59 = vld [vmem:[%s4325_s3 + $0xe8] sm:$0xff]  ;;  %vm820_vm13 = vmor %vm3175_vm4, %vm3194_vm11 }
 0x125   :  { %v1112_v0 = vmul.f32 1.0050125, %v1111_v20  ;;  %v1308_v63 = vmul.f32 %v1307_v1, %v3061_v40  ;;  %v126_v61 = vmul.f32 %v1994_v18, %v2802_v6  ;;  %v816_v43 = vsub.f32 3.1415927, %v814_v32  ;;  %vm3270_vm15 = vmxor %vm820_vm13, %vm4328_vm1 }
 0x126   :  { %v1064_v47 = vadd.f32 0.00667009, %v1063_v5  ;;  %v1182_v11 = vadd.f32 1.0050125, %v1179_v21  ;;  %v853_v6 = vmul.f32 %v1996_v23, %v3005_v37  ;;  %v915_v20 = vsub.f32 2.0, %v3036_v54 }
 0x127   :  { %v940_v24 = vadd.f32 1.5707963, %v939_v56  ;;  %v1247_v27 = vsub.f32 0.0, %v3119_v13  ;;  %v750_v3 = vmul.f32 %v1831_v9, %v749_v12  ;;  %v882_v41 = vmul.f32 %v881_v14, %v872_v19 }
 0x128   :  { %v949_v42 = vsel %vm947_vm3, %v948_v46, %v946_v53  ;;  %v1000_v34 = vadd.f32 0.03089188, %v999_v16  ;;  %vm849_vm2 = vcmp.gt.f32.partialorder %v3051_v36, %v1838_v4  ;;  %v1113_v38 = vadd.f32 1.0, %v1112_v0 }
 0x129   :  { %v1309_v29 = vadd.f32 0.008333334, %v1308_v63  ;;  %v1872_v55 = vadd.f32 -0.5, %v1869_v57  ;;  %v131_v28 = vmul.f32 %v1796_v10, %v126_v61  ;;  %v817_v39 = vsel %vm815_vm9, %v816_v43, %v814_v32  ;;  %vm789_vm9 = vmand %vm3194_vm11, %vm3205_vm6 }
 0x12a   :  { %v1998_v26 = vpop.eup %1997  ;;  %v1065_v35 = vmul.f32 %v1064_v47, %v3093_v44  ;;  %2001 = vrcp.f32 %v1182_v11  ;;  %vm854_vm10 = vcmp.ge.f32.partialorder %v853_v6, %v1838_v4  ;;  %v916_v48 = vmul.f32 %v915_v20, %v3036_v54 }
 0x12b   :  { %v2000_v30 = vpop.eup %1999  ;;  %v950_v45 = vmul.f32 %v949_v42, %v940_v24  ;;  %v1250_v17 = vadd.f32 1.0050125, %v1247_v27  ;;  %v751_v50 = vsel %vm721_vm5, %v750_v3, %v2956_v31  ;;  %v884_v32 = vsub.f32 3.1415927, %v882_v41  ;;  %v1842_v31 = vld [vmem:[%s4325_s3 + $0x110] sm:$0xff]  ;;  %vm3249_vm14 = vmor %vm849_vm2, %vm854_vm10 }
 0x12c   :  { %v1001_v1 = vmul.f32 %v1000_v34, %v3014_v52  ;;  %v1009_v58 = vsub.f32 1.0, %v3014_v52  ;;  %v818_v5 = vmul.f32 %v1835_v59, %v817_v39  ;;  %v3230_v18 = vmul.f32 %v1998_v26, %v1113_v38  ;;  %vm3294_vm3 = vmor %vm820_vm13, %vm3249_vm14 }
 0x12d   :  { %v1310_v12 = vmul.f32 %v1309_v29, %v3061_v40  ;;  %v3233_v56 = vmul.f32 3.1415927, %v1872_v55  ;;  %v3235_v23 = vadd.f32 %v1797_v7, %v131_v28  ;;  %v921_v9 = vmul.f32 %v2000_v30, %v3036_v54  ;;  %v1839_v54 = vld [vmem:[%s4325_s3 + $0x100] sm:$0xff]  ;;  %vm3319_vm4 = vmxor %vm3294_vm3, %vm4328_vm1 }
 0x12e   :  { %vm951_vm12 = vcmp.lt.f32.partialorder %v2768_v15, 0.0  ;;  %v1066_v8 = vadd.f32 -0.017088126, %v1065_v35  ;;  %v952_v46 = vsub.f32 3.1415927, %v950_v45  ;;  %2003 = vrcp.f32 %v1250_v17 }
 0x12f   :  { %v981_v16 = vsub.f32 1.0050125, %v2999_v2  ;;  %v1180_v49 = vmul.f32 1.0050125, %v1179_v21  ;;  %v885_v14 = vsel %vm883_vm8, %v884_v32, %v882_v41  ;;  %v1002_v53 = vadd.f32 -0.050174303, %v1001_v1  ;;  %vm857_vm8 = vmand %vm3249_vm14, %vm3270_vm15 }
 0x130   :  { %v3261_v36 = vmax.f32 %v1009_v58, 0.0  ;;  %v1049_v4 = vsub.f32 1.0050125, %v3065_v51  ;;  %vm917_vm0 = vcmp.gt.f32.partialorder %v916_v48, %v1842_v31  ;;  %v3275_v21 = vand.u32 2147483647, %v3230_v18 }
 0x131   :  { %v1311_v33 = vadd.f32 -0.16666667, %v1310_v12  ;;  %v3279_v0 = vmul.f32 %v3233_v56, %v3233_v56  ;;  %v138_v63 = vmin.f32 %v3235_v23, 20.0  ;;  %v819_v57 = vsel %vm789_vm9, %v818_v5, %v751_v50 }
 0x132   :  { %vm922_vm7 = vcmp.ge.f32.partialorder %v921_v9, %v1842_v31  ;;  %v1067_v43 = vmul.f32 %v1066_v8, %v3093_v44  ;;  %v886_v47 = vmul.f32 %v1839_v54, %v885_v14  ;;  %v953_v11 = vsel %vm951_vm12, %v952_v46, %v950_v45 }
 0x133   :  { %v3301_v10 = vmul.f32 100.0, %v981_v16  ;;  %v1181_v6 = vadd.f32 1.0, %v1180_v49  ;;  %v1003_v24 = vmul.f32 %v1002_v53, %v3014_v52  ;;  %2005 = vrsqrt.f32 %v3261_v36  ;;  %vm3328_vm5 = vmor %vm917_vm0, %vm922_vm7 }
 0x134   :  { %v2002_v20 = vpop.eup %2001  ;;  %v3312_v3 = vmul.f32 100.0, %v1049_v4  ;;  %v1248_v15 = vmul.f32 1.0050125, %v1247_v27  ;;  %v1131_v42 = vmul.f32 -0.0012624911, %v3275_v21  ;;  %v1312_v34 = vmul.f32 %v1311_v33, %v3061_v40  ;;  %v1873_v27 = vld [vmem:[%s4325_s3 + $0x1c8] sm:$0xff]  ;;  %vm925_vm11 = vmand %vm3328_vm5, %vm3319_vm4 }
 0x135   :  { %v1374_v37 = vmul.f32 2.7557319e-06, %v3279_v0  ;;  %v139_v38 = vmul.f32 1.442695, %v138_v63  ;;  %v1068_v13 = vadd.f32 0.03089188, %v1067_v43  ;;  %v887_v55 = vsel %vm857_vm8, %v886_v47, %v819_v57  ;;  %vm956_vm15 = vmor %vm3294_vm3, %vm3328_vm5 }
 0x136   :  { %v954_v26 = vmul.f32 %v1843_v60, %v953_v11  ;;  %v986_v28 = vsub.f32 1.0, %v3301_v10  ;;  %v3336_v59 = vmul.f32 %v2002_v20, %v1181_v6  ;;  %v1877_v40 = vld [vmem:[%s4325_s3 + $0x1e0] sm:$0xff]  ;;  %v983_v22 = vsub.f32 2.0, %v3301_v10  ;;  %v1881_v43 = vld [vmem:[%s4325_s3 + $0x1f8] sm:$0xff]  ;;  %vm3509_vm8 = vmxor %vm956_vm15, %vm4328_vm1 }
 0x137   :  { %v1004_v39 = vadd.f32 0.08897899, %v1003_v24  ;;  %v1054_v35 = vsub.f32 1.0, %v3312_v3  ;;  %v1249_v30 = vadd.f32 1.0, %v1248_v15  ;;  %v1132_v48 = vadd.f32 0.00667009, %v1131_v42 }
 0x138   :  { %v2004_v7 = vpop.eup %2003  ;;  %v1313_v45 = vadd.f32 1.0, %v1312_v34  ;;  %v1375_v17 = vadd.f32 -0.0001984127, %v1374_v37  ;;  %v1876_v50 = vadd.f32 -0.5, %v1873_v27  ;;  %2007 = vpow2.f32 %v139_v38 }
 0x139   :  { %v1069_v32 = vmul.f32 %v1068_v13, %v3093_v44  ;;  %v1880_v1 = vadd.f32 -0.5, %v1877_v40  ;;  %v987_v58 = vmul.f32 1.442695, %v986_v28  ;;  %v1077_v5 = vsub.f32 1.0, %v3093_v44 }
 0x13a   :  { %v3350_v12 = vand.u32 2147483647, %v3336_v59  ;;  %v1314_v31 = vmul.f32 %v1313_v45, %v2964_v62  ;;  %v3353_v9 = vsel %vm925_vm11, %v954_v26, %v887_v55  ;;  %v1055_v8 = vmul.f32 1.442695, %v1054_v35 }
 0x13b   :  { %v3355_v19 = vmul.f32 %v2004_v7, %v1249_v30  ;;  %v1376_v46 = vmul.f32 %v1375_v17, %v3279_v0  ;;  %v3359_v16 = vmul.f32 %v983_v22, %v3301_v10  ;;  %v1005_v49 = vmul.f32 %v1004_v39, %v3014_v52 }
 0x13c   :  { %v1133_v54 = vmul.f32 %v1132_v48, %v3275_v21  ;;  %v3363_v14 = vmul.f32 3.1415927, %v1876_v50  ;;  %vm1013_vm2 = vcmp.eq.f32.partialorder %v3261_v36, inf  ;;  %v1070_v62 = vadd.f32 -0.050174303, %v1069_v32 }
 0x13d   :  { %v2006_v53 = vpop.eup %2005  ;;  %v1315_v4 = vsub.f32 0.0, %v1314_v31  ;;  %v3366_v25 = vmul.f32 3.1415927, %v1880_v1  ;;  %2009 = vpow2.f32 %v987_v58  ;;  %v3368_v33 = vmax.f32 %v1077_v5, 0.0 }
 0x13e   :  { %v1199_v63 = vmul.f32 -0.0012624911, %v3350_v12  ;;  %v1377_v57 = vadd.f32 0.008333334, %v1376_v46  ;;  %vm1015_vm6 = vcmp.eq.f32.partialorder %v3261_v36, 0.0  ;;  %v1051_v47 = vsub.f32 2.0, %v3312_v3 }
 0x13f   :  { %2011 = vpow2.f32 %v1055_v8  ;;  %v3377_v11 = vand.u32 2147483647, %v3355_v19  ;;  %v1006_v6 = vadd.f32 -0.2145988, %v1005_v49  ;;  %v1012_v20 = vmul.f32 %v2006_v53, %v3261_v36 }
 0x140   :  { %v1134_v60 = vadd.f32 -0.017088126, %v1133_v54  ;;  %v3382_v24 = vmul.f32 %v3363_v14, %v3363_v14  ;;  %v1071_v15 = vmul.f32 %v1070_v62, %v3093_v44  ;;  %v1318_v41 = vadd.f32 1.0050125, %v1315_v4 }
 0x141   :  { %v3387_v42 = vmul.f32 %v3366_v25, %v3366_v25  ;;  %v1884_v34 = vadd.f32 -0.5, %v1881_v43  ;;  %v1016_v37 = vand.u32 2147483648, %v3261_v36  ;;  %2013 = vrsqrt.f32 %v3368_v33 }
 0x142   :  { %v1200_v38 = vadd.f32 0.00667009, %v1199_v63  ;;  %v1378_v13 = vmul.f32 %v1377_v57, %v3279_v0  ;;  %v2008_v27 = vpop.eup %2007  ;;  %v3393_v55 = vmul.f32 %v1051_v47, %v3312_v3  ;;  %v1117_v26 = vsub.f32 1.0050125, %v3230_v18 }
 0x143   :  { %v1267_v28 = vmul.f32 -0.0012624911, %v3377_v11  ;;  %2015 = vrcp.f32 %v1318_v41  ;;  %v1014_v40 = vsel %vm1013_vm2, %v3261_v36, %v1012_v20  ;;  %v1135_v22 = vmul.f32 %v1134_v60, %v3275_v21 }
 0x144   :  { %v1379_v39 = vadd.f32 -0.16666667, %v1378_v13  ;;  %v1442_v35 = vmul.f32 2.7557319e-06, %v3382_v24  ;;  %v1007_v30 = vmul.f32 %v1006_v6, %v3014_v52  ;;  %v1072_v7 = vadd.f32 0.08897899, %v1071_v15 }
 0x145   :  { %v1510_v48 = vmul.f32 2.7557319e-06, %v3387_v42  ;;  %v3404_v45 = vmul.f32 3.1415927, %v1884_v34  ;;  %v1201_v17 = vmul.f32 %v1200_v38, %v3350_v12  ;;  %v1316_v50 = vmul.f32 1.0050125, %v1315_v4 }
 0x146   :  { %v1380_v32 = vmul.f32 %v1379_v39, %v3279_v0  ;;  %v1443_v1 = vadd.f32 -0.0001984127, %v1442_v35  ;;  %v3408_v58 = vmul.f32 100.0, %v1117_v26  ;;  %v1268_v5 = vadd.f32 0.00667009, %v1267_v28 }
 0x147   :  { %v1511_v31 = vadd.f32 -0.0001984127, %v1510_v48  ;;  %v3412_v8 = vmul.f32 %v3404_v45, %v3404_v45  ;;  %v2010_v52 = vpop.eup %2009  ;;  %v1136_v46 = vadd.f32 0.03089188, %v1135_v22  ;;  %v1145_v49 = vsub.f32 1.0, %v3275_v21 }
 0x148   :  { %v1381_v54 = vadd.f32 1.0, %v1380_v32  ;;  %v1444_v53 = vmul.f32 %v1443_v1, %v3382_v24  ;;  %v1008_v4 = vadd.f32 1.5707963, %v1007_v30  ;;  %v1017_v0 = vsel %vm1015_vm6, %v1016_v37, %v1014_v40 }
 0x149   :  { %v3416_v62 = vpop.eup %2011  ;;  %vm1081_vm10 = vcmp.eq.f32.partialorder %v3368_v33, inf  ;;  %v1512_v63 = vmul.f32 %v1511_v31, %v3387_v42  ;;  %v1578_v57 = vmul.f32 2.7557319e-06, %v3412_v8  ;;  %v1073_v43 = vmul.f32 %v1072_v7, %v3093_v44 }
 0x14a   :  { %v1202_v47 = vadd.f32 -0.017088126, %v1201_v17  ;;  %v1317_v6 = vadd.f32 1.0, %v1316_v50  ;;  %v3425_v20 = vmul.f32 %v1381_v54, %v3233_v56  ;;  %v1269_v60 = vmul.f32 %v1268_v5, %v3377_v11 }
 0x14b   :  { %v1445_v15 = vadd.f32 0.008333334, %v1444_v53  ;;  %v1513_v41 = vadd.f32 0.008333334, %v1512_v63  ;;  %v1579_v34 = vadd.f32 -0.0001984127, %v1578_v57  ;;  %v2014_v36 = vpop.eup %2013  ;;  %v3431_v38 = vmul.f32 %v2010_v52, %v3301_v10 }
 0x14c   :  { %v3428_v37 = vadd.f32 1.0, %v2008_v27  ;;  %vm1019_vm9 = vcmp.lt.f32.partialorder %v2999_v2, 0.0  ;;  %vm1083_vm13 = vcmp.eq.f32.partialorder %v3368_v33, 0.0  ;;  %v1137_v13 = vmul.f32 %v1136_v46, %v3275_v21  ;;  %v3444_v10 = vld [vmem:[%s4325_s3 + $0x128] sm:$0xff] }
 0x14d   :  { %v2016_v26 = vpop.eup %2015  ;;  %v1122_v56 = vsub.f32 1.0, %v3408_v58  ;;  %v3437_v28 = vmax.f32 %v1145_v49, 0.0  ;;  %v1383_v40 = vsub.f32 0.0, %v3425_v20  ;;  %v1446_v22 = vmul.f32 %v1445_v15, %v3382_v24 }
 0x14e   :  { %v1018_v27 = vmul.f32 %v1017_v0, %v1008_v4  ;;  %v1074_v39 = vadd.f32 -0.2145988, %v1073_v43  ;;  %v1203_v35 = vmul.f32 %v1202_v47, %v3350_v12  ;;  %v3447_v30 = vmul.f32 %v2016_v26, %v1317_v6 }
 0x14f   :  { %v1270_v7 = vadd.f32 -0.017088126, %v1269_v60  ;;  %v1447_v48 = vadd.f32 -0.16666667, %v1446_v22  ;;  %v1514_v17 = vmul.f32 %v1513_v41, %v3387_v42  ;;  %v1580_v50 = vmul.f32 %v1579_v34, %v3412_v8 }
 0x150   :  { %v1080_v32 = vmul.f32 %v2014_v36, %v3368_v33  ;;  %v1138_v1 = vadd.f32 -0.050174303, %v1137_v13  ;;  %v3453_v5 = vand.u32 2147483647, %v3447_v30  ;;  %v1386_v31 = vadd.f32 1.0050125, %v1383_v40 }
 0x151   :  { %vm985_vm12 = vcmp.gt.f32.partialorder %v3359_v16, %v3444_v10  ;;  %vm990_vm14 = vcmp.ge.f32.partialorder %v3431_v38, %v3444_v10  ;;  %v1084_v52 = vand.u32 2147483648, %v3368_v33  ;;  %v1119_v46 = vsub.f32 2.0, %v3408_v58  ;;  %v1847_v13 = vld [vmem:[%s4325_s3 + $0x130] sm:$0xff] }
 0x152   :  { %v1123_v49 = vmul.f32 1.442695, %v1122_v56  ;;  %v1020_v54 = vsub.f32 3.1415927, %v1018_v27  ;;  %v1075_v53 = vmul.f32 %v1074_v39, %v3093_v44  ;;  %2017 = vrsqrt.f32 %v3437_v28  ;;  %vm3521_vm4 = vmor %vm985_vm12, %vm990_vm14 }
 0x153   :  { %v1204_v4 = vadd.f32 0.03089188, %v1203_v35  ;;  %v1271_v0 = vmul.f32 %v1270_v7, %v3377_v11  ;;  %v1448_v63 = vmul.f32 %v1447_v48, %v3382_v24  ;;  %v1515_v57 = vadd.f32 -0.16666667, %v1514_v17  ;;  %vm993_vm2 = vmand %vm3521_vm4, %vm3509_vm8 }
 0x154   :  { %v1581_v43 = vadd.f32 0.008333334, %v1580_v50  ;;  %v1082_v47 = vsel %vm1081_vm10, %v3368_v33, %v1080_v32  ;;  %v1139_v6 = vmul.f32 %v1138_v1, %v3275_v21  ;;  %v1335_v20 = vmul.f32 -0.0012624911, %v3453_v5  ;;  %v1885_v50 = vld [vmem:[%s4325_s3 + $0x210] sm:$0xff] }
 0x155   :  { %2019 = vrcp.f32 %v1386_v31  ;;  %v1449_v44 = vadd.f32 1.0, %v1448_v63  ;;  %v1516_v60 = vmul.f32 %v1515_v57, %v3387_v42  ;;  %v1076_v41 = vadd.f32 1.5707963, %v1075_v53 }
 0x156   :  { %2021 = vpow2.f32 %v1123_v49  ;;  %v1582_v15 = vmul.f32 %v1581_v43, %v3412_v8  ;;  %v3473_v24 = vmul.f32 %v1119_v46, %v3408_v58  ;;  %v1152_v34 = vand.u32 2147483648, %v3437_v28 }
 0x157   :  { %v1213_v36 = vsub.f32 1.0, %v3350_v12  ;;  %v1021_v26 = vsel %vm1019_vm9, %v1020_v54, %v1018_v27  ;;  %v1085_v42 = vsel %vm1083_vm13, %v1084_v52, %v1082_v47  ;;  %v1205_v56 = vmul.f32 %v1204_v4, %v3350_v12 }
 0x158   :  { %v1272_v22 = vadd.f32 0.03089188, %v1271_v0  ;;  %v3491_v39 = vmul.f32 %v3416_v62, %v3312_v3  ;;  %v1140_v35 = vadd.f32 0.08897899, %v1139_v6  ;;  %v1185_v7 = vsub.f32 1.0050125, %v3336_v59 }
 0x159   :  { %v1336_v2 = vadd.f32 0.00667009, %v1335_v20  ;;  %vm1149_vm0 = vcmp.eq.f32.partialorder %v3437_v28, inf  ;;  %v1384_v33 = vmul.f32 1.0050125, %v1383_v40  ;;  %v1450_v27 = vmul.f32 %v1449_v44, %v3363_v14 }
 0x15a   :  { %v1517_v48 = vadd.f32 1.0, %v1516_v60  ;;  %v1583_v17 = vadd.f32 -0.16666667, %v1582_v15  ;;  %v1022_v32 = vmul.f32 %v1847_v13, %v1021_v26  ;;  %v1086_v1 = vmul.f32 %v1085_v42, %v1076_v41 }
 0x15b   :  { %vm1087_vm7 = vcmp.lt.f32.partialorder %v3065_v51, 0.0  ;;  %v3500_v3 = vmax.f32 %v1213_v36, 0.0  ;;  %v1281_v62 = vsub.f32 1.0, %v3377_v11  ;;  %v1206_v40 = vadd.f32 -0.050174303, %v1205_v56 }
 0x15c   :  { %v1273_v31 = vmul.f32 %v1272_v22, %v3377_v11  ;;  %v1451_v52 = vsub.f32 0.0, %v1450_v27  ;;  %v1518_v46 = vmul.f32 %v1517_v48, %v3366_v25  ;;  %v2018_v49 = vpop.eup %2017  ;;  %v1141_v53 = vmul.f32 %v1140_v35, %v3275_v21 }
 0x15d   :  { %vm1151_vm11 = vcmp.eq.f32.partialorder %v3437_v28, 0.0  ;;  %v3527_v4 = vmul.f32 100.0, %v1185_v7  ;;  %v1337_v0 = vmul.f32 %v1336_v2, %v3453_v5  ;;  %v1888_v25 = vadd.f32 -0.5, %v1885_v50 }
 0x15e   :  { %v1385_v63 = vadd.f32 1.0, %v1384_v33  ;;  %v1454_v57 = vadd.f32 1.0050125, %v1451_v52  ;;  %v1519_v43 = vsub.f32 0.0, %v1518_v46  ;;  %v1584_v38 = vmul.f32 %v1583_v17, %v3412_v8  ;;  %v1889_v17 = vld [vmem:[%s4325_s3 + $0x228] sm:$0xff] }
 0x15f   :  { %v2020_v47 = vpop.eup %2019  ;;  %v1088_v16 = vsub.f32 3.1415927, %v1086_v1  ;;  %2023 = vrsqrt.f32 %v3500_v3  ;;  %v1253_v10 = vsub.f32 1.0050125, %v3355_v19  ;;  %v3533_v6 = vmax.f32 %v1281_v62, 0.0 }
 0x160   :  { %v2022_v20 = vpop.eup %2021  ;;  %v1207_v44 = vmul.f32 %v1206_v40, %v3350_v12  ;;  %v1274_v60 = vadd.f32 -0.050174303, %v1273_v31  ;;  %2025 = vrcp.f32 %v1454_v57  ;;  %v1522_v15 = vadd.f32 1.0050125, %v1519_v43 }
 0x161   :  { %v1148_v8 = vmul.f32 %v2018_v49, %v3437_v28  ;;  %v1190_v41 = vsub.f32 1.0, %v3527_v4  ;;  %v1338_v36 = vadd.f32 -0.017088126, %v1337_v0  ;;  %v3542_v13 = vmul.f32 3.1415927, %v1888_v25  ;;  %v3582_v0 = vld [vmem:[%s4325_s3 + $0x140] sm:$0xff] }
 0x162   :  { %v1142_v26 = vadd.f32 -0.2145988, %v1141_v53  ;;  %v3544_v42 = vmul.f32 %v2020_v47, %v1385_v63  ;;  %2027 = vrcp.f32 %v1522_v15  ;;  %v1585_v56 = vadd.f32 1.0, %v1584_v38 }
 0x163   :  { %v3547_v22 = vsel %vm993_vm2, %v1022_v32, %v3353_v9  ;;  %v3550_v35 = vmul.f32 %v2022_v20, %v3408_v58  ;;  %v3552_v7 = vmul.f32 100.0, %v1253_v10  ;;  %v1452_v2 = vmul.f32 1.0050125, %v1451_v52 }
 0x164   :  { %v1208_v33 = vadd.f32 0.08897899, %v1207_v44  ;;  %v1275_v27 = vmul.f32 %v1274_v60, %v3377_v11  ;;  %2029 = vrsqrt.f32 %v3533_v6  ;;  %v1586_v48 = vmul.f32 %v1585_v56, %v3404_v45  ;;  %v1851_v45 = vld [vmem:[%s4325_s3 + $0x148] sm:$0xff]  ;;  %v3609_v56 = vld [vmem:[%s4325_s3 + $0x158] sm:$0xff] }
 0x165   :  { %v1150_v9 = vsel %vm1149_vm0, %v3437_v28, %v1148_v8  ;;  %v1187_v58 = vsub.f32 2.0, %v3527_v4  ;;  %v1339_v50 = vmul.f32 %v1338_v36, %v3453_v5  ;;  %v3567_v32 = vmul.f32 %v3542_v13, %v3542_v13 }
 0x166   :  { %v1089_v62 = vsel %vm1087_vm7, %v1088_v16, %v1086_v1  ;;  %v1143_v14 = vmul.f32 %v1142_v26, %v3275_v21  ;;  %v1191_v40 = vmul.f32 1.442695, %v1190_v41  ;;  %v3576_v31 = vand.u32 2147483647, %v3544_v42  ;;  %vm3646_vm7 = vmor %vm956_vm15, %vm3521_vm4 }
 0x167   :  { %v1258_v52 = vsub.f32 1.0, %v3552_v7  ;;  %v1453_v46 = vadd.f32 1.0, %v1452_v2  ;;  %v1520_v49 = vmul.f32 1.0050125, %v1519_v43  ;;  %v1892_v53 = vadd.f32 -0.5, %v1889_v17  ;;  %vm3667_vm3 = vmxor %vm3646_vm7, %vm4328_vm1 }
 0x168   :  { %v1153_v51 = vsel %vm1151_vm11, %v1152_v34, %v1150_v9  ;;  %v1209_v21 = vmul.f32 %v1208_v33, %v3350_v12  ;;  %v1276_v1 = vadd.f32 0.08897899, %v1275_v27  ;;  %v1587_v25 = vsub.f32 0.0, %v1586_v48 }
 0x169   :  { %v2024_v63 = vpop.eup %2023  ;;  %v3589_v57 = vmul.f32 %v1851_v45, %v1089_v62  ;;  %v3592_v43 = vmul.f32 %v1187_v58, %v3527_v4  ;;  %v1340_v38 = vadd.f32 0.03089188, %v1339_v50  ;;  %v1646_v47 = vmul.f32 2.7557319e-06, %v3567_v32 }
 0x16a   :  { %v2026_v16 = vpop.eup %2025  ;;  %v1144_v10 = vadd.f32 1.5707963, %v1143_v14  ;;  %2031 = vpow2.f32 %v1191_v40  ;;  %v1403_v20 = vmul.f32 -0.0012624911, %v3576_v31  ;;  %v1590_v28 = vadd.f32 1.0050125, %v1587_v25 }
 0x16b   :  { %vm1053_vm6 = vcmp.gt.f32.partialorder %v3393_v55, %v3582_v0  ;;  %vm1058_vm10 = vcmp.ge.f32.partialorder %v3491_v39, %v3582_v0  ;;  %v1259_v34 = vmul.f32 1.442695, %v1258_v52  ;;  %v3600_v44 = vmul.f32 %v2026_v16, %v1453_v46 }
 0x16c   :  { %v1521_v60 = vadd.f32 1.0, %v1520_v49  ;;  %v3602_v15 = vmul.f32 3.1415927, %v1892_v53  ;;  %v2028_v8 = vpop.eup %2027  ;;  %v1210_v41 = vadd.f32 -0.2145988, %v1209_v21  ;;  %v1216_v36 = vmul.f32 %v2024_v63, %v3500_v3  ;;  %vm3681_vm5 = vmor %vm1053_vm6, %vm1058_vm10 }
 0x16d   :  { %v1277_v26 = vmul.f32 %v1276_v1, %v3377_v11  ;;  %2033 = vrcp.f32 %v1590_v28  ;;  %vm1217_vm9 = vcmp.eq.f32.partialorder %v3500_v3, inf  ;;  %vm1219_vm13 = vcmp.eq.f32.partialorder %v3500_v3, 0.0  ;;  %vm1061_vm4 = vmand %vm3681_vm5, %vm3667_vm3 }
 0x16e   :  { %v1341_v2 = vmul.f32 %v1340_v38, %v3453_v5  ;;  %v1647_v33 = vadd.f32 -0.0001984127, %v1646_v47  ;;  %v2030_v27 = vpop.eup %2029  ;;  %v1220_v48 = vand.u32 2147483648, %v3500_v3  ;;  %v1349_v17 = vsub.f32 1.0, %v3453_v5  ;;  %vm1092_vm2 = vmor %vm3646_vm7, %vm3681_vm5 }
 0x16f   :  { %v1404_v9 = vadd.f32 0.00667009, %v1403_v20  ;;  %v3617_v58 = vand.u32 2147483647, %v3600_v44  ;;  %v3619_v50 = vmul.f32 %v1153_v51, %v1144_v10  ;;  %2035 = vpow2.f32 %v1259_v34 }
 0x170   :  { %v3621_v45 = vmul.f32 %v2028_v8, %v1521_v60  ;;  %v3625_v62 = vmul.f32 %v3602_v15, %v3602_v15  ;;  %vm1121_vm12 = vcmp.gt.f32.partialorder %v3473_v24, %v3609_v56  ;;  %vm1126_vm14 = vcmp.ge.f32.partialorder %v3550_v35, %v3609_v56  ;;  %v1855_v35 = vld [vmem:[%s4325_s3 + $0x160] sm:$0xff] }
 0x171   :  { %vm1155_vm0 = vcmp.lt.f32.partialorder %v3230_v18, 0.0  ;;  %v1211_v14 = vmul.f32 %v1210_v41, %v3350_v12  ;;  %v1218_v40 = vsel %vm1217_vm9, %v3500_v3, %v1216_v36  ;;  %v1278_v52 = vadd.f32 -0.2145988, %v1277_v26  ;;  %vm3720_vm10 = vmor %vm1121_vm12, %vm1126_vm14 }
 0x172   :  { %v1588_v46 = vmul.f32 1.0050125, %v1587_v25  ;;  %v1284_v49 = vmul.f32 %v2030_v27, %v3533_v6  ;;  %v1321_v53 = vsub.f32 1.0050125, %v3447_v30  ;;  %v1342_v51 = vadd.f32 -0.050174303, %v1341_v2  ;;  %vm3763_vm12 = vmor %vm1092_vm2, %vm3720_vm10 }
 0x173   :  { %v1648_v21 = vmul.f32 %v1647_v33, %v3567_v32  ;;  %vm1285_vm8 = vcmp.eq.f32.partialorder %v3533_v6, inf  ;;  %v3651_v1 = vmax.f32 %v1349_v17, 0.0  ;;  %v1405_v25 = vmul.f32 %v1404_v9, %v3576_v31  ;;  %v1858_v33 = vld [vmem:[%s4325_s3 + $0x170] sm:$0xff] }
 0x174   :  { %v1471_v63 = vmul.f32 -0.0012624911, %v3617_v58  ;;  %vm1287_vm11 = vcmp.eq.f32.partialorder %v3533_v6, 0.0  ;;  %v1288_v54 = vand.u32 2147483648, %v3533_v6  ;;  %v3658_v61 = vand.u32 2147483647, %v3621_v45  ;;  %v2032_v38 = vpop.eup %2031 }
 0x175   :  { %v1714_v29 = vmul.f32 2.7557319e-06, %v3625_v62  ;;  %v1212_v47 = vadd.f32 1.5707963, %v1211_v14  ;;  %v1221_v16 = vsel %vm1219_vm13, %v1220_v48, %v1218_v40  ;;  %v1279_v10 = vmul.f32 %v1278_v52, %v3377_v11  ;;  %vm3740_vm13 = vmxor %vm1092_vm2, %vm4328_vm1 }
 0x176   :  { %v1589_v20 = vadd.f32 1.0, %v1588_v46  ;;  %v1286_v34 = vsel %vm1285_vm8, %v3533_v6, %v1284_v49  ;;  %v3672_v60 = vmul.f32 100.0, %v1321_v53  ;;  %v1343_v8 = vmul.f32 %v1342_v51, %v3453_v5  ;;  %vm1129_vm7 = vmand %vm3720_vm10, %vm3740_vm13 }
 0x177   :  { %v1649_v41 = vadd.f32 0.008333334, %v1648_v21  ;;  %v2034_v36 = vpop.eup %2033  ;;  %v1156_v3 = vsub.f32 3.1415927, %v3619_v50  ;;  %2037 = vrsqrt.f32 %v3651_v1  ;;  %v1406_v26 = vadd.f32 -0.017088126, %v1405_v25 }
 0x178   :  { %v1472_v2 = vadd.f32 0.00667009, %v1471_v63  ;;  %v1193_v27 = vmul.f32 %v2032_v38, %v3527_v4  ;;  %vm1223_vm15 = vcmp.lt.f32.partialorder %v3336_v59, 0.0  ;;  %v1255_v55 = vsub.f32 2.0, %v3552_v7 }
 0x179   :  { %v1539_v39 = vmul.f32 -0.0012624911, %v3658_v61  ;;  %v1715_v0 = vadd.f32 -0.0001984127, %v1714_v29  ;;  %v1222_v48 = vmul.f32 %v1221_v16, %v1212_v47  ;;  %v1280_v17 = vadd.f32 1.5707963, %v1279_v10  ;;  %v2036_v40 = vpop.eup %2035 }
 0x17a   :  { %v1289_v9 = vsel %vm1287_vm11, %v1288_v54, %v1286_v34  ;;  %v3696_v14 = vmul.f32 %v2034_v36, %v1589_v20  ;;  %v1326_v4 = vsub.f32 1.0, %v3672_v60  ;;  %v1344_v52 = vadd.f32 0.08897899, %v1343_v8  ;;  %vm3788_vm11 = vmxor %vm3763_vm12, %vm4328_vm1  ;;  %v1886_v8 = vld [vmem:[%s4325_s3 + $0x218] sm:$0xff] }
 0x17b   :  { %v1540_v46 = vadd.f32 0.00667009, %v1539_v39  ;;  %v1650_v49 = vmul.f32 %v1649_v41, %v3567_v32  ;;  %vm1189_vm6 = vcmp.gt.f32.partialorder %v3592_v43, %v1858_v33  ;;  %v1407_v6 = vmul.f32 %v1406_v26, %v3576_v31  ;;  %v1859_v39 = vld [vmem:[%s4325_s3 + $0x178] sm:$0xff] }
 0x17c   :  { %v1473_v53 = vmul.f32 %v1472_v2, %v3617_v58  ;;  %v3712_v51 = vand.u32 2147483647, %v3696_v14  ;;  %v1157_v25 = vsel %vm1155_vm0, %v1156_v3, %v3619_v50  ;;  %vm1194_vm9 = vcmp.ge.f32.partialorder %v1193_v27, %v1858_v33  ;;  %v1862_v50 = vld [vmem:[%s4325_s3 + $0x188] sm:$0xff] }
 0x17d   :  { %v1256_v63 = vmul.f32 %v1255_v55, %v3552_v7  ;;  %v1716_v54 = vmul.f32 %v1715_v0, %v3625_v62  ;;  %v1224_v29 = vsub.f32 3.1415927, %v1222_v48  ;;  %v1290_v38 = vmul.f32 %v1289_v9, %v1280_v17  ;;  %vm3771_vm14 = vmor %vm1189_vm6, %vm1194_vm9 }
 0x17e   :  { %v1389_v24 = vsub.f32 1.0050125, %v3544_v42  ;;  %v1417_v56 = vsub.f32 1.0, %v3576_v31  ;;  %v1327_v47 = vmul.f32 1.442695, %v1326_v4  ;;  %v1345_v16 = vmul.f32 %v1344_v52, %v3453_v5  ;;  %vm1228_vm3 = vmor %vm3763_vm12, %vm3771_vm14 }
 0x17f   :  { %v1541_v10 = vmul.f32 %v1540_v46, %v3658_v61  ;;  %v1651_v20 = vadd.f32 -0.16666667, %v1650_v49  ;;  %v1091_v34 = vsel %vm1061_vm4, %v3589_v57, %v3547_v22  ;;  %v1408_v41 = vadd.f32 0.03089188, %v1407_v6  ;;  %v1863_v49 = vld [vmem:[%s4325_s3 + $0x190] sm:$0xff]  ;;  %vm3828_vm2 = vmxor %vm1228_vm3, %vm4328_vm1 }
 0x180   :  { %v1474_v36 = vadd.f32 -0.017088126, %v1473_v53  ;;  %v1607_v3 = vmul.f32 -0.0012624911, %v3712_v51  ;;  %v1158_v26 = vmul.f32 %v1855_v35, %v1157_v25  ;;  %v1261_v57 = vmul.f32 %v2036_v40, %v3552_v7 }
 0x181   :  { %vm1291_vm0 = vcmp.lt.f32.partialorder %v3355_v19, 0.0  ;;  %v1717_v12 = vadd.f32 0.008333334, %v1716_v54  ;;  %v2038_v28 = vpop.eup %2037  ;;  %vm1257_vm8 = vcmp.gt.f32.partialorder %v1256_v63, %v1862_v50  ;;  %v1292_v11 = vsub.f32 3.1415927, %v1290_v38 }
 0x182   :  { %v3781_v2 = vmul.f32 100.0, %v1389_v24  ;;  %v3783_v43 = vmax.f32 %v1417_v56, 0.0  ;;  %2039 = vpow2.f32 %v1327_v47  ;;  %v1346_v33 = vadd.f32 -0.2145988, %v1345_v16 }
 0x183   :  { %v1542_v27 = vadd.f32 -0.017088126, %v1541_v10  ;;  %v1608_v55 = vadd.f32 0.00667009, %v1607_v3  ;;  %v1225_v0 = vsel %vm1223_vm15, %v1224_v29, %v1222_v48  ;;  %v1409_v17 = vmul.f32 %v1408_v41, %v3576_v31  ;;  %vm1197_vm15 = vmand %vm3771_vm14, %vm3788_vm11 }
 0x184   :  { %v1475_v9 = vmul.f32 %v1474_v36, %v3617_v58  ;;  %v1652_v40 = vmul.f32 %v1651_v20, %v3567_v32  ;;  %v1159_v4 = vsel %vm1129_vm7, %v1158_v26, %v1091_v34  ;;  %vm1262_vm5 = vcmp.ge.f32.partialorder %v1261_v57, %v1862_v50 }
 0x185   :  { %v1352_v59 = vmul.f32 %v2038_v28, %v3651_v1  ;;  %v1718_v48 = vmul.f32 %v1717_v12, %v3625_v62  ;;  %vm1353_vm4 = vcmp.eq.f32.partialorder %v3651_v1, inf  ;;  %v1394_v32 = vsub.f32 1.0, %v3781_v2  ;;  %vm3837_vm6 = vmor %vm1257_vm8, %vm1262_vm5 }
 0x186   :  { %2041 = vrsqrt.f32 %v3783_v43  ;;  %v1609_v52 = vmul.f32 %v1608_v55, %v3712_v51  ;;  %v1226_v46 = vmul.f32 %v1859_v39, %v1225_v0  ;;  %v1293_v53 = vsel %vm1291_vm0, %v1292_v11, %v1290_v38  ;;  %vm1265_vm9 = vmand %vm3837_vm6, %vm3828_vm2 }
 0x187   :  { %v1347_v21 = vmul.f32 %v1346_v33, %v3453_v5  ;;  %v1543_v25 = vmul.f32 %v1542_v27, %v3658_v61  ;;  %v1356_v35 = vand.u32 2147483648, %v3651_v1  ;;  %v1410_v29 = vadd.f32 -0.050174303, %v1409_v17 }
 0x188   :  { %v1476_v24 = vadd.f32 0.03089188, %v1475_v9  ;;  %v1653_v56 = vadd.f32 1.0, %v1652_v40  ;;  %v1354_v18 = vsel %vm1353_vm4, %v3651_v1, %v1352_v59  ;;  %vm1355_vm10 = vcmp.eq.f32.partialorder %v3651_v1, 0.0 }
 0x189   :  { %v1610_v19 = vadd.f32 -0.017088126, %v1609_v52  ;;  %v1719_v38 = vadd.f32 -0.16666667, %v1718_v48  ;;  %2043 = vlog2.f32 %v3428_v37  ;;  %v1294_v5 = vmul.f32 %v1863_v49, %v1293_v53 }
 0x18a   :  { %v1323_v63 = vsub.f32 2.0, %v3672_v60  ;;  %v1395_v50 = vmul.f32 1.442695, %v1394_v32  ;;  %v1227_v47 = vsel %vm1197_vm15, %v1226_v46, %v1159_v4  ;;  %v1348_v1 = vadd.f32 1.5707963, %v1347_v21 }
 0x18b   :  { %v1457_v16 = vsub.f32 1.0050125, %v3600_v44  ;;  %v1544_v10 = vadd.f32 0.03089188, %v1543_v25  ;;  %v1357_v37 = vsel %vm1355_vm10, %v1356_v35, %v1354_v18  ;;  %v1411_v20 = vmul.f32 %v1410_v29, %v3576_v31 }
 0x18c   :  { %v1477_v34 = vmul.f32 %v1476_v24, %v3617_v58  ;;  %v1654_v41 = vmul.f32 %v1653_v56, %v3542_v13  ;;  %v2040_v36 = vpop.eup %2039  ;;  %vm1359_vm13 = vcmp.lt.f32.partialorder %v3447_v30, 0.0  ;;  %v1391_v3 = vsub.f32 2.0, %v3781_v2 }
 0x18d   :  { %v1485_v26 = vsub.f32 1.0, %v3617_v58  ;;  %v1611_v57 = vmul.f32 %v1610_v19, %v3712_v51  ;;  %v1720_v12 = vmul.f32 %v1719_v38, %v3625_v62  ;;  %v3864_v28 = vsel %vm1265_vm9, %v1294_v5, %v1227_v47 }
 0x18e   :  { %v3867_v11 = vmul.f32 %v1323_v63, %v3672_v60  ;;  %2045 = vpow2.f32 %v1395_v50  ;;  %v1655_v7 = vsub.f32 0.0, %v1654_v41  ;;  %v1358_v33 = vmul.f32 %v1357_v37, %v1348_v1  ;;  %v1867_v1 = vld [vmem:[%s4325_s3 + $0x1a8] sm:$0xff] }
 0x18f   :  { %v3869_v13 = vmul.f32 100.0, %v1457_v16  ;;  %v1545_v27 = vmul.f32 %v1544_v10, %v3658_v61  ;;  %v1721_v55 = vadd.f32 1.0, %v1720_v12  ;;  %v3873_v0 = vmul.f32 %v2040_v36, %v3672_v60 }
 0x190   :  { %v2042_v39 = vpop.eup %2041  ;;  %v1412_v17 = vadd.f32 0.08897899, %v1411_v20  ;;  %v1478_v9 = vadd.f32 -0.050174303, %v1477_v34  ;;  %v1658_v62 = vadd.f32 1.0050125, %v1655_v7  ;;  %v3876_v40 = vmul.f32 %v1391_v3, %v3781_v2 }
 0x191   :  { %v3878_v4 = vmax.f32 %v1485_v26, 0.0  ;;  %v1612_v59 = vadd.f32 0.03089188, %v1611_v57  ;;  %v1722_v48 = vmul.f32 %v1721_v55, %v3602_v15  ;;  %vm1421_vm0 = vcmp.eq.f32.partialorder %v3783_v43, inf }
 0x192   :  { %v1525_v32 = vsub.f32 1.0050125, %v3621_v45  ;;  %v1553_v52 = vsub.f32 1.0, %v3658_v61  ;;  %2047 = vrcp.f32 %v1658_v62  ;;  %v1360_v60 = vsub.f32 3.1415927, %v1358_v33 }
 0x193   :  { %v1420_v46 = vmul.f32 %v2042_v39, %v3783_v43  ;;  %v1546_v49 = vadd.f32 -0.050174303, %v1545_v27  ;;  %v1723_v6 = vsub.f32 0.0, %v1722_v48  ;;  %v3885_v53 = vpop.eup %2043  ;;  %v1413_v21 = vmul.f32 %v1412_v17, %v3576_v31  ;;  %v3927_v39 = vld [vmem:[%s4325_s3 + $0x1a0] sm:$0xff] }
 0x194   :  { %v1462_v25 = vsub.f32 1.0, %v3869_v13  ;;  %v1479_v15 = vmul.f32 %v1478_v9, %v3617_v58  ;;  %v1593_v35 = vsub.f32 1.0050125, %v3696_v14  ;;  %2049 = vrsqrt.f32 %v3878_v4 }
 0x195   :  { %v1613_v29 = vmul.f32 %v1612_v59, %v3712_v51  ;;  %v1656_v24 = vmul.f32 1.0050125, %v1655_v7  ;;  %v1726_v56 = vadd.f32 1.0050125, %v1723_v6  ;;  %vm1423_vm7 = vcmp.eq.f32.partialorder %v3783_v43, 0.0 }
 0x196   :  { %v3894_v18 = vmul.f32 100.0, %v1525_v32  ;;  %v3896_v19 = vmax.f32 %v1553_v52, 0.0  ;;  %v1621_v38 = vsub.f32 1.0, %v3712_v51  ;;  %v1424_v5 = vand.u32 2147483648, %v3783_v43 }
 0x197   :  { %v1459_v63 = vsub.f32 2.0, %v3869_v13  ;;  %v1547_v50 = vmul.f32 %v1546_v49, %v3658_v61  ;;  %2051 = vrcp.f32 %v1726_v56  ;;  %v1361_v16 = vsel %vm1359_vm13, %v1360_v60, %v1358_v33 }
 0x198   :  { %v2046_v47 = vpop.eup %2045  ;;  %v1463_v10 = vmul.f32 1.442695, %v1462_v25  ;;  %v1480_v37 = vadd.f32 0.08897899, %v1479_v15  ;;  %v3907_v20 = vmul.f32 100.0, %v1593_v35  ;;  %v1422_v41 = vsel %vm1421_vm0, %v3783_v43, %v1420_v46  ;;  %vm4009_vm0 = vmor %vm1228_vm3, %vm3837_vm6 }
 0x199   :  { %v1414_v34 = vadd.f32 -0.2145988, %v1413_v21  ;;  %v1614_v36 = vadd.f32 -0.050174303, %v1613_v29  ;;  %v1657_v3 = vadd.f32 1.0, %v1656_v24  ;;  %v1530_v26 = vsub.f32 1.0, %v3894_v18 }
 0x19a   :  { %2053 = vrsqrt.f32 %v3896_v19  ;;  %v3914_v57 = vmax.f32 %v1621_v38, 0.0  ;;  %v1724_v12 = vmul.f32 1.0050125, %v1723_v6  ;;  %v3916_v30 = vmul.f32 %v1867_v1, %v1361_v16 }
 0x19b   :  { %v3919_v7 = vmul.f32 %v2046_v47, %v3781_v2  ;;  %v3922_v33 = vmul.f32 %v1459_v63, %v3869_v13  ;;  %v1548_v27 = vadd.f32 0.08897899, %v1547_v50  ;;  %v1425_v17 = vsel %vm1423_vm7, %v1424_v5, %v1422_v41 }
 0x19c   :  { %v2048_v55 = vpop.eup %2047  ;;  %v1481_v9 = vmul.f32 %v1480_v37, %v3617_v58  ;;  %v1527_v62 = vsub.f32 2.0, %v3894_v18  ;;  %v1598_v2 = vsub.f32 1.0, %v3907_v20  ;;  %2055 = vpow2.f32 %v1463_v10 }
 0x19d   :  { %vm1489_vm8 = vcmp.eq.f32.partialorder %v3878_v4, inf  ;;  %v1615_v59 = vmul.f32 %v1614_v36, %v3712_v51  ;;  %v3936_v48 = vmul.f32 %v2048_v55, %v1657_v3  ;;  %v1415_v32 = vmul.f32 %v1414_v34, %v3576_v31  ;;  %v3953_v31 = vld [vmem:[%s4325_s3 + $0x1b8] sm:$0xff]  ;;  %v3975_v34 = vld [vmem:[%s4325_s3 + $0x1d0] sm:$0xff] }
 0x19e   :  { %v1531_v52 = vmul.f32 1.442695, %v1530_v26  ;;  %2057 = vrsqrt.f32 %v3914_v57  ;;  %v1725_v43 = vadd.f32 1.0, %v1724_v12  ;;  %v2050_v60 = vpop.eup %2049  ;;  %vm1325_vm11 = vcmp.gt.f32.partialorder %v3867_v11, %v3927_v39 }
 0x19f   :  { %vm1330_vm5 = vcmp.ge.f32.partialorder %v3873_v0, %v3927_v39  ;;  %vm1491_vm15 = vcmp.eq.f32.partialorder %v3878_v4, 0.0  ;;  %v1549_v46 = vmul.f32 %v1548_v27, %v3658_v61  ;;  %v1661_v49 = vsub.f32 1.0050125, %v3936_v48 }
 0x1a0   :  { %v3948_v6 = vand.u32 2147483647, %v3936_v48  ;;  %v1482_v21 = vadd.f32 -0.2145988, %v1481_v9  ;;  %v1492_v25 = vand.u32 2147483648, %v3878_v4  ;;  %v3957_v15 = vmul.f32 %v1527_v62, %v3894_v18  ;;  %vm4024_vm12 = vmor %vm1325_vm11, %vm1330_vm5 }
 0x1a1   :  { %v1599_v35 = vmul.f32 1.442695, %v1598_v2  ;;  %v2052_v29 = vpop.eup %2051  ;;  %v1616_v24 = vadd.f32 0.08897899, %v1615_v59  ;;  %v3959_v56 = vmul.f32 100.0, %v1661_v49  ;;  %v1488_v50 = vmul.f32 %v2050_v60, %v3878_v4  ;;  %vm1364_vm6 = vmor %vm4009_vm0, %vm4024_vm12 }
 0x1a2   :  { %v1675_v38 = vmul.f32 -0.0012624911, %v3948_v6  ;;  %v1689_v5 = vsub.f32 1.0, %v3948_v6  ;;  %v1416_v63 = vadd.f32 1.5707963, %v1415_v32  ;;  %2059 = vpow2.f32 %v1531_v52 }
 0x1a3   :  { %v3964_v47 = vmul.f32 %v2052_v29, %v1725_v43  ;;  %vm1393_vm4 = vcmp.gt.f32.partialorder %v3876_v40, %v3953_v31  ;;  %vm1398_vm2 = vcmp.ge.f32.partialorder %v3919_v7, %v3953_v31  ;;  %v1550_v1 = vadd.f32 -0.2145988, %v1549_v46 }
 0x1a4   :  { %vm1557_vm10 = vcmp.eq.f32.partialorder %v3896_v19, inf  ;;  %v1666_v16 = vsub.f32 1.0, %v3959_v56  ;;  %v1676_v10 = vadd.f32 0.00667009, %v1675_v38  ;;  %v2054_v37 = vpop.eup %2053  ;;  %v1483_v41 = vmul.f32 %v1482_v21, %v3617_v58 }
 0x1a5   :  { %v3978_v36 = vmax.f32 %v1689_v5, 0.0  ;;  %v1729_v3 = vsub.f32 1.0050125, %v3964_v47  ;;  %v3982_v26 = vand.u32 2147483647, %v3964_v47  ;;  %vm1559_vm9 = vcmp.eq.f32.partialorder %v3896_v19, 0.0 }
 0x1a6   :  { %2061 = vpow2.f32 %v1599_v35  ;;  %v1617_v12 = vmul.f32 %v1616_v24, %v3712_v51  ;;  %v1677_v27 = vmul.f32 %v1676_v10, %v3948_v6  ;;  %v3987_v55 = vmul.f32 %v1425_v17, %v1416_v63  ;;  %v2056_v62 = vpop.eup %2055 }
 0x1a7   :  { %v1490_v58 = vsel %vm1489_vm8, %v3878_v4, %v1488_v50  ;;  %v1667_v9 = vmul.f32 1.442695, %v1666_v16  ;;  %2063 = vrsqrt.f32 %v3978_v36  ;;  %vm1461_vm13 = vcmp.gt.f32.partialorder %v3922_v33, %v3975_v34  ;;  %vm4052_vm8 = vmor %vm1393_vm4, %vm1398_vm2 }
 0x1a8   :  { %v1556_v2 = vmul.f32 %v2054_v37, %v3896_v19  ;;  %v1560_v59 = vand.u32 2147483648, %v3896_v19  ;;  %v1678_v32 = vadd.f32 -0.017088126, %v1677_v27  ;;  %v3997_v52 = vmul.f32 100.0, %v1729_v3  ;;  %v2058_v17 = vpop.eup %2057  ;;  %vm4079_vm2 = vmxor %vm1364_vm6, %vm4328_vm1 }
 0x1a9   :  { %v1484_v43 = vadd.f32 1.5707963, %v1483_v41  ;;  %v1551_v60 = vmul.f32 %v1550_v1, %v3658_v61  ;;  %v1743_v46 = vmul.f32 -0.0012624911, %v3982_v26  ;;  %v1757_v49 = vsub.f32 1.0, %v3982_v26 }
 0x1aa   :  { %vm1427_vm7 = vcmp.lt.f32.partialorder %v3544_v42, 0.0  ;;  %v1493_v61 = vsel %vm1491_vm15, %v1492_v25, %v1490_v58  ;;  %v1618_v35 = vadd.f32 -0.2145988, %v1617_v12  ;;  %v1679_v29 = vmul.f32 %v1678_v32, %v3948_v6  ;;  %vm4064_vm15 = vmxor %vm4009_vm0, %vm4328_vm1 }
 0x1ab   :  { %v1734_v24 = vsub.f32 1.0, %v3997_v52  ;;  %v1465_v22 = vmul.f32 %v2056_v62, %v3869_v13  ;;  %vm1495_vm14 = vcmp.lt.f32.partialorder %v3600_v44, 0.0  ;;  %2065 = vpow2.f32 %v1667_v9  ;;  %v1878_v9 = vld [vmem:[%s4325_s3 + $0x1e8] sm:$0xff]  ;;  %vm1333_vm0 = vmand %vm4024_vm12, %vm4064_vm15 }
 0x1ac   :  { %v1744_v54 = vadd.f32 0.00667009, %v1743_v46  ;;  %v4030_v4 = vmax.f32 %v1757_v49, 0.0  ;;  %v1558_v25 = vsel %vm1557_vm10, %v3896_v19, %v1556_v2  ;;  %v1595_v0 = vsub.f32 2.0, %v3907_v20  ;;  %v2060_v38 = vpop.eup %2059  ;;  %vm4096_vm10 = vmor %vm1364_vm6, %vm4052_vm8 }
 0x1ad   :  { %v1624_v11 = vmul.f32 %v2058_v17, %v3914_v57  ;;  %v1680_v39 = vadd.f32 0.03089188, %v1679_v29  ;;  %v1494_v5 = vmul.f32 %v1493_v61, %v1484_v43  ;;  %v1552_v63 = vadd.f32 1.5707963, %v1551_v60  ;;  %v1882_v17 = vld [vmem:[%s4325_s3 + $0x200] sm:$0xff] }
 0x1ae   :  { %vm1625_vm3 = vcmp.eq.f32.partialorder %v3914_v57, inf  ;;  %v1745_v13 = vmul.f32 %v1744_v54, %v3982_v26  ;;  %v1619_v50 = vmul.f32 %v1618_v35, %v3712_v51  ;;  %v1735_v16 = vmul.f32 1.442695, %v1734_v24  ;;  %v1871_v24 = vld [vmem:[%s4325_s3 + $0x1c0] sm:$0xff] }
 0x1af   :  { %v1681_v1 = vmul.f32 %v1680_v39, %v3948_v6  ;;  %2067 = vrsqrt.f32 %v4030_v4  ;;  %vm1466_vm11 = vcmp.ge.f32.partialorder %v1465_v22, %v3975_v34  ;;  %v1561_v51 = vsel %vm1559_vm9, %v1560_v59, %v1558_v25 }
 0x1b0   :  { %vm1563_vm5 = vcmp.lt.f32.partialorder %v3621_v45, 0.0  ;;  %v1628_v37 = vand.u32 2147483648, %v3914_v57  ;;  %v1746_v41 = vadd.f32 -0.017088126, %v1745_v13  ;;  %v2062_v3 = vpop.eup %2061  ;;  %v1533_v7 = vmul.f32 %v2060_v38, %v3894_v18  ;;  %vm4109_vm9 = vmor %vm1461_vm13, %vm1466_vm11  ;;  %v1875_v38 = vld [vmem:[%s4325_s3 + $0x1d8] sm:$0xff] }
 0x1b1   :  { %v1626_v19 = vsel %vm1625_vm3, %v3914_v57, %v1624_v11  ;;  %vm1627_vm4 = vcmp.eq.f32.partialorder %v3914_v57, 0.0  ;;  %v1682_v31 = vadd.f32 -0.050174303, %v1681_v1  ;;  %v2064_v12 = vpop.eup %2063  ;;  %v1428_v18 = vsub.f32 3.1415927, %v3987_v55  ;;  %vm1500_vm13 = vmor %vm4096_vm10, %vm4109_vm9 }
 0x1b2   :  { %v1496_v58 = vsub.f32 3.1415927, %v1494_v5  ;;  %v1596_v62 = vmul.f32 %v1595_v0, %v3907_v20  ;;  %v1747_v2 = vmul.f32 %v1746_v41, %v3982_v26  ;;  %v1562_v32 = vmul.f32 %v1561_v51, %v1552_v63 }
 0x1b3   :  { %v1620_v43 = vadd.f32 1.5707963, %v1619_v50  ;;  %v1683_v60 = vmul.f32 %v1682_v31, %v3948_v6  ;;  %2069 = vpow2.f32 %v1735_v16  ;;  %v1601_v49 = vmul.f32 %v2062_v3, %v3907_v20 }
 0x1b4   :  { %v1629_v21 = vsel %vm1627_vm4, %v1628_v37, %v1626_v19  ;;  %v1663_v61 = vsub.f32 2.0, %v3959_v56  ;;  %v1748_v35 = vadd.f32 0.03089188, %v1747_v2  ;;  %vm1529_vm3 = vcmp.gt.f32.partialorder %v3957_v15, %v1878_v9  ;;  %v1883_v2 = vld [vmem:[%s4325_s3 + $0x208] sm:$0xff] }
 0x1b5   :  { %vm1534_vm6 = vcmp.ge.f32.partialorder %v1533_v7, %v1878_v9  ;;  %v1684_v33 = vadd.f32 0.08897899, %v1683_v60  ;;  %v1692_v34 = vmul.f32 %v2064_v12, %v3978_v36  ;;  %v2066_v29 = vpop.eup %2065  ;;  %v1429_v20 = vsel %vm1427_vm7, %v1428_v18, %v3987_v55 }
 0x1b6   :  { %vm1693_vm4 = vcmp.eq.f32.partialorder %v3978_v36, inf  ;;  %v1749_v57 = vmul.f32 %v1748_v35, %v3982_v26  ;;  %v1497_v22 = vsel %vm1495_vm14, %v1496_v58, %v1494_v5  ;;  %v1564_v54 = vsub.f32 3.1415927, %v1562_v32  ;;  %vm4145_vm7 = vmor %vm1529_vm3, %vm1534_vm6 }
 0x1b7   :  { %v1630_v42 = vmul.f32 %v1629_v21, %v1620_v43  ;;  %v1685_v55 = vmul.f32 %v1684_v33, %v3948_v6  ;;  %vm1602_vm11 = vcmp.ge.f32.partialorder %v1601_v49, %v1882_v17  ;;  %v1664_v44 = vmul.f32 %v1663_v61, %v3959_v56  ;;  %vm4157_vm14 = vmxor %vm4096_vm10, %vm4328_vm1  ;;  %v1887_v61 = vld [vmem:[%s4325_s3 + $0x220] sm:$0xff] }
 0x1b8   :  { %v1696_v0 = vand.u32 2147483648, %v3978_v36  ;;  %v1750_v11 = vadd.f32 -0.050174303, %v1749_v57  ;;  %v1669_v5 = vmul.f32 %v2066_v29, %v3959_v56  ;;  %v1694_v13 = vsel %vm1693_vm4, %v3978_v36, %v1692_v34  ;;  %vm4179_vm6 = vmxor %vm1500_vm13, %vm4328_vm1  ;;  %v1891_v57 = vld [vmem:[%s4325_s3 + $0x238] sm:$0xff] }
 0x1b9   :  { %v2068_v39 = vpop.eup %2067  ;;  %v1686_v63 = vadd.f32 -0.2145988, %v1685_v55  ;;  %vm1695_vm3 = vcmp.eq.f32.partialorder %v3978_v36, 0.0  ;;  %v1363_v50 = vsel %vm1333_vm0, %v3916_v30, %v3864_v28  ;;  %v1430_v1 = vmul.f32 %v1871_v24, %v1429_v20  ;;  %v1879_v28 = vld [vmem:[%s4325_s3 + $0x1f0] sm:$0xff]  ;;  %vm4200_vm12 = vmor %vm1500_vm13, %vm4145_vm7 }
 0x1ba   :  { %vm1631_vm4 = vcmp.lt.f32.partialorder %v3696_v14, 0.0  ;;  %v1751_v16 = vmul.f32 %v1750_v11, %v3982_v26  ;;  %v1565_v30 = vsel %vm1563_vm5, %v1564_v54, %v1562_v32  ;;  %v1632_v37 = vsub.f32 3.1415927, %v1630_v42 }
 0x1bb   :  { %v1687_v41 = vmul.f32 %v1686_v63, %v3948_v6  ;;  %v1731_v3 = vsub.f32 2.0, %v3997_v52  ;;  %v1498_v40 = vmul.f32 %v1875_v38, %v1497_v22  ;;  %vm4433_vm15 = vcmp.gt.f32.partialorder %v1596_v62, %v1882_v17 }
 0x1bc   :  { %vm4208_vm5 = vmor %vm4433_vm15, %vm1602_vm11  ;;  %v1697_v7 = vsel %vm1695_vm3, %v1696_v0, %v1694_v13  ;;  %v1752_v19 = vadd.f32 0.08897899, %v1751_v16  ;;  %v1760_v31 = vmul.f32 %v2068_v39, %v4030_v4  ;;  %vm1665_vm0 = vcmp.gt.f32.partialorder %v1664_v44, %v1886_v8 }
 0x1bd   :  { %v2070_v12 = vpop.eup %2069  ;;  %vm1670_vm13 = vcmp.ge.f32.partialorder %v1669_v5, %v1886_v8  ;;  %v1688_v6 = vadd.f32 1.5707963, %v1687_v41  ;;  %vm1761_vm11 = vcmp.eq.f32.partialorder %v4030_v4, inf  ;;  %vm4436_vm15 = vmand %vm4052_vm8, %vm4079_vm2  ;;  %v1566_v18 = vmul.f32 %v1879_v28, %v1565_v30 }
 0x1be   :  { %v1431_v36 = vsel %vm4436_vm15, %v1430_v1, %v1363_v50  ;;  %vm1537_vm3 = vmand %vm4145_vm7, %vm4179_vm6  ;;  %vm1699_vm1 = vcmp.lt.f32.partialorder %v3936_v48, 0.0  ;;  %v1753_v58 = vmul.f32 %v1752_v19, %v3982_v26  ;;  %v1633_v9 = vsel %vm1631_vm4, %v1632_v37, %v1630_v42 }
 0x1bf   :  { %vm1636_vm10 = vmor %vm4200_vm12, %vm4208_vm5  ;;  %v1698_v10 = vmul.f32 %v1697_v7, %v1688_v6  ;;  %v1732_v27 = vmul.f32 %v1731_v3, %v3997_v52  ;;  %v1764_v62 = vand.u32 2147483648, %v4030_v4  ;;  %v1737_v14 = vmul.f32 %v2070_v12, %v3997_v52  ;;  %v1890_v52 = vld [vmem:[%s4325_s3 + $0x230] sm:$0xff]  ;;  %s2071_s3 = scalar_lea.vmem %s1787_s5, 128 }
 0x1c0   :  { %vm4243_vm8 = vmor %vm1665_vm0, %vm1670_vm13  ;;  %v1754_v32 = vadd.f32 -0.2145988, %v1753_v58  ;;  %v1762_v17 = vsel %vm1761_vm11, %v4030_v4, %v1760_v31  ;;  %vm1763_vm2 = vcmp.eq.f32.partialorder %v4030_v4, 0.0  ;;  %vm4440_vm15 = vmmov 1   ;;  %p2072_p0 = scmp.ne.s32.totalorder %s1787_s5, %s2071_s3  ;;  %p2077_p2 = scmp.lt.s32.totalorder %s2071_s3, %s2071_s3 }
 0x1c1   :  { %vm4439_vm4 = vmand %vm4109_vm9, %vm4157_vm14  ;;  %v1700_v49 = vsub.f32 3.1415927, %v1698_v10  ;;  %v1634_v21 = vmul.f32 %v1883_v2, %v1633_v9  ;;  %v1765_v33 = vsel %vm1763_vm2, %v1764_v62, %v1762_v17  ;;  %vm1733_vm13 = vcmp.gt.f32.partialorder %v1732_v27, %v1890_v52 }
 0x1c2   :  { %v1499_v43 = vsel %vm4439_vm4, %v1498_v40, %v1431_v36  ;;  %vm4258_vm0 = vmxor %vm4200_vm12, %vm4440_vm15  ;;  %v1755_v46 = vmul.f32 %v1754_v32, %v3982_v26  ;;  %vm1738_vm11 = vcmp.ge.f32.partialorder %v1737_v14, %v1890_v52  ;;  %vm1767_vm6 = vcmp.lt.f32.partialorder %v3964_v47, 0.0  ;;  %p2078_p3 = por %p2077_p2, %p2076_p1 }
 0x1c3   :  { %vm4271_vm9 = vmxor %vm1636_vm10, %vm4440_vm15  ;;  %v1701_v35 = vsel %vm1699_vm1, %v1700_v49, %v1698_v10  ;;  %v1567_v26 = vsel %vm1537_vm3, %v1566_v18, %v1499_v43  ;;  %v143_v22 = vmul.f32 0.6931472, %v3885_v53  ;;  %vm137_vm3 = vcmp.gt.f32.partialorder %v3235_v23, 20.0 }
 0x1c4   :  { %vm1704_vm14 = vmor %vm1636_vm10, %vm4243_vm8  ;;  %v1756_v48 = vadd.f32 1.5707963, %v1755_v46  ;;  %v1702_v34 = vmul.f32 %v1887_v61, %v1701_v35  ;;  %p2079_p4 = pnand %p2078_p3, %p2072_p0 }
 0x1c5   :  { %vm1605_vm1 = vmand %vm4208_vm5, %vm4258_vm0  ;;  %v144_v25 = vsel %vm137_vm3, %v3235_v23, %v143_v22 }
 0x1c6   :  { %vm1673_vm12 = vmand %vm4243_vm8, %vm4271_vm9  ;;  %v1766_v29 = vmul.f32 %v1765_v33, %v1756_v48  ;;  %v1635_v20 = vsel %vm1605_vm1, %v1634_v21, %v1567_v26  ;;  %vm4445_vm8 = vcmask 130048  }
 0x1c7   :  { %vm1740_vm10 = vmxor %vm1704_vm14, %vm4440_vm15  ;;  %v1703_v54 = vsel %vm1673_vm12, %v1702_v34, %v1635_v20 }
 0x1c8   :  { %vm1739_vm7 = vmor %vm1733_vm13, %vm1738_vm11  ;;  %v1768_v24 = vsub.f32 3.1415927, %v1766_v29 }
 0x1c9   :  { %vm1741_vm5 = vmand %vm1739_vm7, %vm1740_vm10 }
 0x1ca   :  { %v1769_v42 = vsel %vm1767_vm6, %v1768_v24, %v1766_v29 }
 0x1cb   :  { %v1770_v55 = vmul.f32 %v1891_v57, %v1769_v42 }
 0x1cd   :  { %v1771_v44 = vsel %vm1741_vm5, %v1770_v55, %v1703_v54 }
 0x1ce   :  { %v1772_v0 = vadd.f32 3.1415927, %v1771_v44 }
 0x1d0   :  { %v1773_v11 = vadd.f32 %v1772_v0, %v144_v25 }
 0x1d2   :  { %v1774_v39 = vmul.f32 0.15915494, %v1773_v11 }
 0x1d4   :  { %v1775_v47 = vfloor.f32 %v1774_v39 }
 0x1d6   :  { %v1776_v38 = vmul.f32 6.2831855, %v1775_v47 }
 0x1d8   :  { %v1777_v15 = vsub.f32 %v1773_v11, %v1776_v38 }
 0x1da   :  { %v1893_v5 = vadd.f32 -3.1415927, %v1777_v15 }
 0x1dc   :  { %1779 = vst.msk [vmem:[#allocation2] sm:$0xff] %vm4445_vm8, %v1893_v5 }
 0x1dd   :  { %2082 = shalt.err (!%p2079_p4)
}
 0x1de   :  { %s2083_s8 = scalar_lea.hbm %s4326_s4, 128 }
 0x1df   :  { %p2084_p5 = scmp.ne.s32.totalorder %s4326_s4, %s2083_s8  ;;  %p2087_p6 = scmp.lt.u32.totalorder %s2083_s8, %s4326_s4 }
 0x1e1   :  { %p2089_p7 = pnand %p2087_p6, %p2084_p5 }
 0x1e3   :  { %2092 = shalt.err (!%p2089_p7)
}
 0x1e4   :  { %1789 = dma.vmem_to_hbm [thread:$0]  %s1787_s5, 128, %s4326_s4, [#allocation3]  }
 0x1e5   :  { %2093 = dma.done.wait [#allocation3], 128  }
 0x1e6   :  { %2094 = vsyncadd [#allocation3], 4294967168 }
 0x1e7   :  { %1793 = vsyncpa [#allocation3], 1 }

</bundles_post_ra>
